<compile_context>
chip_gen: v7x
topology: tpu7x:2x2x1
jax: 0.10.0
libtpu: 0.0.40
codegen_flags: <defaults>
</compile_context>

<pallas_src>
import jax
import jax.numpy as jnp
from jax.experimental import pallas as pl
from jax.experimental.pallas import tpu as pltpu

# ---------------- configuration (small shapes implied by the module) --------
VOCAB = 32
EMBED = 16       # embed_size
HIDDEN = 32      # hidden_size
NUM_LAYERS = 3
B = 2
T = 8
LN_EPS = 1e-5


# ---------------- single fused kernel ----------------------------------------
def make_fused_kernel(t_len, b_sz, embed, hidden):
    E = embed
    H = hidden
    SW = 2 * H       # fused state width  [h_fwd | h_bwd]
    GW = 8 * H       # fused gate width   [i_f,i_b,f_f,f_b,g_f,g_b,o_f,o_b]
    TB = t_len * b_sz

    def layernorm(z, g, be):
        mu = jnp.mean(z, axis=-1, keepdims=True)
        var = jnp.mean((z - mu) ** 2, axis=-1, keepdims=True)
        return (z - mu) * jax.lax.rsqrt(var + LN_EPS) * g + be

    def kernel(x_ref, mask_ref, scal_ref, s0_ref, s1_ref, s2_ref,
               hA_ref, hB_ref, out_ref, yF_ref, yR_ref):
        mask = mask_ref[...]                              # [T,B,2H] fused mask
        inv_t = scal_ref[0]                               # 1 / max(x_lengths)
        b3 = scal_ref[1]                                  # final linear bias

        # Hoisted activation blend: act = scale*tanh(scale*gates) + offset
        #   'g' (tanh) lanes: 1*tanh(1*x) + 0
        #   i/f/o (sigmoid) : 0.5*tanh(0.5*x) + 0.5 == sigmoid(x)
        col = jax.lax.broadcasted_iota(jnp.int32, (b_sz, GW), 1)
        g_sel = (col >= 4 * H) & (col < 6 * H)
        scale = jnp.where(g_sel, 1.0, 0.5).astype(jnp.float32)
        offset = jnp.where(g_sel, 0.0, 0.5).astype(jnp.float32)

        def gate_inputs(xf, xr, wa, wb, bias):
            # all per-step input projections for both directions hoisted out
            # of the recurrence: one value [T*B, 8H], row block s == step s
            return (jnp.dot(xf, wa, preferred_element_type=jnp.float32) + bias
                    + jnp.dot(xr, wb, preferred_element_type=jnp.float32))

        def recurrence(g_all, whh, last):
            h = jnp.zeros((b_sz, SW), jnp.float32)
            c = jnp.zeros((b_sz, SW), jnp.float32)
            acc = jnp.zeros((b_sz, SW), jnp.float32)
            for s in range(t_len):                        # fully unrolled
                gates = (g_all[s * b_sz:(s + 1) * b_sz, :]
                         + jnp.dot(h, whh, preferred_element_type=jnp.float32))
                act = scale * jnp.tanh(gates * scale) + offset   # single tanh
                i_g = act[:, 0 * SW:1 * SW]
                f_g = act[:, 1 * SW:2 * SW]
                g_g = act[:, 2 * SW:3 * SW]
                o_g = act[:, 3 * SW:4 * SW]
                c = f_g * c + i_g * g_g
                h = o_g * jnp.tanh(c)
                m = mask[s]                               # [B, 2H]
                c = c * m
                h = h * m                                 # packed-seq padding -> 0
                if last:
                    acc = acc + h
                else:
                    # store time-aligned and time-reversed copies for the next
                    # layer's hoisted input projection (off critical path)
                    yF_ref[s * b_sz:(s + 1) * b_sz, :] = h
                    r = t_len - 1 - s
                    yR_ref[r * b_sz:(r + 1) * b_sz, :] = h
            return acc

        # ---- layer 0: input = embeddings (fwd + time-reversed stacks) ------
        xf = x_ref[0:TB, :]
        xr = x_ref[TB:2 * TB, :]
        g0 = gate_inputs(xf, xr,
                         s0_ref[0:E, :], s0_ref[E:2 * E, :],
                         s0_ref[2 * E + SW:2 * E + SW + 1, :])
        recurrence(g0, s0_ref[2 * E:2 * E + SW, :], last=False)

        # ---- layer 1 --------------------------------------------------------
        yf = yF_ref[...]
        yr = yR_ref[...]
        g1 = gate_inputs(yf, yr,
                         s1_ref[0:SW, :], s1_ref[SW:2 * SW, :],
                         s1_ref[3 * SW:3 * SW + 1, :])
        recurrence(g1, s1_ref[2 * SW:3 * SW, :], last=False)

        # ---- layer 2: only the masked time-mean is needed -------------------
        yf = yF_ref[...]
        yr = yR_ref[...]
        g2 = gate_inputs(yf, yr,
                         s2_ref[0:SW, :], s2_ref[SW:2 * SW, :],
                         s2_ref[3 * SW:3 * SW + 1, :])
        mean = recurrence(g2, s2_ref[2 * SW:3 * SW, :], last=True) * inv_t

        # ---- Conv1d(1,1,9,'same') as Toeplitz matmul; MaxPool1d(9,2,pad=4) --
        convA = hA_ref[0:SW, :]                      # [2H, 2H]
        poolM = hA_ref[SW:SW + H, :]                 # [H, 2H] additive window mask
        w1 = hA_ref[SW + H:SW + 2 * H, :]            # [H, 2H]
        vA = hA_ref[SW + 2 * H:SW + 2 * H + 4, :]    # convB | b1 | g1 | be1
        convB, b1v, g1v, be1v = vA[0:1, :], vA[1:2, :], vA[2:3, :], vA[3:4, :]

        conv = jnp.dot(mean, convA, preferred_element_type=jnp.float32) + convB
        pooled = jnp.max(conv[:, None, :] + poolM[None, :, :], axis=-1)  # [B,H]

        # ---- Linear -> LayerNorm -> ReLU (x2) -> Linear -> Sigmoid ----------
        z1 = jnp.dot(pooled, w1, preferred_element_type=jnp.float32) + b1v
        a1 = jnp.maximum(layernorm(z1, g1v, be1v), 0.0)

        w2 = hB_ref[0:SW, :]                         # [2H, H]
        vB = hB_ref[SW:SW + 4, :]                    # b2 | g2 | be2 | w3^T
        b2v, g2v, be2v, w3r = vB[0:1, :], vB[1:2, :], vB[2:3, :], vB[3:4, :]

        z2 = jnp.dot(a1, w2, preferred_element_type=jnp.float32) + b2v
        a2 = jnp.maximum(layernorm(z2, g2v, be2v), 0.0)

        logit = jnp.sum(a2 * w3r, axis=-1, keepdims=True) + b3
        out_ref[...] = jax.nn.sigmoid(logit)

    return kernel


# ---------------- one-time weight / constant packing (off per-call path) -----
def interleave_gate_cols(wf, wb, hidden):
    """[.., 4H] fwd/bwd (gate order i,f,g,o) -> [.., 8H] fused column layout
    [i_f, i_b, f_f, f_b, g_f, g_b, o_f, o_b]."""
    parts = []
    for k in range(4):
        parts.append(wf[..., k * hidden:(k + 1) * hidden])
        parts.append(wb[..., k * hidden:(k + 1) * hidden])
    return jnp.concatenate(parts, axis=-1)


def prepare_lstm_layer(lp, din, hidden):
    H = hidden
    G = 8 * H
    wih_c = interleave_gate_cols(lp['fwd']['wih'], lp['bwd']['wih'], H)  # [din,8H]
    bias_c = interleave_gate_cols(lp['fwd']['b'], lp['bwd']['b'], H)     # [1,8H]
    whh_c = jnp.concatenate(                                             # [2H,8H]
        [interleave_gate_cols(lp['fwd']['whh'], jnp.zeros_like(lp['bwd']['whh']), H),
         interleave_gate_cols(jnp.zeros_like(lp['fwd']['whh']), lp['bwd']['whh'], H)],
        axis=0)
    col = jnp.arange(G)
    fwd_col = ((col // H) % 2 == 0).astype(jnp.float32)[None, :]         # [1,8H]
    bwd_col = 1.0 - fwd_col
    if din == 2 * H:
        # input features 0:H are the previous layer's fwd outputs, H:2H bwd.
        row_fwd = (jnp.arange(din) < H).astype(jnp.float32)[:, None]
        wa = wih_c * (row_fwd * fwd_col + (1.0 - row_fwd) * bwd_col)     # applied to y_fwd
        wb = wih_c - wa                                                  # applied to y_rev
    else:
        wa = wih_c * fwd_col                                             # applied to x_fwd
        wb = wih_c * bwd_col                                             # applied to x_rev
    return wa, wb, whh_c, bias_c


def conv_toeplitz(w9, two_h):
    # conv[i] = sum_j m[j] * w9[j - i + 4]  ->  A[j, i] = w9[j - i + 4]
    j = jnp.arange(two_h)[:, None]
    i = jnp.arange(two_h)[None, :]
    d = j - i + 4
    valid = (d >= 0) & (d <= 8)
    return jnp.where(valid, jnp.take(w9, jnp.clip(d, 0, 8)), 0.0).astype(jnp.float32)


def pool_additive_mask(hidden):
    # MaxPool1d(kernel=9, stride=2, padding=4): out[i] = max conv[2i-4 : 2i+5]
    rows = jnp.arange(hidden)[:, None]
    cols = jnp.arange(2 * hidden)[None, :]
    win = jnp.abs(cols - 2 * rows) <= 4
    return jnp.where(win, 0.0, -1e30).astype(jnp.float32)   # [H, 2H]


def build_fused_mask(lengths, t_len, hidden):
    m = (jnp.arange(t_len)[:, None] < lengths[None, :]).astype(jnp.float32)  # [T,B]
    mf = jnp.broadcast_to(m[:, :, None], (t_len, m.shape[1], hidden))
    mb = jnp.broadcast_to(m[::-1, :, None], (t_len, m.shape[1], hidden))
    return jnp.concatenate([mf, mb], axis=-1)                # [T, B, 2H]


def pack_params(params):
    """Done ONCE: pack all weights into a few lane-aligned slabs."""
    H = HIDDEN
    slabs = []
    din = EMBED
    for layer in range(NUM_LAYERS):
        wa, wb, whh_c, bias_c = prepare_lstm_layer(params['lstm'][layer], din, H)
        slabs.append(jnp.concatenate([wa, wb, whh_c, bias_c],
                                     axis=0).astype(jnp.float32))
        din = 2 * H

    convA = conv_toeplitz(params['conv_w'], 2 * H)                       # [64,64]
    poolM = pool_additive_mask(H)                                        # [32,64]
    convB = jnp.broadcast_to(params['conv_b'], (1, 2 * H))               # [1,64]
    vecsA = jnp.concatenate([convB, params['b1'], params['g1'], params['be1']],
                            axis=0)                                      # [4,64]
    headA = jnp.concatenate([convA, poolM, params['w1'], vecsA],
                            axis=0).astype(jnp.float32)                  # [132,64]

    vecsB = jnp.concatenate([params['b2'], params['g2'], params['be2'],
                             params['w3'].T], axis=0)                    # [4,32]
    headB = jnp.concatenate([params['w2'], vecsB],
                            axis=0).astype(jnp.float32)                  # [68,32]

    return {'embedding': params['embedding'].astype(jnp.float32),
            'slab0': slabs[0], 'slab1': slabs[1], 'slab2': slabs[2],
            'headA': headA, 'headB': headB,
            'b3': params['b3'].reshape(()).astype(jnp.float32)}


# ---------------- parameters (deterministic, shapes from __init__) -----------
def init_params(key):
    ks = jax.random.split(key, 32)
    it = iter(ks)

    def nrm(shape, scale=0.1):
        return (scale * jax.random.normal(next(it), shape)).astype(jnp.float32)

    p = {}
    emb = nrm((VOCAB, EMBED), 0.5)
    emb = emb.at[0].set(0.0)                     # padding_idx = word2int['<PAD>']
    p['embedding'] = emb

    p['lstm'] = []
    for layer in range(NUM_LAYERS):
        din = EMBED if layer == 0 else 2 * HIDDEN
        layer_p = {}
        for d in ('fwd', 'bwd'):
            layer_p[d] = dict(
                wih=nrm((din, 4 * HIDDEN)),       # (W_ih)^T, gate order i,f,g,o
                whh=nrm((HIDDEN, 4 * HIDDEN)),    # (W_hh)^T
                b=nrm((1, 4 * HIDDEN)),           # b_ih + b_hh
            )
        p['lstm'].append(layer_p)

    p['conv_w'] = nrm((9,))
    p['conv_b'] = nrm((1, 1))
    p['w1'] = nrm((HIDDEN, 2 * HIDDEN)); p['b1'] = nrm((1, 2 * HIDDEN))
    p['g1'] = jnp.ones((1, 2 * HIDDEN), jnp.float32)
    p['be1'] = jnp.zeros((1, 2 * HIDDEN), jnp.float32)
    p['w2'] = nrm((2 * HIDDEN, HIDDEN)); p['b2'] = nrm((1, HIDDEN))
    p['g2'] = jnp.ones((1, HIDDEN), jnp.float32)
    p['be2'] = jnp.zeros((1, HIDDEN), jnp.float32)
    p['w3'] = nrm((HIDDEN, 1)); p['b3'] = nrm((1, 1))
    return p


# ---------------- full forward pass (jitted glue + one pallas_call) ----------
@jax.jit
def model2_forward(packed, x_ids, lengths):
    """packed: output of pack_params; x_ids: [B,T] int32; lengths: [B] int32."""
    b_sz, t_len = x_ids.shape
    H = HIDDEN

    emb = jnp.take(packed['embedding'], x_ids, axis=0)               # [B,T,E]
    x_tbe = jnp.transpose(emb, (1, 0, 2))                            # [T,B,E]
    x_slab = jnp.concatenate(
        [x_tbe.reshape(t_len * b_sz, EMBED),
         x_tbe[::-1].reshape(t_len * b_sz, EMBED)], axis=0)          # [2TB, E]
    mask = build_fused_mask(lengths, t_len, H)                       # [T,B,2H]

    # pad_packed_sequence length used by torch.mean — traced, not baked in.
    inv_t = 1.0 / jnp.max(lengths).astype(jnp.float32)
    scalars = jnp.stack([inv_t, packed['b3']])                       # SMEM (2,)

    kernel = make_fused_kernel(t_len, b_sz, EMBED, H)
    vmem = pl.BlockSpec(memory_space=pltpu.MemorySpace.VMEM)
    smem = pl.BlockSpec(memory_space=pltpu.MemorySpace.SMEM)

    out = pl.pallas_call(
        kernel,
        out_shape=jax.ShapeDtypeStruct((b_sz, 1), jnp.float32),
        in_specs=[vmem, vmem, smem, vmem, vmem, vmem, vmem, vmem],
        out_specs=vmem,
        scratch_shapes=[pltpu.VMEM((t_len * b_sz, 2 * H), jnp.float32),
                        pltpu.VMEM((t_len * b_sz, 2 * H), jnp.float32)],
    )(x_slab, mask, scalars,
      packed['slab0'], packed['slab1'], packed['slab2'],
      packed['headA'], packed['headB'])
    return out.reshape(b_sz, 1, 1)


# ---------------- driver ------------------------------------------------------
if __name__ == "__main__":
    word2int = {'<PAD>': 0}
    key = jax.random.PRNGKey(0)
    pkey, xkey = jax.random.split(key)
    params = init_params(pkey)
    packed = pack_params(params)     # one-time weight packing (off per-call path)

    x_lengths = [T, 5]
    lengths = jnp.asarray(x_lengths, jnp.int32)
    ids = jax.random.randint(xkey, (B, T), 1, VOCAB, dtype=jnp.int32)
    valid = jnp.arange(T)[None, :] < lengths[:, None]
    x_ids = jnp.where(valid, ids, word2int['<PAD>']).astype(jnp.int32)

    logits = model2_forward(packed, x_ids, lengths)
    logits = jax.block_until_ready(logits)
    assert logits.shape == (B, 1, 1), logits.shape
    assert bool(jnp.all(jnp.isfinite(logits)))
    print("KERNEL_OK")
</pallas_src>

<mosaic_0001>
module attributes {stable_mosaic.version = 11 : i64} {
  func.func @kernel(%arg0: memref<32x16xf32, #tpu.memory_space<vmem>>, %arg1: memref<8x2x64xf32, #tpu.memory_space<vmem>>, %arg2: memref<2xf32, #tpu.memory_space<smem>>, %arg3: memref<97x256xf32, #tpu.memory_space<vmem>>, %arg4: memref<193x256xf32, #tpu.memory_space<vmem>>, %arg5: memref<193x256xf32, #tpu.memory_space<vmem>>, %arg6: memref<132x64xf32, #tpu.memory_space<vmem>>, %arg7: memref<68x32xf32, #tpu.memory_space<vmem>>, %arg8: memref<2x1xf32, #tpu.memory_space<vmem>>, %arg9: memref<16x64xf32, #tpu.memory_space<vmem>>, %arg10: memref<16x64xf32, #tpu.memory_space<vmem>>) attributes {dimension_semantics = [], scalar_prefetch = 0 : i64, scratch_operands = 2 : i64, tpu.core_type = #tpu.core_type<tc>} {
    %c0 = arith.constant 0 : index
    %c0_0 = arith.constant 0 : index
    %c0_1 = arith.constant 0 : index
    %0 = vector.load %arg1[%c0, %c0_0, %c0_1] : memref<8x2x64xf32, #tpu.memory_space<vmem>>, vector<8x2x64xf32>
    %c0_2 = arith.constant 0 : index
    %1 = memref.load %arg2[%c0_2] : memref<2xf32, #tpu.memory_space<smem>>
    %c1 = arith.constant 1 : index
    %2 = memref.load %arg2[%c1] : memref<2xf32, #tpu.memory_space<smem>>
    %3 = tpu.iota {dimensions = array<i32: 1>} : vector<2x256xi32>
    %c128_i32 = arith.constant 128 : i32
    %4 = vector.broadcast %c128_i32 : i32 to vector<2x256xi32>
    %5 = arith.cmpi sge, %3, %4 : vector<2x256xi32>
    %c192_i32 = arith.constant 192 : i32
    %6 = vector.broadcast %c192_i32 : i32 to vector<2x256xi32>
    %7 = arith.cmpi slt, %3, %6 : vector<2x256xi32>
    %8 = arith.andi %5, %7 : vector<2x256xi1>
    %cst = arith.constant 1.000000e+00 : f32
    %cst_3 = arith.constant 5.000000e-01 : f32
    %9 = vector.broadcast %cst : f32 to vector<2x256xf32>
    %10 = vector.broadcast %cst_3 : f32 to vector<2x256xf32>
    %11 = arith.select %8, %9, %10 : vector<2x256xi1>, vector<2x256xf32>
    %cst_4 = arith.constant 0.000000e+00 : f32
    %cst_5 = arith.constant 5.000000e-01 : f32
    %12 = vector.broadcast %cst_4 : f32 to vector<2x256xf32>
    %13 = vector.broadcast %cst_5 : f32 to vector<2x256xf32>
    %14 = arith.select %8, %12, %13 : vector<2x256xi1>, vector<2x256xf32>
    %c0_6 = arith.constant 0 : index
    %c0_7 = arith.constant 0 : index
    %15 = vector.load %arg0[%c0_6, %c0_7] : memref<32x16xf32, #tpu.memory_space<vmem>>, vector<16x16xf32>
    %c16 = arith.constant 16 : index
    %c0_8 = arith.constant 0 : index
    %16 = vector.load %arg0[%c16, %c0_8] : memref<32x16xf32, #tpu.memory_space<vmem>>, vector<16x16xf32>
    %c0_9 = arith.constant 0 : index
    %c0_10 = arith.constant 0 : index
    %17 = vector.load %arg3[%c0_9, %c0_10] : memref<97x256xf32, #tpu.memory_space<vmem>>, vector<16x256xf32>
    %c16_11 = arith.constant 16 : index
    %c0_12 = arith.constant 0 : index
    %18 = vector.load %arg3[%c16_11, %c0_12] : memref<97x256xf32, #tpu.memory_space<vmem>>, vector<16x256xf32>
    %c96 = arith.constant 96 : index
    %c0_13 = arith.constant 0 : index
    %19 = vector.load %arg3[%c96, %c0_13] : memref<97x256xf32, #tpu.memory_space<vmem>>, vector<1x256xf32>
    %cst_14 = arith.constant dense<0.000000e+00> : vector<16x256xf32>
    %20 = tpu.matmul %15, %17, %cst_14 {dimension_numbers = #tpu.dot_dimension_numbers<[1], [0], [0], [1], [0, 0, 1, 1], [], []>} : vector<16x16xf32>, vector<16x256xf32>, vector<16x256xf32> -> vector<16x256xf32>
    %21 = vector.broadcast %19 : vector<1x256xf32> to vector<16x256xf32>
    %22 = arith.addf %20, %21 : vector<16x256xf32>
    %cst_15 = arith.constant dense<0.000000e+00> : vector<16x256xf32>
    %23 = tpu.matmul %16, %18, %cst_15 {dimension_numbers = #tpu.dot_dimension_numbers<[1], [0], [0], [1], [0, 0, 1, 1], [], []>} : vector<16x16xf32>, vector<16x256xf32>, vector<16x256xf32> -> vector<16x256xf32>
    %24 = arith.addf %22, %23 : vector<16x256xf32>
    %c32 = arith.constant 32 : index
    %c0_16 = arith.constant 0 : index
    %25 = vector.load %arg3[%c32, %c0_16] : memref<97x256xf32, #tpu.memory_space<vmem>>, vector<64x256xf32>
    %cst_17 = arith.constant 0.000000e+00 : f32
    %26 = vector.broadcast %cst_17 : f32 to vector<2x64xf32>
    %cst_18 = arith.constant 0.000000e+00 : f32
    %27 = vector.broadcast %cst_18 : f32 to vector<2x64xf32>
    %28 = vector.extract_strided_slice %24 {offsets = [0, 0], sizes = [2, 256], strides = [1, 1]} : vector<16x256xf32> to vector<2x256xf32>
    %cst_19 = arith.constant dense<0.000000e+00> : vector<2x256xf32>
    %29 = tpu.matmul %26, %25, %cst_19 {dimension_numbers = #tpu.dot_dimension_numbers<[1], [0], [0], [1], [0, 0, 1, 1], [], []>} : vector<2x64xf32>, vector<64x256xf32>, vector<2x256xf32> -> vector<2x256xf32>
    %30 = arith.addf %28, %29 : vector<2x256xf32>
    %31 = arith.mulf %30, %11 : vector<2x256xf32>
    %32 = math.tanh %31 : vector<2x256xf32>
    %33 = arith.mulf %11, %32 : vector<2x256xf32>
    %34 = arith.addf %33, %14 : vector<2x256xf32>
    %35 = vector.extract_strided_slice %34 {offsets = [0, 0], sizes = [2, 64], strides = [1, 1]} : vector<2x256xf32> to vector<2x64xf32>
    %36 = vector.extract_strided_slice %34 {offsets = [0, 64], sizes = [2, 64], strides = [1, 1]} : vector<2x256xf32> to vector<2x64xf32>
    %37 = vector.extract_strided_slice %34 {offsets = [0, 128], sizes = [2, 64], strides = [1, 1]} : vector<2x256xf32> to vector<2x64xf32>
    %38 = vector.extract_strided_slice %34 {offsets = [0, 192], sizes = [2, 64], strides = [1, 1]} : vector<2x256xf32> to vector<2x64xf32>
    %39 = arith.mulf %36, %27 : vector<2x64xf32>
    %40 = arith.mulf %35, %37 : vector<2x64xf32>
    %41 = arith.addf %39, %40 : vector<2x64xf32>
    %42 = math.tanh %41 : vector<2x64xf32>
    %43 = arith.mulf %38, %42 : vector<2x64xf32>
    %44 = vector.extract_strided_slice %0 {offsets = [0, 0, 0], sizes = [1, 2, 64], strides = [1, 1, 1]} : vector<8x2x64xf32> to vector<1x2x64xf32>
    %45 = vector.shape_cast %44 : vector<1x2x64xf32> to vector<2x64xf32>
    %46 = arith.mulf %41, %45 : vector<2x64xf32>
    %47 = arith.mulf %43, %45 : vector<2x64xf32>
    %c0_20 = arith.constant 0 : index
    %c0_21 = arith.constant 0 : index
    %48 = vector.load %arg9[%c0_20, %c0_21] : memref<16x64xf32, #tpu.memory_space<vmem>>, vector<2x64xf32>
    tpu.vector_store %arg9[%c0_20, %c0_21], %47 {strides = array<i32>} : memref<16x64xf32, #tpu.memory_space<vmem>>, vector<2x64xf32>,
    %c14 = arith.constant 14 : index
    %c0_22 = arith.constant 0 : index
    %49 = vector.load %arg10[%c14, %c0_22] : memref<16x64xf32, #tpu.memory_space<vmem>>, vector<2x64xf32>
    tpu.vector_store %arg10[%c14, %c0_22], %47 {strides = array<i32>} : memref<16x64xf32, #tpu.memory_space<vmem>>, vector<2x64xf32>,
    %50 = vector.extract_strided_slice %24 {offsets = [2, 0], sizes = [2, 256], strides = [1, 1]} : vector<16x256xf32> to vector<2x256xf32>
    %cst_23 = arith.constant dense<0.000000e+00> : vector<2x256xf32>
    %51 = tpu.matmul %47, %25, %cst_23 {dimension_numbers = #tpu.dot_dimension_numbers<[1], [0], [0], [1], [0, 0, 1, 1], [], []>} : vector<2x64xf32>, vector<64x256xf32>, vector<2x256xf32> -> vector<2x256xf32>
    %52 = arith.addf %50, %51 : vector<2x256xf32>
    %53 = arith.mulf %52, %11 : vector<2x256xf32>
    %54 = math.tanh %53 : vector<2x256xf32>
    %55 = arith.mulf %11, %54 : vector<2x256xf32>
    %56 = arith.addf %55, %14 : vector<2x256xf32>
    %57 = vector.extract_strided_slice %56 {offsets = [0, 0], sizes = [2, 64], strides = [1, 1]} : vector<2x256xf32> to vector<2x64xf32>
    %58 = vector.extract_strided_slice %56 {offsets = [0, 64], sizes = [2, 64], strides = [1, 1]} : vector<2x256xf32> to vector<2x64xf32>
    %59 = vector.extract_strided_slice %56 {offsets = [0, 128], sizes = [2, 64], strides = [1, 1]} : vector<2x256xf32> to vector<2x64xf32>
    %60 = vector.extract_strided_slice %56 {offsets = [0, 192], sizes = [2, 64], strides = [1, 1]} : vector<2x256xf32> to vector<2x64xf32>
    %61 = arith.mulf %58, %46 : vector<2x64xf32>
    %62 = arith.mulf %57, %59 : vector<2x64xf32>
    %63 = arith.addf %61, %62 : vector<2x64xf32>
    %64 = math.tanh %63 : vector<2x64xf32>
    %65 = arith.mulf %60, %64 : vector<2x64xf32>
    %66 = vector.extract_strided_slice %0 {offsets = [1, 0, 0], sizes = [1, 2, 64], strides = [1, 1, 1]} : vector<8x2x64xf32> to vector<1x2x64xf32>
    %67 = vector.shape_cast %66 : vector<1x2x64xf32> to vector<2x64xf32>
    %68 = arith.mulf %63, %67 : vector<2x64xf32>
    %69 = arith.mulf %65, %67 : vector<2x64xf32>
    %c2 = arith.constant 2 : index
    %c0_24 = arith.constant 0 : index
    %70 = vector.load %arg9[%c2, %c0_24] : memref<16x64xf32, #tpu.memory_space<vmem>>, vector<2x64xf32>
    tpu.vector_store %arg9[%c2, %c0_24], %69 {strides = array<i32>} : memref<16x64xf32, #tpu.memory_space<vmem>>, vector<2x64xf32>,
    %c12 = arith.constant 12 : index
    %c0_25 = arith.constant 0 : index
    %71 = vector.load %arg10[%c12, %c0_25] : memref<16x64xf32, #tpu.memory_space<vmem>>, vector<2x64xf32>
    tpu.vector_store %arg10[%c12, %c0_25], %69 {strides = array<i32>} : memref<16x64xf32, #tpu.memory_space<vmem>>, vector<2x64xf32>,
    %72 = vector.extract_strided_slice %24 {offsets = [4, 0], sizes = [2, 256], strides = [1, 1]} : vector<16x256xf32> to vector<2x256xf32>
    %cst_26 = arith.constant dense<0.000000e+00> : vector<2x256xf32>
    %73 = tpu.matmul %69, %25, %cst_26 {dimension_numbers = #tpu.dot_dimension_numbers<[1], [0], [0], [1], [0, 0, 1, 1], [], []>} : vector<2x64xf32>, vector<64x256xf32>, vector<2x256xf32> -> vector<2x256xf32>
    %74 = arith.addf %72, %73 : vector<2x256xf32>
    %75 = arith.mulf %74, %11 : vector<2x256xf32>
    %76 = math.tanh %75 : vector<2x256xf32>
    %77 = arith.mulf %11, %76 : vector<2x256xf32>
    %78 = arith.addf %77, %14 : vector<2x256xf32>
    %79 = vector.extract_strided_slice %78 {offsets = [0, 0], sizes = [2, 64], strides = [1, 1]} : vector<2x256xf32> to vector<2x64xf32>
    %80 = vector.extract_strided_slice %78 {offsets = [0, 64], sizes = [2, 64], strides = [1, 1]} : vector<2x256xf32> to vector<2x64xf32>
    %81 = vector.extract_strided_slice %78 {offsets = [0, 128], sizes = [2, 64], strides = [1, 1]} : vector<2x256xf32> to vector<2x64xf32>
    %82 = vector.extract_strided_slice %78 {offsets = [0, 192], sizes = [2, 64], strides = [1, 1]} : vector<2x256xf32> to vector<2x64xf32>
    %83 = arith.mulf %80, %68 : vector<2x64xf32>
    %84 = arith.mulf %79, %81 : vector<2x64xf32>
    %85 = arith.addf %83, %84 : vector<2x64xf32>
    %86 = math.tanh %85 : vector<2x64xf32>
    %87 = arith.mulf %82, %86 : vector<2x64xf32>
    %88 = vector.extract_strided_slice %0 {offsets = [2, 0, 0], sizes = [1, 2, 64], strides = [1, 1, 1]} : vector<8x2x64xf32> to vector<1x2x64xf32>
    %89 = vector.shape_cast %88 : vector<1x2x64xf32> to vector<2x64xf32>
    %90 = arith.mulf %85, %89 : vector<2x64xf32>
    %91 = arith.mulf %87, %89 : vector<2x64xf32>
    %c4 = arith.constant 4 : index
    %c0_27 = arith.constant 0 : index
    %92 = vector.load %arg9[%c4, %c0_27] : memref<16x64xf32, #tpu.memory_space<vmem>>, vector<2x64xf32>
    tpu.vector_store %arg9[%c4, %c0_27], %91 {strides = array<i32>} : memref<16x64xf32, #tpu.memory_space<vmem>>, vector<2x64xf32>,
    %c10 = arith.constant 10 : index
    %c0_28 = arith.constant 0 : index
    %93 = vector.load %arg10[%c10, %c0_28] : memref<16x64xf32, #tpu.memory_space<vmem>>, vector<2x64xf32>
    tpu.vector_store %arg10[%c10, %c0_28], %91 {strides = array<i32>} : memref<16x64xf32, #tpu.memory_space<vmem>>, vector<2x64xf32>,
    %94 = vector.extract_strided_slice %24 {offsets = [6, 0], sizes = [2, 256], strides = [1, 1]} : vector<16x256xf32> to vector<2x256xf32>
    %cst_29 = arith.constant dense<0.000000e+00> : vector<2x256xf32>
    %95 = tpu.matmul %91, %25, %cst_29 {dimension_numbers = #tpu.dot_dimension_numbers<[1], [0], [0], [1], [0, 0, 1, 1], [], []>} : vector<2x64xf32>, vector<64x256xf32>, vector<2x256xf32> -> vector<2x256xf32>
    %96 = arith.addf %94, %95 : vector<2x256xf32>
    %97 = arith.mulf %96, %11 : vector<2x256xf32>
    %98 = math.tanh %97 : vector<2x256xf32>
    %99 = arith.mulf %11, %98 : vector<2x256xf32>
    %100 = arith.addf %99, %14 : vector<2x256xf32>
    %101 = vector.extract_strided_slice %100 {offsets = [0, 0], sizes = [2, 64], strides = [1, 1]} : vector<2x256xf32> to vector<2x64xf32>
    %102 = vector.extract_strided_slice %100 {offsets = [0, 64], sizes = [2, 64], strides = [1, 1]} : vector<2x256xf32> to vector<2x64xf32>
    %103 = vector.extract_strided_slice %100 {offsets = [0, 128], sizes = [2, 64], strides = [1, 1]} : vector<2x256xf32> to vector<2x64xf32>
    %104 = vector.extract_strided_slice %100 {offsets = [0, 192], sizes = [2, 64], strides = [1, 1]} : vector<2x256xf32> to vector<2x64xf32>
    %105 = arith.mulf %102, %90 : vector<2x64xf32>
    %106 = arith.mulf %101, %103 : vector<2x64xf32>
    %107 = arith.addf %105, %106 : vector<2x64xf32>
    %108 = math.tanh %107 : vector<2x64xf32>
    %109 = arith.mulf %104, %108 : vector<2x64xf32>
    %110 = vector.extract_strided_slice %0 {offsets = [3, 0, 0], sizes = [1, 2, 64], strides = [1, 1, 1]} : vector<8x2x64xf32> to vector<1x2x64xf32>
    %111 = vector.shape_cast %110 : vector<1x2x64xf32> to vector<2x64xf32>
    %112 = arith.mulf %107, %111 : vector<2x64xf32>
    %113 = arith.mulf %109, %111 : vector<2x64xf32>
    %c6 = arith.constant 6 : index
    %c0_30 = arith.constant 0 : index
    %114 = vector.load %arg9[%c6, %c0_30] : memref<16x64xf32, #tpu.memory_space<vmem>>, vector<2x64xf32>
    tpu.vector_store %arg9[%c6, %c0_30], %113 {strides = array<i32>} : memref<16x64xf32, #tpu.memory_space<vmem>>, vector<2x64xf32>,
    %c8 = arith.constant 8 : index
    %c0_31 = arith.constant 0 : index
    %115 = vector.load %arg10[%c8, %c0_31] : memref<16x64xf32, #tpu.memory_space<vmem>>, vector<2x64xf32>
    tpu.vector_store %arg10[%c8, %c0_31], %113 {strides = array<i32>} : memref<16x64xf32, #tpu.memory_space<vmem>>, vector<2x64xf32>,
    %116 = vector.extract_strided_slice %24 {offsets = [8, 0], sizes = [2, 256], strides = [1, 1]} : vector<16x256xf32> to vector<2x256xf32>
    %cst_32 = arith.constant dense<0.000000e+00> : vector<2x256xf32>
    %117 = tpu.matmul %113, %25, %cst_32 {dimension_numbers = #tpu.dot_dimension_numbers<[1], [0], [0], [1], [0, 0, 1, 1], [], []>} : vector<2x64xf32>, vector<64x256xf32>, vector<2x256xf32> -> vector<2x256xf32>
    %118 = arith.addf %116, %117 : vector<2x256xf32>
    %119 = arith.mulf %118, %11 : vector<2x256xf32>
    %120 = math.tanh %119 : vector<2x256xf32>
    %121 = arith.mulf %11, %120 : vector<2x256xf32>
    %122 = arith.addf %121, %14 : vector<2x256xf32>
    %123 = vector.extract_strided_slice %122 {offsets = [0, 0], sizes = [2, 64], strides = [1, 1]} : vector<2x256xf32> to vector<2x64xf32>
    %124 = vector.extract_strided_slice %122 {offsets = [0, 64], sizes = [2, 64], strides = [1, 1]} : vector<2x256xf32> to vector<2x64xf32>
    %125 = vector.extract_strided_slice %122 {offsets = [0, 128], sizes = [2, 64], strides = [1, 1]} : vector<2x256xf32> to vector<2x64xf32>
    %126 = vector.extract_strided_slice %122 {offsets = [0, 192], sizes = [2, 64], strides = [1, 1]} : vector<2x256xf32> to vector<2x64xf32>
    %127 = arith.mulf %124, %112 : vector<2x64xf32>
    %128 = arith.mulf %123, %125 : vector<2x64xf32>
    %129 = arith.addf %127, %128 : vector<2x64xf32>
    %130 = math.tanh %129 : vector<2x64xf32>
    %131 = arith.mulf %126, %130 : vector<2x64xf32>
    %132 = vector.extract_strided_slice %0 {offsets = [4, 0, 0], sizes = [1, 2, 64], strides = [1, 1, 1]} : vector<8x2x64xf32> to vector<1x2x64xf32>
    %133 = vector.shape_cast %132 : vector<1x2x64xf32> to vector<2x64xf32>
    %134 = arith.mulf %129, %133 : vector<2x64xf32>
    %135 = arith.mulf %131, %133 : vector<2x64xf32>
    %c8_33 = arith.constant 8 : index
    %c0_34 = arith.constant 0 : index
    %136 = vector.load %arg9[%c8_33, %c0_34] : memref<16x64xf32, #tpu.memory_space<vmem>>, vector<2x64xf32>
    tpu.vector_store %arg9[%c8_33, %c0_34], %135 {strides = array<i32>} : memref<16x64xf32, #tpu.memory_space<vmem>>, vector<2x64xf32>,
    %c6_35 = arith.constant 6 : index
    %c0_36 = arith.constant 0 : index
    %137 = vector.load %arg10[%c6_35, %c0_36] : memref<16x64xf32, #tpu.memory_space<vmem>>, vector<2x64xf32>
    tpu.vector_store %arg10[%c6_35, %c0_36], %135 {strides = array<i32>} : memref<16x64xf32, #tpu.memory_space<vmem>>, vector<2x64xf32>,
    %138 = vector.extract_strided_slice %24 {offsets = [10, 0], sizes = [2, 256], strides = [1, 1]} : vector<16x256xf32> to vector<2x256xf32>
    %cst_37 = arith.constant dense<0.000000e+00> : vector<2x256xf32>
    %139 = tpu.matmul %135, %25, %cst_37 {dimension_numbers = #tpu.dot_dimension_numbers<[1], [0], [0], [1], [0, 0, 1, 1], [], []>} : vector<2x64xf32>, vector<64x256xf32>, vector<2x256xf32> -> vector<2x256xf32>
    %140 = arith.addf %138, %139 : vector<2x256xf32>
    %141 = arith.mulf %140, %11 : vector<2x256xf32>
    %142 = math.tanh %141 : vector<2x256xf32>
    %143 = arith.mulf %11, %142 : vector<2x256xf32>
    %144 = arith.addf %143, %14 : vector<2x256xf32>
    %145 = vector.extract_strided_slice %144 {offsets = [0, 0], sizes = [2, 64], strides = [1, 1]} : vector<2x256xf32> to vector<2x64xf32>
    %146 = vector.extract_strided_slice %144 {offsets = [0, 64], sizes = [2, 64], strides = [1, 1]} : vector<2x256xf32> to vector<2x64xf32>
    %147 = vector.extract_strided_slice %144 {offsets = [0, 128], sizes = [2, 64], strides = [1, 1]} : vector<2x256xf32> to vector<2x64xf32>
    %148 = vector.extract_strided_slice %144 {offsets = [0, 192], sizes = [2, 64], strides = [1, 1]} : vector<2x256xf32> to vector<2x64xf32>
    %149 = arith.mulf %146, %134 : vector<2x64xf32>
    %150 = arith.mulf %145, %147 : vector<2x64xf32>
    %151 = arith.addf %149, %150 : vector<2x64xf32>
    %152 = math.tanh %151 : vector<2x64xf32>
    %153 = arith.mulf %148, %152 : vector<2x64xf32>
    %154 = vector.extract_strided_slice %0 {offsets = [5, 0, 0], sizes = [1, 2, 64], strides = [1, 1, 1]} : vector<8x2x64xf32> to vector<1x2x64xf32>
    %155 = vector.shape_cast %154 : vector<1x2x64xf32> to vector<2x64xf32>
    %156 = arith.mulf %151, %155 : vector<2x64xf32>
    %157 = arith.mulf %153, %155 : vector<2x64xf32>
    %c10_38 = arith.constant 10 : index
    %c0_39 = arith.constant 0 : index
    %158 = vector.load %arg9[%c10_38, %c0_39] : memref<16x64xf32, #tpu.memory_space<vmem>>, vector<2x64xf32>
    tpu.vector_store %arg9[%c10_38, %c0_39], %157 {strides = array<i32>} : memref<16x64xf32, #tpu.memory_space<vmem>>, vector<2x64xf32>,
    %c4_40 = arith.constant 4 : index
    %c0_41 = arith.constant 0 : index
    %159 = vector.load %arg10[%c4_40, %c0_41] : memref<16x64xf32, #tpu.memory_space<vmem>>, vector<2x64xf32>
    tpu.vector_store %arg10[%c4_40, %c0_41], %157 {strides = array<i32>} : memref<16x64xf32, #tpu.memory_space<vmem>>, vector<2x64xf32>,
    %160 = vector.extract_strided_slice %24 {offsets = [12, 0], sizes = [2, 256], strides = [1, 1]} : vector<16x256xf32> to vector<2x256xf32>
    %cst_42 = arith.constant dense<0.000000e+00> : vector<2x256xf32>
    %161 = tpu.matmul %157, %25, %cst_42 {dimension_numbers = #tpu.dot_dimension_numbers<[1], [0], [0], [1], [0, 0, 1, 1], [], []>} : vector<2x64xf32>, vector<64x256xf32>, vector<2x256xf32> -> vector<2x256xf32>
    %162 = arith.addf %160, %161 : vector<2x256xf32>
    %163 = arith.mulf %162, %11 : vector<2x256xf32>
    %164 = math.tanh %163 : vector<2x256xf32>
    %165 = arith.mulf %11, %164 : vector<2x256xf32>
    %166 = arith.addf %165, %14 : vector<2x256xf32>
    %167 = vector.extract_strided_slice %166 {offsets = [0, 0], sizes = [2, 64], strides = [1, 1]} : vector<2x256xf32> to vector<2x64xf32>
    %168 = vector.extract_strided_slice %166 {offsets = [0, 64], sizes = [2, 64], strides = [1, 1]} : vector<2x256xf32> to vector<2x64xf32>
    %169 = vector.extract_strided_slice %166 {offsets = [0, 128], sizes = [2, 64], strides = [1, 1]} : vector<2x256xf32> to vector<2x64xf32>
    %170 = vector.extract_strided_slice %166 {offsets = [0, 192], sizes = [2, 64], strides = [1, 1]} : vector<2x256xf32> to vector<2x64xf32>
    %171 = arith.mulf %168, %156 : vector<2x64xf32>
    %172 = arith.mulf %167, %169 : vector<2x64xf32>
    %173 = arith.addf %171, %172 : vector<2x64xf32>
    %174 = math.tanh %173 : vector<2x64xf32>
    %175 = arith.mulf %170, %174 : vector<2x64xf32>
    %176 = vector.extract_strided_slice %0 {offsets = [6, 0, 0], sizes = [1, 2, 64], strides = [1, 1, 1]} : vector<8x2x64xf32> to vector<1x2x64xf32>
    %177 = vector.shape_cast %176 : vector<1x2x64xf32> to vector<2x64xf32>
    %178 = arith.mulf %173, %177 : vector<2x64xf32>
    %179 = arith.mulf %175, %177 : vector<2x64xf32>
    %c12_43 = arith.constant 12 : index
    %c0_44 = arith.constant 0 : index
    %180 = vector.load %arg9[%c12_43, %c0_44] : memref<16x64xf32, #tpu.memory_space<vmem>>, vector<2x64xf32>
    tpu.vector_store %arg9[%c12_43, %c0_44], %179 {strides = array<i32>} : memref<16x64xf32, #tpu.memory_space<vmem>>, vector<2x64xf32>,
    %c2_45 = arith.constant 2 : index
    %c0_46 = arith.constant 0 : index
    %181 = vector.load %arg10[%c2_45, %c0_46] : memref<16x64xf32, #tpu.memory_space<vmem>>, vector<2x64xf32>
    tpu.vector_store %arg10[%c2_45, %c0_46], %179 {strides = array<i32>} : memref<16x64xf32, #tpu.memory_space<vmem>>, vector<2x64xf32>,
    %182 = vector.extract_strided_slice %24 {offsets = [14, 0], sizes = [2, 256], strides = [1, 1]} : vector<16x256xf32> to vector<2x256xf32>
    %cst_47 = arith.constant dense<0.000000e+00> : vector<2x256xf32>
    %183 = tpu.matmul %179, %25, %cst_47 {dimension_numbers = #tpu.dot_dimension_numbers<[1], [0], [0], [1], [0, 0, 1, 1], [], []>} : vector<2x64xf32>, vector<64x256xf32>, vector<2x256xf32> -> vector<2x256xf32>
    %184 = arith.addf %182, %183 : vector<2x256xf32>
    %185 = arith.mulf %184, %11 : vector<2x256xf32>
    %186 = math.tanh %185 : vector<2x256xf32>
    %187 = arith.mulf %11, %186 : vector<2x256xf32>
    %188 = arith.addf %187, %14 : vector<2x256xf32>
    %189 = vector.extract_strided_slice %188 {offsets = [0, 0], sizes = [2, 64], strides = [1, 1]} : vector<2x256xf32> to vector<2x64xf32>
    %190 = vector.extract_strided_slice %188 {offsets = [0, 64], sizes = [2, 64], strides = [1, 1]} : vector<2x256xf32> to vector<2x64xf32>
    %191 = vector.extract_strided_slice %188 {offsets = [0, 128], sizes = [2, 64], strides = [1, 1]} : vector<2x256xf32> to vector<2x64xf32>
    %192 = vector.extract_strided_slice %188 {offsets = [0, 192], sizes = [2, 64], strides = [1, 1]} : vector<2x256xf32> to vector<2x64xf32>
    %193 = arith.mulf %190, %178 : vector<2x64xf32>
    %194 = arith.mulf %189, %191 : vector<2x64xf32>
    %195 = arith.addf %193, %194 : vector<2x64xf32>
    %196 = math.tanh %195 : vector<2x64xf32>
    %197 = arith.mulf %192, %196 : vector<2x64xf32>
    %198 = vector.extract_strided_slice %0 {offsets = [7, 0, 0], sizes = [1, 2, 64], strides = [1, 1, 1]} : vector<8x2x64xf32> to vector<1x2x64xf32>
    %199 = vector.shape_cast %198 : vector<1x2x64xf32> to vector<2x64xf32>
    %200 = arith.mulf %197, %199 : vector<2x64xf32>
    %c14_48 = arith.constant 14 : index
    %c0_49 = arith.constant 0 : index
    %201 = vector.load %arg9[%c14_48, %c0_49] : memref<16x64xf32, #tpu.memory_space<vmem>>, vector<2x64xf32>
    tpu.vector_store %arg9[%c14_48, %c0_49], %200 {strides = array<i32>} : memref<16x64xf32, #tpu.memory_space<vmem>>, vector<2x64xf32>,
    %c0_50 = arith.constant 0 : index
    %c0_51 = arith.constant 0 : index
    %202 = vector.load %arg10[%c0_50, %c0_51] : memref<16x64xf32, #tpu.memory_space<vmem>>, vector<2x64xf32>
    tpu.vector_store %arg10[%c0_50, %c0_51], %200 {strides = array<i32>} : memref<16x64xf32, #tpu.memory_space<vmem>>, vector<2x64xf32>,
    %c0_52 = arith.constant 0 : index
    %c0_53 = arith.constant 0 : index
    %203 = vector.load %arg9[%c0_52, %c0_53] : memref<16x64xf32, #tpu.memory_space<vmem>>, vector<16x64xf32>
    %c0_54 = arith.constant 0 : index
    %c0_55 = arith.constant 0 : index
    %204 = vector.load %arg10[%c0_54, %c0_55] : memref<16x64xf32, #tpu.memory_space<vmem>>, vector<16x64xf32>
    %c0_56 = arith.constant 0 : index
    %c0_57 = arith.constant 0 : index
    %205 = vector.load %arg4[%c0_56, %c0_57] : memref<193x256xf32, #tpu.memory_space<vmem>>, vector<64x256xf32>
    %c64 = arith.constant 64 : index
    %c0_58 = arith.constant 0 : index
    %206 = vector.load %arg4[%c64, %c0_58] : memref<193x256xf32, #tpu.memory_space<vmem>>, vector<64x256xf32>
    %c192 = arith.constant 192 : index
    %c0_59 = arith.constant 0 : index
    %207 = vector.load %arg4[%c192, %c0_59] : memref<193x256xf32, #tpu.memory_space<vmem>>, vector<1x256xf32>
    %cst_60 = arith.constant dense<0.000000e+00> : vector<16x256xf32>
    %208 = tpu.matmul %203, %205, %cst_60 {dimension_numbers = #tpu.dot_dimension_numbers<[1], [0], [0], [1], [0, 0, 1, 1], [], []>} : vector<16x64xf32>, vector<64x256xf32>, vector<16x256xf32> -> vector<16x256xf32>
    %209 = vector.broadcast %207 : vector<1x256xf32> to vector<16x256xf32>
    %210 = arith.addf %208, %209 : vector<16x256xf32>
    %cst_61 = arith.constant dense<0.000000e+00> : vector<16x256xf32>
    %211 = tpu.matmul %204, %206, %cst_61 {dimension_numbers = #tpu.dot_dimension_numbers<[1], [0], [0], [1], [0, 0, 1, 1], [], []>} : vector<16x64xf32>, vector<64x256xf32>, vector<16x256xf32> -> vector<16x256xf32>
    %212 = arith.addf %210, %211 : vector<16x256xf32>
    %c128 = arith.constant 128 : index
    %c0_62 = arith.constant 0 : index
    %213 = vector.load %arg4[%c128, %c0_62] : memref<193x256xf32, #tpu.memory_space<vmem>>, vector<64x256xf32>
    %cst_63 = arith.constant 0.000000e+00 : f32
    %214 = vector.broadcast %cst_63 : f32 to vector<2x64xf32>
    %cst_64 = arith.constant 0.000000e+00 : f32
    %215 = vector.broadcast %cst_64 : f32 to vector<2x64xf32>
    %216 = vector.extract_strided_slice %212 {offsets = [0, 0], sizes = [2, 256], strides = [1, 1]} : vector<16x256xf32> to vector<2x256xf32>
    %cst_65 = arith.constant dense<0.000000e+00> : vector<2x256xf32>
    %217 = tpu.matmul %214, %213, %cst_65 {dimension_numbers = #tpu.dot_dimension_numbers<[1], [0], [0], [1], [0, 0, 1, 1], [], []>} : vector<2x64xf32>, vector<64x256xf32>, vector<2x256xf32> -> vector<2x256xf32>
    %218 = arith.addf %216, %217 : vector<2x256xf32>
    %219 = arith.mulf %218, %11 : vector<2x256xf32>
    %220 = math.tanh %219 : vector<2x256xf32>
    %221 = arith.mulf %11, %220 : vector<2x256xf32>
    %222 = arith.addf %221, %14 : vector<2x256xf32>
    %223 = vector.extract_strided_slice %222 {offsets = [0, 0], sizes = [2, 64], strides = [1, 1]} : vector<2x256xf32> to vector<2x64xf32>
    %224 = vector.extract_strided_slice %222 {offsets = [0, 64], sizes = [2, 64], strides = [1, 1]} : vector<2x256xf32> to vector<2x64xf32>
    %225 = vector.extract_strided_slice %222 {offsets = [0, 128], sizes = [2, 64], strides = [1, 1]} : vector<2x256xf32> to vector<2x64xf32>
    %226 = vector.extract_strided_slice %222 {offsets = [0, 192], sizes = [2, 64], strides = [1, 1]} : vector<2x256xf32> to vector<2x64xf32>
    %227 = arith.mulf %224, %215 : vector<2x64xf32>
    %228 = arith.mulf %223, %225 : vector<2x64xf32>
    %229 = arith.addf %227, %228 : vector<2x64xf32>
    %230 = math.tanh %229 : vector<2x64xf32>
    %231 = arith.mulf %226, %230 : vector<2x64xf32>
    %232 = vector.extract_strided_slice %0 {offsets = [0, 0, 0], sizes = [1, 2, 64], strides = [1, 1, 1]} : vector<8x2x64xf32> to vector<1x2x64xf32>
    %233 = vector.shape_cast %232 : vector<1x2x64xf32> to vector<2x64xf32>
    %234 = arith.mulf %229, %233 : vector<2x64xf32>
    %235 = arith.mulf %231, %233 : vector<2x64xf32>
    %c0_66 = arith.constant 0 : index
    %c0_67 = arith.constant 0 : index
    %236 = vector.load %arg9[%c0_66, %c0_67] : memref<16x64xf32, #tpu.memory_space<vmem>>, vector<2x64xf32>
    tpu.vector_store %arg9[%c0_66, %c0_67], %235 {strides = array<i32>} : memref<16x64xf32, #tpu.memory_space<vmem>>, vector<2x64xf32>,
    %c14_68 = arith.constant 14 : index
    %c0_69 = arith.constant 0 : index
    %237 = vector.load %arg10[%c14_68, %c0_69] : memref<16x64xf32, #tpu.memory_space<vmem>>, vector<2x64xf32>
    tpu.vector_store %arg10[%c14_68, %c0_69], %235 {strides = array<i32>} : memref<16x64xf32, #tpu.memory_space<vmem>>, vector<2x64xf32>,
    %238 = vector.extract_strided_slice %212 {offsets = [2, 0], sizes = [2, 256], strides = [1, 1]} : vector<16x256xf32> to vector<2x256xf32>
    %cst_70 = arith.constant dense<0.000000e+00> : vector<2x256xf32>
    %239 = tpu.matmul %235, %213, %cst_70 {dimension_numbers = #tpu.dot_dimension_numbers<[1], [0], [0], [1], [0, 0, 1, 1], [], []>} : vector<2x64xf32>, vector<64x256xf32>, vector<2x256xf32> -> vector<2x256xf32>
    %240 = arith.addf %238, %239 : vector<2x256xf32>
    %241 = arith.mulf %240, %11 : vector<2x256xf32>
    %242 = math.tanh %241 : vector<2x256xf32>
    %243 = arith.mulf %11, %242 : vector<2x256xf32>
    %244 = arith.addf %243, %14 : vector<2x256xf32>
    %245 = vector.extract_strided_slice %244 {offsets = [0, 0], sizes = [2, 64], strides = [1, 1]} : vector<2x256xf32> to vector<2x64xf32>
    %246 = vector.extract_strided_slice %244 {offsets = [0, 64], sizes = [2, 64], strides = [1, 1]} : vector<2x256xf32> to vector<2x64xf32>
    %247 = vector.extract_strided_slice %244 {offsets = [0, 128], sizes = [2, 64], strides = [1, 1]} : vector<2x256xf32> to vector<2x64xf32>
    %248 = vector.extract_strided_slice %244 {offsets = [0, 192], sizes = [2, 64], strides = [1, 1]} : vector<2x256xf32> to vector<2x64xf32>
    %249 = arith.mulf %246, %234 : vector<2x64xf32>
    %250 = arith.mulf %245, %247 : vector<2x64xf32>
    %251 = arith.addf %249, %250 : vector<2x64xf32>
    %252 = math.tanh %251 : vector<2x64xf32>
    %253 = arith.mulf %248, %252 : vector<2x64xf32>
    %254 = vector.extract_strided_slice %0 {offsets = [1, 0, 0], sizes = [1, 2, 64], strides = [1, 1, 1]} : vector<8x2x64xf32> to vector<1x2x64xf32>
    %255 = vector.shape_cast %254 : vector<1x2x64xf32> to vector<2x64xf32>
    %256 = arith.mulf %251, %255 : vector<2x64xf32>
    %257 = arith.mulf %253, %255 : vector<2x64xf32>
    %c2_71 = arith.constant 2 : index
    %c0_72 = arith.constant 0 : index
    %258 = vector.load %arg9[%c2_71, %c0_72] : memref<16x64xf32, #tpu.memory_space<vmem>>, vector<2x64xf32>
    tpu.vector_store %arg9[%c2_71, %c0_72], %257 {strides = array<i32>} : memref<16x64xf32, #tpu.memory_space<vmem>>, vector<2x64xf32>,
    %c12_73 = arith.constant 12 : index
    %c0_74 = arith.constant 0 : index
    %259 = vector.load %arg10[%c12_73, %c0_74] : memref<16x64xf32, #tpu.memory_space<vmem>>, vector<2x64xf32>
    tpu.vector_store %arg10[%c12_73, %c0_74], %257 {strides = array<i32>} : memref<16x64xf32, #tpu.memory_space<vmem>>, vector<2x64xf32>,
    %260 = vector.extract_strided_slice %212 {offsets = [4, 0], sizes = [2, 256], strides = [1, 1]} : vector<16x256xf32> to vector<2x256xf32>
    %cst_75 = arith.constant dense<0.000000e+00> : vector<2x256xf32>
    %261 = tpu.matmul %257, %213, %cst_75 {dimension_numbers = #tpu.dot_dimension_numbers<[1], [0], [0], [1], [0, 0, 1, 1], [], []>} : vector<2x64xf32>, vector<64x256xf32>, vector<2x256xf32> -> vector<2x256xf32>
    %262 = arith.addf %260, %261 : vector<2x256xf32>
    %263 = arith.mulf %262, %11 : vector<2x256xf32>
    %264 = math.tanh %263 : vector<2x256xf32>
    %265 = arith.mulf %11, %264 : vector<2x256xf32>
    %266 = arith.addf %265, %14 : vector<2x256xf32>
    %267 = vector.extract_strided_slice %266 {offsets = [0, 0], sizes = [2, 64], strides = [1, 1]} : vector<2x256xf32> to vector<2x64xf32>
    %268 = vector.extract_strided_slice %266 {offsets = [0, 64], sizes = [2, 64], strides = [1, 1]} : vector<2x256xf32> to vector<2x64xf32>
    %269 = vector.extract_strided_slice %266 {offsets = [0, 128], sizes = [2, 64], strides = [1, 1]} : vector<2x256xf32> to vector<2x64xf32>
    %270 = vector.extract_strided_slice %266 {offsets = [0, 192], sizes = [2, 64], strides = [1, 1]} : vector<2x256xf32> to vector<2x64xf32>
    %271 = arith.mulf %268, %256 : vector<2x64xf32>
    %272 = arith.mulf %267, %269 : vector<2x64xf32>
    %273 = arith.addf %271, %272 : vector<2x64xf32>
    %274 = math.tanh %273 : vector<2x64xf32>
    %275 = arith.mulf %270, %274 : vector<2x64xf32>
    %276 = vector.extract_strided_slice %0 {offsets = [2, 0, 0], sizes = [1, 2, 64], strides = [1, 1, 1]} : vector<8x2x64xf32> to vector<1x2x64xf32>
    %277 = vector.shape_cast %276 : vector<1x2x64xf32> to vector<2x64xf32>
    %278 = arith.mulf %273, %277 : vector<2x64xf32>
    %279 = arith.mulf %275, %277 : vector<2x64xf32>
    %c4_76 = arith.constant 4 : index
    %c0_77 = arith.constant 0 : index
    %280 = vector.load %arg9[%c4_76, %c0_77] : memref<16x64xf32, #tpu.memory_space<vmem>>, vector<2x64xf32>
    tpu.vector_store %arg9[%c4_76, %c0_77], %279 {strides = array<i32>} : memref<16x64xf32, #tpu.memory_space<vmem>>, vector<2x64xf32>,
    %c10_78 = arith.constant 10 : index
    %c0_79 = arith.constant 0 : index
    %281 = vector.load %arg10[%c10_78, %c0_79] : memref<16x64xf32, #tpu.memory_space<vmem>>, vector<2x64xf32>
    tpu.vector_store %arg10[%c10_78, %c0_79], %279 {strides = array<i32>} : memref<16x64xf32, #tpu.memory_space<vmem>>, vector<2x64xf32>,
    %282 = vector.extract_strided_slice %212 {offsets = [6, 0], sizes = [2, 256], strides = [1, 1]} : vector<16x256xf32> to vector<2x256xf32>
    %cst_80 = arith.constant dense<0.000000e+00> : vector<2x256xf32>
    %283 = tpu.matmul %279, %213, %cst_80 {dimension_numbers = #tpu.dot_dimension_numbers<[1], [0], [0], [1], [0, 0, 1, 1], [], []>} : vector<2x64xf32>, vector<64x256xf32>, vector<2x256xf32> -> vector<2x256xf32>
    %284 = arith.addf %282, %283 : vector<2x256xf32>
    %285 = arith.mulf %284, %11 : vector<2x256xf32>
    %286 = math.tanh %285 : vector<2x256xf32>
    %287 = arith.mulf %11, %286 : vector<2x256xf32>
    %288 = arith.addf %287, %14 : vector<2x256xf32>
    %289 = vector.extract_strided_slice %288 {offsets = [0, 0], sizes = [2, 64], strides = [1, 1]} : vector<2x256xf32> to vector<2x64xf32>
    %290 = vector.extract_strided_slice %288 {offsets = [0, 64], sizes = [2, 64], strides = [1, 1]} : vector<2x256xf32> to vector<2x64xf32>
    %291 = vector.extract_strided_slice %288 {offsets = [0, 128], sizes = [2, 64], strides = [1, 1]} : vector<2x256xf32> to vector<2x64xf32>
    %292 = vector.extract_strided_slice %288 {offsets = [0, 192], sizes = [2, 64], strides = [1, 1]} : vector<2x256xf32> to vector<2x64xf32>
    %293 = arith.mulf %290, %278 : vector<2x64xf32>
    %294 = arith.mulf %289, %291 : vector<2x64xf32>
    %295 = arith.addf %293, %294 : vector<2x64xf32>
    %296 = math.tanh %295 : vector<2x64xf32>
    %297 = arith.mulf %292, %296 : vector<2x64xf32>
    %298 = vector.extract_strided_slice %0 {offsets = [3, 0, 0], sizes = [1, 2, 64], strides = [1, 1, 1]} : vector<8x2x64xf32> to vector<1x2x64xf32>
    %299 = vector.shape_cast %298 : vector<1x2x64xf32> to vector<2x64xf32>
    %300 = arith.mulf %295, %299 : vector<2x64xf32>
    %301 = arith.mulf %297, %299 : vector<2x64xf32>
    %c6_81 = arith.constant 6 : index
    %c0_82 = arith.constant 0 : index
    %302 = vector.load %arg9[%c6_81, %c0_82] : memref<16x64xf32, #tpu.memory_space<vmem>>, vector<2x64xf32>
    tpu.vector_store %arg9[%c6_81, %c0_82], %301 {strides = array<i32>} : memref<16x64xf32, #tpu.memory_space<vmem>>, vector<2x64xf32>,
    %c8_83 = arith.constant 8 : index
    %c0_84 = arith.constant 0 : index
    %303 = vector.load %arg10[%c8_83, %c0_84] : memref<16x64xf32, #tpu.memory_space<vmem>>, vector<2x64xf32>
    tpu.vector_store %arg10[%c8_83, %c0_84], %301 {strides = array<i32>} : memref<16x64xf32, #tpu.memory_space<vmem>>, vector<2x64xf32>,
    %304 = vector.extract_strided_slice %212 {offsets = [8, 0], sizes = [2, 256], strides = [1, 1]} : vector<16x256xf32> to vector<2x256xf32>
    %cst_85 = arith.constant dense<0.000000e+00> : vector<2x256xf32>
    %305 = tpu.matmul %301, %213, %cst_85 {dimension_numbers = #tpu.dot_dimension_numbers<[1], [0], [0], [1], [0, 0, 1, 1], [], []>} : vector<2x64xf32>, vector<64x256xf32>, vector<2x256xf32> -> vector<2x256xf32>
    %306 = arith.addf %304, %305 : vector<2x256xf32>
    %307 = arith.mulf %306, %11 : vector<2x256xf32>
    %308 = math.tanh %307 : vector<2x256xf32>
    %309 = arith.mulf %11, %308 : vector<2x256xf32>
    %310 = arith.addf %309, %14 : vector<2x256xf32>
    %311 = vector.extract_strided_slice %310 {offsets = [0, 0], sizes = [2, 64], strides = [1, 1]} : vector<2x256xf32> to vector<2x64xf32>
    %312 = vector.extract_strided_slice %310 {offsets = [0, 64], sizes = [2, 64], strides = [1, 1]} : vector<2x256xf32> to vector<2x64xf32>
    %313 = vector.extract_strided_slice %310 {offsets = [0, 128], sizes = [2, 64], strides = [1, 1]} : vector<2x256xf32> to vector<2x64xf32>
    %314 = vector.extract_strided_slice %310 {offsets = [0, 192], sizes = [2, 64], strides = [1, 1]} : vector<2x256xf32> to vector<2x64xf32>
    %315 = arith.mulf %312, %300 : vector<2x64xf32>
    %316 = arith.mulf %311, %313 : vector<2x64xf32>
    %317 = arith.addf %315, %316 : vector<2x64xf32>
    %318 = math.tanh %317 : vector<2x64xf32>
    %319 = arith.mulf %314, %318 : vector<2x64xf32>
    %320 = vector.extract_strided_slice %0 {offsets = [4, 0, 0], sizes = [1, 2, 64], strides = [1, 1, 1]} : vector<8x2x64xf32> to vector<1x2x64xf32>
    %321 = vector.shape_cast %320 : vector<1x2x64xf32> to vector<2x64xf32>
    %322 = arith.mulf %317, %321 : vector<2x64xf32>
    %323 = arith.mulf %319, %321 : vector<2x64xf32>
    %c8_86 = arith.constant 8 : index
    %c0_87 = arith.constant 0 : index
    %324 = vector.load %arg9[%c8_86, %c0_87] : memref<16x64xf32, #tpu.memory_space<vmem>>, vector<2x64xf32>
    tpu.vector_store %arg9[%c8_86, %c0_87], %323 {strides = array<i32>} : memref<16x64xf32, #tpu.memory_space<vmem>>, vector<2x64xf32>,
    %c6_88 = arith.constant 6 : index
    %c0_89 = arith.constant 0 : index
    %325 = vector.load %arg10[%c6_88, %c0_89] : memref<16x64xf32, #tpu.memory_space<vmem>>, vector<2x64xf32>
    tpu.vector_store %arg10[%c6_88, %c0_89], %323 {strides = array<i32>} : memref<16x64xf32, #tpu.memory_space<vmem>>, vector<2x64xf32>,
    %326 = vector.extract_strided_slice %212 {offsets = [10, 0], sizes = [2, 256], strides = [1, 1]} : vector<16x256xf32> to vector<2x256xf32>
    %cst_90 = arith.constant dense<0.000000e+00> : vector<2x256xf32>
    %327 = tpu.matmul %323, %213, %cst_90 {dimension_numbers = #tpu.dot_dimension_numbers<[1], [0], [0], [1], [0, 0, 1, 1], [], []>} : vector<2x64xf32>, vector<64x256xf32>, vector<2x256xf32> -> vector<2x256xf32>
    %328 = arith.addf %326, %327 : vector<2x256xf32>
    %329 = arith.mulf %328, %11 : vector<2x256xf32>
    %330 = math.tanh %329 : vector<2x256xf32>
    %331 = arith.mulf %11, %330 : vector<2x256xf32>
    %332 = arith.addf %331, %14 : vector<2x256xf32>
    %333 = vector.extract_strided_slice %332 {offsets = [0, 0], sizes = [2, 64], strides = [1, 1]} : vector<2x256xf32> to vector<2x64xf32>
    %334 = vector.extract_strided_slice %332 {offsets = [0, 64], sizes = [2, 64], strides = [1, 1]} : vector<2x256xf32> to vector<2x64xf32>
    %335 = vector.extract_strided_slice %332 {offsets = [0, 128], sizes = [2, 64], strides = [1, 1]} : vector<2x256xf32> to vector<2x64xf32>
    %336 = vector.extract_strided_slice %332 {offsets = [0, 192], sizes = [2, 64], strides = [1, 1]} : vector<2x256xf32> to vector<2x64xf32>
    %337 = arith.mulf %334, %322 : vector<2x64xf32>
    %338 = arith.mulf %333, %335 : vector<2x64xf32>
    %339 = arith.addf %337, %338 : vector<2x64xf32>
    %340 = math.tanh %339 : vector<2x64xf32>
    %341 = arith.mulf %336, %340 : vector<2x64xf32>
    %342 = vector.extract_strided_slice %0 {offsets = [5, 0, 0], sizes = [1, 2, 64], strides = [1, 1, 1]} : vector<8x2x64xf32> to vector<1x2x64xf32>
    %343 = vector.shape_cast %342 : vector<1x2x64xf32> to vector<2x64xf32>
    %344 = arith.mulf %339, %343 : vector<2x64xf32>
    %345 = arith.mulf %341, %343 : vector<2x64xf32>
    %c10_91 = arith.constant 10 : index
    %c0_92 = arith.constant 0 : index
    %346 = vector.load %arg9[%c10_91, %c0_92] : memref<16x64xf32, #tpu.memory_space<vmem>>, vector<2x64xf32>
    tpu.vector_store %arg9[%c10_91, %c0_92], %345 {strides = array<i32>} : memref<16x64xf32, #tpu.memory_space<vmem>>, vector<2x64xf32>,
    %c4_93 = arith.constant 4 : index
    %c0_94 = arith.constant 0 : index
    %347 = vector.load %arg10[%c4_93, %c0_94] : memref<16x64xf32, #tpu.memory_space<vmem>>, vector<2x64xf32>
    tpu.vector_store %arg10[%c4_93, %c0_94], %345 {strides = array<i32>} : memref<16x64xf32, #tpu.memory_space<vmem>>, vector<2x64xf32>,
    %348 = vector.extract_strided_slice %212 {offsets = [12, 0], sizes = [2, 256], strides = [1, 1]} : vector<16x256xf32> to vector<2x256xf32>
    %cst_95 = arith.constant dense<0.000000e+00> : vector<2x256xf32>
    %349 = tpu.matmul %345, %213, %cst_95 {dimension_numbers = #tpu.dot_dimension_numbers<[1], [0], [0], [1], [0, 0, 1, 1], [], []>} : vector<2x64xf32>, vector<64x256xf32>, vector<2x256xf32> -> vector<2x256xf32>
    %350 = arith.addf %348, %349 : vector<2x256xf32>
    %351 = arith.mulf %350, %11 : vector<2x256xf32>
    %352 = math.tanh %351 : vector<2x256xf32>
    %353 = arith.mulf %11, %352 : vector<2x256xf32>
    %354 = arith.addf %353, %14 : vector<2x256xf32>
    %355 = vector.extract_strided_slice %354 {offsets = [0, 0], sizes = [2, 64], strides = [1, 1]} : vector<2x256xf32> to vector<2x64xf32>
    %356 = vector.extract_strided_slice %354 {offsets = [0, 64], sizes = [2, 64], strides = [1, 1]} : vector<2x256xf32> to vector<2x64xf32>
    %357 = vector.extract_strided_slice %354 {offsets = [0, 128], sizes = [2, 64], strides = [1, 1]} : vector<2x256xf32> to vector<2x64xf32>
    %358 = vector.extract_strided_slice %354 {offsets = [0, 192], sizes = [2, 64], strides = [1, 1]} : vector<2x256xf32> to vector<2x64xf32>
    %359 = arith.mulf %356, %344 : vector<2x64xf32>
    %360 = arith.mulf %355, %357 : vector<2x64xf32>
    %361 = arith.addf %359, %360 : vector<2x64xf32>
    %362 = math.tanh %361 : vector<2x64xf32>
    %363 = arith.mulf %358, %362 : vector<2x64xf32>
    %364 = vector.extract_strided_slice %0 {offsets = [6, 0, 0], sizes = [1, 2, 64], strides = [1, 1, 1]} : vector<8x2x64xf32> to vector<1x2x64xf32>
    %365 = vector.shape_cast %364 : vector<1x2x64xf32> to vector<2x64xf32>
    %366 = arith.mulf %361, %365 : vector<2x64xf32>
    %367 = arith.mulf %363, %365 : vector<2x64xf32>
    %c12_96 = arith.constant 12 : index
    %c0_97 = arith.constant 0 : index
    %368 = vector.load %arg9[%c12_96, %c0_97] : memref<16x64xf32, #tpu.memory_space<vmem>>, vector<2x64xf32>
    tpu.vector_store %arg9[%c12_96, %c0_97], %367 {strides = array<i32>} : memref<16x64xf32, #tpu.memory_space<vmem>>, vector<2x64xf32>,
    %c2_98 = arith.constant 2 : index
    %c0_99 = arith.constant 0 : index
    %369 = vector.load %arg10[%c2_98, %c0_99] : memref<16x64xf32, #tpu.memory_space<vmem>>, vector<2x64xf32>
    tpu.vector_store %arg10[%c2_98, %c0_99], %367 {strides = array<i32>} : memref<16x64xf32, #tpu.memory_space<vmem>>, vector<2x64xf32>,
    %370 = vector.extract_strided_slice %212 {offsets = [14, 0], sizes = [2, 256], strides = [1, 1]} : vector<16x256xf32> to vector<2x256xf32>
    %cst_100 = arith.constant dense<0.000000e+00> : vector<2x256xf32>
    %371 = tpu.matmul %367, %213, %cst_100 {dimension_numbers = #tpu.dot_dimension_numbers<[1], [0], [0], [1], [0, 0, 1, 1], [], []>} : vector<2x64xf32>, vector<64x256xf32>, vector<2x256xf32> -> vector<2x256xf32>
    %372 = arith.addf %370, %371 : vector<2x256xf32>
    %373 = arith.mulf %372, %11 : vector<2x256xf32>
    %374 = math.tanh %373 : vector<2x256xf32>
    %375 = arith.mulf %11, %374 : vector<2x256xf32>
    %376 = arith.addf %375, %14 : vector<2x256xf32>
    %377 = vector.extract_strided_slice %376 {offsets = [0, 0], sizes = [2, 64], strides = [1, 1]} : vector<2x256xf32> to vector<2x64xf32>
    %378 = vector.extract_strided_slice %376 {offsets = [0, 64], sizes = [2, 64], strides = [1, 1]} : vector<2x256xf32> to vector<2x64xf32>
    %379 = vector.extract_strided_slice %376 {offsets = [0, 128], sizes = [2, 64], strides = [1, 1]} : vector<2x256xf32> to vector<2x64xf32>
    %380 = vector.extract_strided_slice %376 {offsets = [0, 192], sizes = [2, 64], strides = [1, 1]} : vector<2x256xf32> to vector<2x64xf32>
    %381 = arith.mulf %378, %366 : vector<2x64xf32>
    %382 = arith.mulf %377, %379 : vector<2x64xf32>
    %383 = arith.addf %381, %382 : vector<2x64xf32>
    %384 = math.tanh %383 : vector<2x64xf32>
    %385 = arith.mulf %380, %384 : vector<2x64xf32>
    %386 = vector.extract_strided_slice %0 {offsets = [7, 0, 0], sizes = [1, 2, 64], strides = [1, 1, 1]} : vector<8x2x64xf32> to vector<1x2x64xf32>
    %387 = vector.shape_cast %386 : vector<1x2x64xf32> to vector<2x64xf32>
    %388 = arith.mulf %385, %387 : vector<2x64xf32>
    %c14_101 = arith.constant 14 : index
    %c0_102 = arith.constant 0 : index
    %389 = vector.load %arg9[%c14_101, %c0_102] : memref<16x64xf32, #tpu.memory_space<vmem>>, vector<2x64xf32>
    tpu.vector_store %arg9[%c14_101, %c0_102], %388 {strides = array<i32>} : memref<16x64xf32, #tpu.memory_space<vmem>>, vector<2x64xf32>,
    %c0_103 = arith.constant 0 : index
    %c0_104 = arith.constant 0 : index
    %390 = vector.load %arg10[%c0_103, %c0_104] : memref<16x64xf32, #tpu.memory_space<vmem>>, vector<2x64xf32>
    tpu.vector_store %arg10[%c0_103, %c0_104], %388 {strides = array<i32>} : memref<16x64xf32, #tpu.memory_space<vmem>>, vector<2x64xf32>,
    %c0_105 = arith.constant 0 : index
    %c0_106 = arith.constant 0 : index
    %391 = vector.load %arg9[%c0_105, %c0_106] : memref<16x64xf32, #tpu.memory_space<vmem>>, vector<16x64xf32>
    %c0_107 = arith.constant 0 : index
    %c0_108 = arith.constant 0 : index
    %392 = vector.load %arg10[%c0_107, %c0_108] : memref<16x64xf32, #tpu.memory_space<vmem>>, vector<16x64xf32>
    %c0_109 = arith.constant 0 : index
    %c0_110 = arith.constant 0 : index
    %393 = vector.load %arg5[%c0_109, %c0_110] : memref<193x256xf32, #tpu.memory_space<vmem>>, vector<64x256xf32>
    %c64_111 = arith.constant 64 : index
    %c0_112 = arith.constant 0 : index
    %394 = vector.load %arg5[%c64_111, %c0_112] : memref<193x256xf32, #tpu.memory_space<vmem>>, vector<64x256xf32>
    %c192_113 = arith.constant 192 : index
    %c0_114 = arith.constant 0 : index
    %395 = vector.load %arg5[%c192_113, %c0_114] : memref<193x256xf32, #tpu.memory_space<vmem>>, vector<1x256xf32>
    %cst_115 = arith.constant dense<0.000000e+00> : vector<16x256xf32>
    %396 = tpu.matmul %391, %393, %cst_115 {dimension_numbers = #tpu.dot_dimension_numbers<[1], [0], [0], [1], [0, 0, 1, 1], [], []>} : vector<16x64xf32>, vector<64x256xf32>, vector<16x256xf32> -> vector<16x256xf32>
    %397 = vector.broadcast %395 : vector<1x256xf32> to vector<16x256xf32>
    %398 = arith.addf %396, %397 : vector<16x256xf32>
    %cst_116 = arith.constant dense<0.000000e+00> : vector<16x256xf32>
    %399 = tpu.matmul %392, %394, %cst_116 {dimension_numbers = #tpu.dot_dimension_numbers<[1], [0], [0], [1], [0, 0, 1, 1], [], []>} : vector<16x64xf32>, vector<64x256xf32>, vector<16x256xf32> -> vector<16x256xf32>
    %400 = arith.addf %398, %399 : vector<16x256xf32>
    %c128_117 = arith.constant 128 : index
    %c0_118 = arith.constant 0 : index
    %401 = vector.load %arg5[%c128_117, %c0_118] : memref<193x256xf32, #tpu.memory_space<vmem>>, vector<64x256xf32>
    %cst_119 = arith.constant 0.000000e+00 : f32
    %402 = vector.broadcast %cst_119 : f32 to vector<2x64xf32>
    %cst_120 = arith.constant 0.000000e+00 : f32
    %403 = vector.broadcast %cst_120 : f32 to vector<2x64xf32>
    %cst_121 = arith.constant 0.000000e+00 : f32
    %404 = vector.broadcast %cst_121 : f32 to vector<2x64xf32>
    %405 = vector.extract_strided_slice %400 {offsets = [0, 0], sizes = [2, 256], strides = [1, 1]} : vector<16x256xf32> to vector<2x256xf32>
    %cst_122 = arith.constant dense<0.000000e+00> : vector<2x256xf32>
    %406 = tpu.matmul %402, %401, %cst_122 {dimension_numbers = #tpu.dot_dimension_numbers<[1], [0], [0], [1], [0, 0, 1, 1], [], []>} : vector<2x64xf32>, vector<64x256xf32>, vector<2x256xf32> -> vector<2x256xf32>
    %407 = arith.addf %405, %406 : vector<2x256xf32>
    %408 = arith.mulf %407, %11 : vector<2x256xf32>
    %409 = math.tanh %408 : vector<2x256xf32>
    %410 = arith.mulf %11, %409 : vector<2x256xf32>
    %411 = arith.addf %410, %14 : vector<2x256xf32>
    %412 = vector.extract_strided_slice %411 {offsets = [0, 0], sizes = [2, 64], strides = [1, 1]} : vector<2x256xf32> to vector<2x64xf32>
    %413 = vector.extract_strided_slice %411 {offsets = [0, 64], sizes = [2, 64], strides = [1, 1]} : vector<2x256xf32> to vector<2x64xf32>
    %414 = vector.extract_strided_slice %411 {offsets = [0, 128], sizes = [2, 64], strides = [1, 1]} : vector<2x256xf32> to vector<2x64xf32>
    %415 = vector.extract_strided_slice %411 {offsets = [0, 192], sizes = [2, 64], strides = [1, 1]} : vector<2x256xf32> to vector<2x64xf32>
    %416 = arith.mulf %413, %403 : vector<2x64xf32>
    %417 = arith.mulf %412, %414 : vector<2x64xf32>
    %418 = arith.addf %416, %417 : vector<2x64xf32>
    %419 = math.tanh %418 : vector<2x64xf32>
    %420 = arith.mulf %415, %419 : vector<2x64xf32>
    %421 = vector.extract_strided_slice %0 {offsets = [0, 0, 0], sizes = [1, 2, 64], strides = [1, 1, 1]} : vector<8x2x64xf32> to vector<1x2x64xf32>
    %422 = vector.shape_cast %421 : vector<1x2x64xf32> to vector<2x64xf32>
    %423 = arith.mulf %418, %422 : vector<2x64xf32>
    %424 = arith.mulf %420, %422 : vector<2x64xf32>
    %425 = arith.addf %404, %424 : vector<2x64xf32>
    %426 = vector.extract_strided_slice %400 {offsets = [2, 0], sizes = [2, 256], strides = [1, 1]} : vector<16x256xf32> to vector<2x256xf32>
    %cst_123 = arith.constant dense<0.000000e+00> : vector<2x256xf32>
    %427 = tpu.matmul %424, %401, %cst_123 {dimension_numbers = #tpu.dot_dimension_numbers<[1], [0], [0], [1], [0, 0, 1, 1], [], []>} : vector<2x64xf32>, vector<64x256xf32>, vector<2x256xf32> -> vector<2x256xf32>
    %428 = arith.addf %426, %427 : vector<2x256xf32>
    %429 = arith.mulf %428, %11 : vector<2x256xf32>
    %430 = math.tanh %429 : vector<2x256xf32>
    %431 = arith.mulf %11, %430 : vector<2x256xf32>
    %432 = arith.addf %431, %14 : vector<2x256xf32>
    %433 = vector.extract_strided_slice %432 {offsets = [0, 0], sizes = [2, 64], strides = [1, 1]} : vector<2x256xf32> to vector<2x64xf32>
    %434 = vector.extract_strided_slice %432 {offsets = [0, 64], sizes = [2, 64], strides = [1, 1]} : vector<2x256xf32> to vector<2x64xf32>
    %435 = vector.extract_strided_slice %432 {offsets = [0, 128], sizes = [2, 64], strides = [1, 1]} : vector<2x256xf32> to vector<2x64xf32>
    %436 = vector.extract_strided_slice %432 {offsets = [0, 192], sizes = [2, 64], strides = [1, 1]} : vector<2x256xf32> to vector<2x64xf32>
    %437 = arith.mulf %434, %423 : vector<2x64xf32>
    %438 = arith.mulf %433, %435 : vector<2x64xf32>
    %439 = arith.addf %437, %438 : vector<2x64xf32>
    %440 = math.tanh %439 : vector<2x64xf32>
    %441 = arith.mulf %436, %440 : vector<2x64xf32>
    %442 = vector.extract_strided_slice %0 {offsets = [1, 0, 0], sizes = [1, 2, 64], strides = [1, 1, 1]} : vector<8x2x64xf32> to vector<1x2x64xf32>
    %443 = vector.shape_cast %442 : vector<1x2x64xf32> to vector<2x64xf32>
    %444 = arith.mulf %439, %443 : vector<2x64xf32>
    %445 = arith.mulf %441, %443 : vector<2x64xf32>
    %446 = arith.addf %425, %445 : vector<2x64xf32>
    %447 = vector.extract_strided_slice %400 {offsets = [4, 0], sizes = [2, 256], strides = [1, 1]} : vector<16x256xf32> to vector<2x256xf32>
    %cst_124 = arith.constant dense<0.000000e+00> : vector<2x256xf32>
    %448 = tpu.matmul %445, %401, %cst_124 {dimension_numbers = #tpu.dot_dimension_numbers<[1], [0], [0], [1], [0, 0, 1, 1], [], []>} : vector<2x64xf32>, vector<64x256xf32>, vector<2x256xf32> -> vector<2x256xf32>
    %449 = arith.addf %447, %448 : vector<2x256xf32>
    %450 = arith.mulf %449, %11 : vector<2x256xf32>
    %451 = math.tanh %450 : vector<2x256xf32>
    %452 = arith.mulf %11, %451 : vector<2x256xf32>
    %453 = arith.addf %452, %14 : vector<2x256xf32>
    %454 = vector.extract_strided_slice %453 {offsets = [0, 0], sizes = [2, 64], strides = [1, 1]} : vector<2x256xf32> to vector<2x64xf32>
    %455 = vector.extract_strided_slice %453 {offsets = [0, 64], sizes = [2, 64], strides = [1, 1]} : vector<2x256xf32> to vector<2x64xf32>
    %456 = vector.extract_strided_slice %453 {offsets = [0, 128], sizes = [2, 64], strides = [1, 1]} : vector<2x256xf32> to vector<2x64xf32>
    %457 = vector.extract_strided_slice %453 {offsets = [0, 192], sizes = [2, 64], strides = [1, 1]} : vector<2x256xf32> to vector<2x64xf32>
    %458 = arith.mulf %455, %444 : vector<2x64xf32>
    %459 = arith.mulf %454, %456 : vector<2x64xf32>
    %460 = arith.addf %458, %459 : vector<2x64xf32>
    %461 = math.tanh %460 : vector<2x64xf32>
    %462 = arith.mulf %457, %461 : vector<2x64xf32>
    %463 = vector.extract_strided_slice %0 {offsets = [2, 0, 0], sizes = [1, 2, 64], strides = [1, 1, 1]} : vector<8x2x64xf32> to vector<1x2x64xf32>
    %464 = vector.shape_cast %463 : vector<1x2x64xf32> to vector<2x64xf32>
    %465 = arith.mulf %460, %464 : vector<2x64xf32>
    %466 = arith.mulf %462, %464 : vector<2x64xf32>
    %467 = arith.addf %446, %466 : vector<2x64xf32>
    %468 = vector.extract_strided_slice %400 {offsets = [6, 0], sizes = [2, 256], strides = [1, 1]} : vector<16x256xf32> to vector<2x256xf32>
    %cst_125 = arith.constant dense<0.000000e+00> : vector<2x256xf32>
    %469 = tpu.matmul %466, %401, %cst_125 {dimension_numbers = #tpu.dot_dimension_numbers<[1], [0], [0], [1], [0, 0, 1, 1], [], []>} : vector<2x64xf32>, vector<64x256xf32>, vector<2x256xf32> -> vector<2x256xf32>
    %470 = arith.addf %468, %469 : vector<2x256xf32>
    %471 = arith.mulf %470, %11 : vector<2x256xf32>
    %472 = math.tanh %471 : vector<2x256xf32>
    %473 = arith.mulf %11, %472 : vector<2x256xf32>
    %474 = arith.addf %473, %14 : vector<2x256xf32>
    %475 = vector.extract_strided_slice %474 {offsets = [0, 0], sizes = [2, 64], strides = [1, 1]} : vector<2x256xf32> to vector<2x64xf32>
    %476 = vector.extract_strided_slice %474 {offsets = [0, 64], sizes = [2, 64], strides = [1, 1]} : vector<2x256xf32> to vector<2x64xf32>
    %477 = vector.extract_strided_slice %474 {offsets = [0, 128], sizes = [2, 64], strides = [1, 1]} : vector<2x256xf32> to vector<2x64xf32>
    %478 = vector.extract_strided_slice %474 {offsets = [0, 192], sizes = [2, 64], strides = [1, 1]} : vector<2x256xf32> to vector<2x64xf32>
    %479 = arith.mulf %476, %465 : vector<2x64xf32>
    %480 = arith.mulf %475, %477 : vector<2x64xf32>
    %481 = arith.addf %479, %480 : vector<2x64xf32>
    %482 = math.tanh %481 : vector<2x64xf32>
    %483 = arith.mulf %478, %482 : vector<2x64xf32>
    %484 = vector.extract_strided_slice %0 {offsets = [3, 0, 0], sizes = [1, 2, 64], strides = [1, 1, 1]} : vector<8x2x64xf32> to vector<1x2x64xf32>
    %485 = vector.shape_cast %484 : vector<1x2x64xf32> to vector<2x64xf32>
    %486 = arith.mulf %481, %485 : vector<2x64xf32>
    %487 = arith.mulf %483, %485 : vector<2x64xf32>
    %488 = arith.addf %467, %487 : vector<2x64xf32>
    %489 = vector.extract_strided_slice %400 {offsets = [8, 0], sizes = [2, 256], strides = [1, 1]} : vector<16x256xf32> to vector<2x256xf32>
    %cst_126 = arith.constant dense<0.000000e+00> : vector<2x256xf32>
    %490 = tpu.matmul %487, %401, %cst_126 {dimension_numbers = #tpu.dot_dimension_numbers<[1], [0], [0], [1], [0, 0, 1, 1], [], []>} : vector<2x64xf32>, vector<64x256xf32>, vector<2x256xf32> -> vector<2x256xf32>
    %491 = arith.addf %489, %490 : vector<2x256xf32>
    %492 = arith.mulf %491, %11 : vector<2x256xf32>
    %493 = math.tanh %492 : vector<2x256xf32>
    %494 = arith.mulf %11, %493 : vector<2x256xf32>
    %495 = arith.addf %494, %14 : vector<2x256xf32>
    %496 = vector.extract_strided_slice %495 {offsets = [0, 0], sizes = [2, 64], strides = [1, 1]} : vector<2x256xf32> to vector<2x64xf32>
    %497 = vector.extract_strided_slice %495 {offsets = [0, 64], sizes = [2, 64], strides = [1, 1]} : vector<2x256xf32> to vector<2x64xf32>
    %498 = vector.extract_strided_slice %495 {offsets = [0, 128], sizes = [2, 64], strides = [1, 1]} : vector<2x256xf32> to vector<2x64xf32>
    %499 = vector.extract_strided_slice %495 {offsets = [0, 192], sizes = [2, 64], strides = [1, 1]} : vector<2x256xf32> to vector<2x64xf32>
    %500 = arith.mulf %497, %486 : vector<2x64xf32>
    %501 = arith.mulf %496, %498 : vector<2x64xf32>
    %502 = arith.addf %500, %501 : vector<2x64xf32>
    %503 = math.tanh %502 : vector<2x64xf32>
    %504 = arith.mulf %499, %503 : vector<2x64xf32>
    %505 = vector.extract_strided_slice %0 {offsets = [4, 0, 0], sizes = [1, 2, 64], strides = [1, 1, 1]} : vector<8x2x64xf32> to vector<1x2x64xf32>
    %506 = vector.shape_cast %505 : vector<1x2x64xf32> to vector<2x64xf32>
    %507 = arith.mulf %502, %506 : vector<2x64xf32>
    %508 = arith.mulf %504, %506 : vector<2x64xf32>
    %509 = arith.addf %488, %508 : vector<2x64xf32>
    %510 = vector.extract_strided_slice %400 {offsets = [10, 0], sizes = [2, 256], strides = [1, 1]} : vector<16x256xf32> to vector<2x256xf32>
    %cst_127 = arith.constant dense<0.000000e+00> : vector<2x256xf32>
    %511 = tpu.matmul %508, %401, %cst_127 {dimension_numbers = #tpu.dot_dimension_numbers<[1], [0], [0], [1], [0, 0, 1, 1], [], []>} : vector<2x64xf32>, vector<64x256xf32>, vector<2x256xf32> -> vector<2x256xf32>
    %512 = arith.addf %510, %511 : vector<2x256xf32>
    %513 = arith.mulf %512, %11 : vector<2x256xf32>
    %514 = math.tanh %513 : vector<2x256xf32>
    %515 = arith.mulf %11, %514 : vector<2x256xf32>
    %516 = arith.addf %515, %14 : vector<2x256xf32>
    %517 = vector.extract_strided_slice %516 {offsets = [0, 0], sizes = [2, 64], strides = [1, 1]} : vector<2x256xf32> to vector<2x64xf32>
    %518 = vector.extract_strided_slice %516 {offsets = [0, 64], sizes = [2, 64], strides = [1, 1]} : vector<2x256xf32> to vector<2x64xf32>
    %519 = vector.extract_strided_slice %516 {offsets = [0, 128], sizes = [2, 64], strides = [1, 1]} : vector<2x256xf32> to vector<2x64xf32>
    %520 = vector.extract_strided_slice %516 {offsets = [0, 192], sizes = [2, 64], strides = [1, 1]} : vector<2x256xf32> to vector<2x64xf32>
    %521 = arith.mulf %518, %507 : vector<2x64xf32>
    %522 = arith.mulf %517, %519 : vector<2x64xf32>
    %523 = arith.addf %521, %522 : vector<2x64xf32>
    %524 = math.tanh %523 : vector<2x64xf32>
    %525 = arith.mulf %520, %524 : vector<2x64xf32>
    %526 = vector.extract_strided_slice %0 {offsets = [5, 0, 0], sizes = [1, 2, 64], strides = [1, 1, 1]} : vector<8x2x64xf32> to vector<1x2x64xf32>
    %527 = vector.shape_cast %526 : vector<1x2x64xf32> to vector<2x64xf32>
    %528 = arith.mulf %523, %527 : vector<2x64xf32>
    %529 = arith.mulf %525, %527 : vector<2x64xf32>
    %530 = arith.addf %509, %529 : vector<2x64xf32>
    %531 = vector.extract_strided_slice %400 {offsets = [12, 0], sizes = [2, 256], strides = [1, 1]} : vector<16x256xf32> to vector<2x256xf32>
    %cst_128 = arith.constant dense<0.000000e+00> : vector<2x256xf32>
    %532 = tpu.matmul %529, %401, %cst_128 {dimension_numbers = #tpu.dot_dimension_numbers<[1], [0], [0], [1], [0, 0, 1, 1], [], []>} : vector<2x64xf32>, vector<64x256xf32>, vector<2x256xf32> -> vector<2x256xf32>
    %533 = arith.addf %531, %532 : vector<2x256xf32>
    %534 = arith.mulf %533, %11 : vector<2x256xf32>
    %535 = math.tanh %534 : vector<2x256xf32>
    %536 = arith.mulf %11, %535 : vector<2x256xf32>
    %537 = arith.addf %536, %14 : vector<2x256xf32>
    %538 = vector.extract_strided_slice %537 {offsets = [0, 0], sizes = [2, 64], strides = [1, 1]} : vector<2x256xf32> to vector<2x64xf32>
    %539 = vector.extract_strided_slice %537 {offsets = [0, 64], sizes = [2, 64], strides = [1, 1]} : vector<2x256xf32> to vector<2x64xf32>
    %540 = vector.extract_strided_slice %537 {offsets = [0, 128], sizes = [2, 64], strides = [1, 1]} : vector<2x256xf32> to vector<2x64xf32>
    %541 = vector.extract_strided_slice %537 {offsets = [0, 192], sizes = [2, 64], strides = [1, 1]} : vector<2x256xf32> to vector<2x64xf32>
    %542 = arith.mulf %539, %528 : vector<2x64xf32>
    %543 = arith.mulf %538, %540 : vector<2x64xf32>
    %544 = arith.addf %542, %543 : vector<2x64xf32>
    %545 = math.tanh %544 : vector<2x64xf32>
    %546 = arith.mulf %541, %545 : vector<2x64xf32>
    %547 = vector.extract_strided_slice %0 {offsets = [6, 0, 0], sizes = [1, 2, 64], strides = [1, 1, 1]} : vector<8x2x64xf32> to vector<1x2x64xf32>
    %548 = vector.shape_cast %547 : vector<1x2x64xf32> to vector<2x64xf32>
    %549 = arith.mulf %544, %548 : vector<2x64xf32>
    %550 = arith.mulf %546, %548 : vector<2x64xf32>
    %551 = arith.addf %530, %550 : vector<2x64xf32>
    %552 = vector.extract_strided_slice %400 {offsets = [14, 0], sizes = [2, 256], strides = [1, 1]} : vector<16x256xf32> to vector<2x256xf32>
    %cst_129 = arith.constant dense<0.000000e+00> : vector<2x256xf32>
    %553 = tpu.matmul %550, %401, %cst_129 {dimension_numbers = #tpu.dot_dimension_numbers<[1], [0], [0], [1], [0, 0, 1, 1], [], []>} : vector<2x64xf32>, vector<64x256xf32>, vector<2x256xf32> -> vector<2x256xf32>
    %554 = arith.addf %552, %553 : vector<2x256xf32>
    %555 = arith.mulf %554, %11 : vector<2x256xf32>
    %556 = math.tanh %555 : vector<2x256xf32>
    %557 = arith.mulf %11, %556 : vector<2x256xf32>
    %558 = arith.addf %557, %14 : vector<2x256xf32>
    %559 = vector.extract_strided_slice %558 {offsets = [0, 0], sizes = [2, 64], strides = [1, 1]} : vector<2x256xf32> to vector<2x64xf32>
    %560 = vector.extract_strided_slice %558 {offsets = [0, 64], sizes = [2, 64], strides = [1, 1]} : vector<2x256xf32> to vector<2x64xf32>
    %561 = vector.extract_strided_slice %558 {offsets = [0, 128], sizes = [2, 64], strides = [1, 1]} : vector<2x256xf32> to vector<2x64xf32>
    %562 = vector.extract_strided_slice %558 {offsets = [0, 192], sizes = [2, 64], strides = [1, 1]} : vector<2x256xf32> to vector<2x64xf32>
    %563 = arith.mulf %560, %549 : vector<2x64xf32>
    %564 = arith.mulf %559, %561 : vector<2x64xf32>
    %565 = arith.addf %563, %564 : vector<2x64xf32>
    %566 = math.tanh %565 : vector<2x64xf32>
    %567 = arith.mulf %562, %566 : vector<2x64xf32>
    %568 = vector.extract_strided_slice %0 {offsets = [7, 0, 0], sizes = [1, 2, 64], strides = [1, 1, 1]} : vector<8x2x64xf32> to vector<1x2x64xf32>
    %569 = vector.shape_cast %568 : vector<1x2x64xf32> to vector<2x64xf32>
    %570 = arith.mulf %567, %569 : vector<2x64xf32>
    %571 = arith.addf %551, %570 : vector<2x64xf32>
    %572 = vector.broadcast %1 : f32 to vector<2x64xf32>
    %573 = arith.mulf %571, %572 : vector<2x64xf32>
    %c0_130 = arith.constant 0 : index
    %c0_131 = arith.constant 0 : index
    %574 = vector.load %arg6[%c0_130, %c0_131] : memref<132x64xf32, #tpu.memory_space<vmem>>, vector<64x64xf32>
    %c64_132 = arith.constant 64 : index
    %c0_133 = arith.constant 0 : index
    %575 = vector.load %arg6[%c64_132, %c0_133] : memref<132x64xf32, #tpu.memory_space<vmem>>, vector<32x64xf32>
    %c96_134 = arith.constant 96 : index
    %c0_135 = arith.constant 0 : index
    %576 = vector.load %arg6[%c96_134, %c0_135] : memref<132x64xf32, #tpu.memory_space<vmem>>, vector<32x64xf32>
    %c128_136 = arith.constant 128 : index
    %c0_137 = arith.constant 0 : index
    %577 = vector.load %arg6[%c128_136, %c0_137] : memref<132x64xf32, #tpu.memory_space<vmem>>, vector<4x64xf32>
    %578 = vector.extract_strided_slice %577 {offsets = [0, 0], sizes = [1, 64], strides = [1, 1]} : vector<4x64xf32> to vector<1x64xf32>
    %579 = vector.extract_strided_slice %577 {offsets = [1, 0], sizes = [1, 64], strides = [1, 1]} : vector<4x64xf32> to vector<1x64xf32>
    %580 = vector.extract_strided_slice %577 {offsets = [2, 0], sizes = [1, 64], strides = [1, 1]} : vector<4x64xf32> to vector<1x64xf32>
    %581 = vector.extract_strided_slice %577 {offsets = [3, 0], sizes = [1, 64], strides = [1, 1]} : vector<4x64xf32> to vector<1x64xf32>
    %cst_138 = arith.constant dense<0.000000e+00> : vector<2x64xf32>
    %582 = tpu.matmul %573, %574, %cst_138 {dimension_numbers = #tpu.dot_dimension_numbers<[1], [0], [0], [1], [0, 0, 1, 1], [], []>} : vector<2x64xf32>, vector<64x64xf32>, vector<2x64xf32> -> vector<2x64xf32>
    %583 = vector.broadcast %578 : vector<1x64xf32> to vector<2x64xf32>
    %584 = arith.addf %582, %583 : vector<2x64xf32>
    %585 = vector.shape_cast %584 : vector<2x64xf32> to vector<2x1x64xf32>
    %586 = vector.shape_cast %575 : vector<32x64xf32> to vector<1x32x64xf32>
    %587 = vector.broadcast %585 : vector<2x1x64xf32> to vector<2x32x64xf32>
    %588 = vector.broadcast %586 : vector<1x32x64xf32> to vector<2x32x64xf32>
    %589 = arith.addf %587, %588 : vector<2x32x64xf32>
    %cst_139 = arith.constant dense<0xFF800000> : vector<2x32xf32>
    %590 = vector.multi_reduction <maximumf>, %589, %cst_139 [2] : vector<2x32x64xf32> to vector<2x32xf32>
    %cst_140 = arith.constant dense<0.000000e+00> : vector<2x64xf32>
    %591 = tpu.matmul %590, %576, %cst_140 {dimension_numbers = #tpu.dot_dimension_numbers<[1], [0], [0], [1], [0, 0, 1, 1], [], []>} : vector<2x32xf32>, vector<32x64xf32>, vector<2x64xf32> -> vector<2x64xf32>
    %592 = vector.broadcast %579 : vector<1x64xf32> to vector<2x64xf32>
    %593 = arith.addf %591, %592 : vector<2x64xf32>
    %cst_141 = arith.constant dense<0.000000e+00> : vector<2xf32>
    %594 = vector.multi_reduction <add>, %593, %cst_141 [1] : vector<2x64xf32> to vector<2xf32>
    %595 = vector.shape_cast %594 : vector<2xf32> to vector<2x1xf32>
    %cst_142 = arith.constant 6.400000e+01 : f32
    %596 = vector.broadcast %cst_142 : f32 to vector<2x1xf32>
    %597 = arith.divf %595, %596 : vector<2x1xf32>
    %598 = vector.broadcast %597 : vector<2x1xf32> to vector<2x64xf32>
    %599 = arith.subf %593, %598 : vector<2x64xf32>
    %600 = arith.mulf %599, %599 : vector<2x64xf32>
    %cst_143 = arith.constant dense<0.000000e+00> : vector<2xf32>
    %601 = vector.multi_reduction <add>, %600, %cst_143 [1] : vector<2x64xf32> to vector<2xf32>
    %602 = vector.shape_cast %601 : vector<2xf32> to vector<2x1xf32>
    %cst_144 = arith.constant 6.400000e+01 : f32
    %603 = vector.broadcast %cst_144 : f32 to vector<2x1xf32>
    %604 = arith.divf %602, %603 : vector<2x1xf32>
    %605 = vector.broadcast %597 : vector<2x1xf32> to vector<2x64xf32>
    %606 = arith.subf %593, %605 : vector<2x64xf32>
    %cst_145 = arith.constant 9.99999974E-6 : f32
    %607 = vector.broadcast %cst_145 : f32 to vector<2x1xf32>
    %608 = arith.addf %604, %607 : vector<2x1xf32>
    %609 = math.rsqrt %608 : vector<2x1xf32>
    %610 = vector.broadcast %609 : vector<2x1xf32> to vector<2x64xf32>
    %611 = arith.mulf %606, %610 : vector<2x64xf32>
    %612 = vector.broadcast %580 : vector<1x64xf32> to vector<2x64xf32>
    %613 = arith.mulf %611, %612 : vector<2x64xf32>
    %614 = vector.broadcast %581 : vector<1x64xf32> to vector<2x64xf32>
    %615 = arith.addf %613, %614 : vector<2x64xf32>
    %cst_146 = arith.constant 0.000000e+00 : f32
    %616 = vector.broadcast %cst_146 : f32 to vector<2x64xf32>
    %617 = arith.maximumf %615, %616 : vector<2x64xf32>
    %c0_147 = arith.constant 0 : index
    %c0_148 = arith.constant 0 : index
    %618 = vector.load %arg7[%c0_147, %c0_148] : memref<68x32xf32, #tpu.memory_space<vmem>>, vector<64x32xf32>
    %c64_149 = arith.constant 64 : index
    %c0_150 = arith.constant 0 : index
    %619 = vector.load %arg7[%c64_149, %c0_150] : memref<68x32xf32, #tpu.memory_space<vmem>>, vector<4x32xf32>
    %620 = vector.extract_strided_slice %619 {offsets = [0, 0], sizes = [1, 32], strides = [1, 1]} : vector<4x32xf32> to vector<1x32xf32>
    %621 = vector.extract_strided_slice %619 {offsets = [1, 0], sizes = [1, 32], strides = [1, 1]} : vector<4x32xf32> to vector<1x32xf32>
    %622 = vector.extract_strided_slice %619 {offsets = [2, 0], sizes = [1, 32], strides = [1, 1]} : vector<4x32xf32> to vector<1x32xf32>
    %623 = vector.extract_strided_slice %619 {offsets = [3, 0], sizes = [1, 32], strides = [1, 1]} : vector<4x32xf32> to vector<1x32xf32>
    %cst_151 = arith.constant dense<0.000000e+00> : vector<2x32xf32>
    %624 = tpu.matmul %617, %618, %cst_151 {dimension_numbers = #tpu.dot_dimension_numbers<[1], [0], [0], [1], [0, 0, 1, 1], [], []>} : vector<2x64xf32>, vector<64x32xf32>, vector<2x32xf32> -> vector<2x32xf32>
    %625 = vector.broadcast %620 : vector<1x32xf32> to vector<2x32xf32>
    %626 = arith.addf %624, %625 : vector<2x32xf32>
    %cst_152 = arith.constant dense<0.000000e+00> : vector<2xf32>
    %627 = vector.multi_reduction <add>, %626, %cst_152 [1] : vector<2x32xf32> to vector<2xf32>
    %628 = vector.shape_cast %627 : vector<2xf32> to vector<2x1xf32>
    %cst_153 = arith.constant 3.200000e+01 : f32
    %629 = vector.broadcast %cst_153 : f32 to vector<2x1xf32>
    %630 = arith.divf %628, %629 : vector<2x1xf32>
    %631 = vector.broadcast %630 : vector<2x1xf32> to vector<2x32xf32>
    %632 = arith.subf %626, %631 : vector<2x32xf32>
    %633 = arith.mulf %632, %632 : vector<2x32xf32>
    %cst_154 = arith.constant dense<0.000000e+00> : vector<2xf32>
    %634 = vector.multi_reduction <add>, %633, %cst_154 [1] : vector<2x32xf32> to vector<2xf32>
    %635 = vector.shape_cast %634 : vector<2xf32> to vector<2x1xf32>
    %cst_155 = arith.constant 3.200000e+01 : f32
    %636 = vector.broadcast %cst_155 : f32 to vector<2x1xf32>
    %637 = arith.divf %635, %636 : vector<2x1xf32>
    %638 = vector.broadcast %630 : vector<2x1xf32> to vector<2x32xf32>
    %639 = arith.subf %626, %638 : vector<2x32xf32>
    %cst_156 = arith.constant 9.99999974E-6 : f32
    %640 = vector.broadcast %cst_156 : f32 to vector<2x1xf32>
    %641 = arith.addf %637, %640 : vector<2x1xf32>
    %642 = math.rsqrt %641 : vector<2x1xf32>
    %643 = vector.broadcast %642 : vector<2x1xf32> to vector<2x32xf32>
    %644 = arith.mulf %639, %643 : vector<2x32xf32>
    %645 = vector.broadcast %621 : vector<1x32xf32> to vector<2x32xf32>
    %646 = arith.mulf %644, %645 : vector<2x32xf32>
    %647 = vector.broadcast %622 : vector<1x32xf32> to vector<2x32xf32>
    %648 = arith.addf %646, %647 : vector<2x32xf32>
    %cst_157 = arith.constant 0.000000e+00 : f32
    %649 = vector.broadcast %cst_157 : f32 to vector<2x32xf32>
    %650 = arith.maximumf %648, %649 : vector<2x32xf32>
    %651 = vector.broadcast %623 : vector<1x32xf32> to vector<2x32xf32>
    %652 = arith.mulf %650, %651 : vector<2x32xf32>
    %cst_158 = arith.constant dense<0.000000e+00> : vector<2xf32>
    %653 = vector.multi_reduction <add>, %652, %cst_158 [1] : vector<2x32xf32> to vector<2xf32>
    %654 = vector.shape_cast %653 : vector<2xf32> to vector<2x1xf32>
    %655 = vector.broadcast %2 : f32 to vector<2x1xf32>
    %656 = arith.addf %654, %655 : vector<2x1xf32>
    %657 = arith.negf %656 : vector<2x1xf32>
    %658 = math.exp %657 : vector<2x1xf32>
    %cst_159 = arith.constant 1.000000e+00 : f32
    %659 = vector.broadcast %cst_159 : f32 to vector<2x1xf32>
    %660 = arith.addf %659, %658 : vector<2x1xf32>
    %661 = arith.divf %659, %660 : vector<2x1xf32>
    %c0_160 = arith.constant 0 : index
    %c0_161 = arith.constant 0 : index
    %662 = vector.load %arg8[%c0_160, %c0_161] : memref<2x1xf32, #tpu.memory_space<vmem>>, vector<2x1xf32>
    tpu.vector_store %arg8[%c0_160, %c0_161], %661 {strides = array<i32>} : memref<2x1xf32, #tpu.memory_space<vmem>>, vector<2x1xf32>,
    return
  }
}

</mosaic_0001>

<bundles_post_ra>
// kernel: model2_forward.1
= control target key start
LH: loop header
LB: loop body
LE: loop exit
PB: predicated region body
PF: predicated region fallthrough
CT: control target
= control target key end

     0   :  { %13 = vsyncpa [#allocation6], 0  ;;  %s5883_s0 = inlined_call_operand.vmem [shape: f32[32,16], index: 0, kind: input, shape index: {}]   ;;  %s5884_s1 = inlined_call_operand.vmem [shape: f32[8,2,64], index: 1, kind: input, shape index: {}]   ;;  %s5885_s2 = inlined_call_operand.vmem [shape: f32[2], index: 2, kind: input, shape index: {}]   ;;  %s5886_s3 = inlined_call_operand.hbm [shape: f32[97,256], index: 3, kind: input, shape index: {}]   ;;  %s5887_s4 = inlined_call_operand.vmem [shape: f32[193,256], index: 4, kind: input, shape index: {}]   ;;  %s5888_s5 = inlined_call_operand.vmem [shape: f32[193,256], index: 5, kind: input, shape index: {}]   ;;  %s5889_s6 = inlined_call_operand.vmem [shape: f32[132,64], index: 6, kind: input, shape index: {}]   ;;  %s5890_s7 = inlined_call_operand.vmem [shape: f32[68,32], index: 7, kind: input, shape index: {}]   ;;  %s5891_s8 = inlined_call_operand.vmem [shape: f32[2,1], index: 8, kind: output, shape index: {}]  }
   0x1   :  { %s25_s29 = sshll.u32 %s5885_s2, 4  ;;  %s26_s29 = int_to_ptr.vmem [resolvable:$true] %s25_s29 }
   0x2   :  { %14 = vsyncpa [#allocation5], 0  ;;  %s4632_s30 = scalar_lea.vmem %s26_s29, 16  ;;  %p4637_p1 = scmp.lt.s32.totalorder %s26_s29, %s26_s29 }
   0x3   :  { %p4633_p0 = scmp.ne.s32.totalorder %s26_s29, %s4632_s30  ;;  %p4638_p2 = scmp.lt.s32.totalorder %s4632_s30, %s4632_s30 }
   0x5   :  { %p4639_p3 = por %p4638_p2, %p4637_p1 }
   0x7   :  { %p4640_p4 = pnand %p4639_p3, %p4633_p0 }
   0x9   :  { %4643 = shalt.err (!%p4640_p4)
}
   0xa   :  { %s4670_s9 = smov [#allocation4]   ;;  %s4671_s10 = smov [#allocation7]  }
   0xb   :  { %28 = dma.vmem_to_smem %s26_s29, 16, %s4670_s9, [#allocation6]  }
   0xc   :  { %s34_s11 = sshll.u32 %s4671_s10, 4  ;;  %s4644_s14 = scalar_lea.hbm %s5886_s3, 3328  ;;  %s35_s11 = int_to_ptr.vmem [resolvable:$true] %s34_s11 }
   0xd   :  { %p4645_p5 = scmp.ne.s32.totalorder %s5886_s3, %s4644_s14  ;;  %p4648_p6 = scmp.lt.u32.totalorder %s4644_s14, %s5886_s3 }
   0xf   :  { %p4650_p7 = pnand %p4648_p6, %p4645_p5 }
  0x11   :  { %4653 = shalt.err (!%p4650_p7)
}
  0x12   :  { %s4654_s18 = scalar_lea.vmem %s35_s11, 3328  ;;  %p4659_p9 = scmp.lt.s32.totalorder %s35_s11, %s35_s11 }
  0x13   :  { %p4655_p8 = scmp.ne.s32.totalorder %s35_s11, %s4654_s18  ;;  %p4660_p10 = scmp.lt.s32.totalorder %s4654_s18, %s4654_s18 }
  0x15   :  { %p4661_p11 = por %p4660_p10, %p4659_p9 }
  0x17   :  { %p4662_p12 = pnand %p4661_p11, %p4655_p8 }
  0x19   :  { %4665 = shalt.err (!%p4662_p12)
}
  0x1a   :  { %s4672_s19 = smov 256   ;;  %s4673_s20 = smov 16  }
  0x1b   :  { %40 = dma.hbm_to_vmem [thread:$0]  %s5886_s3, 3328, %s35_s11, [#allocation5], %s4672_s19, %s4672_s19, %s4673_s20  }
  0x1c   :  { %4666 = dma.done.wait [#allocation6], 16  }
  0x1d   :  { %4667 = vsyncadd [#allocation6], 4294967280 }
  0x1e   :  { %4668 = dma.done.wait [#allocation5], 3328  }
  0x1f   :  { %4669 = vsyncadd [#allocation5], 4294963968 }
  0x20   :  { %55 = sfence }
  0x21   :  { %v84_v0 = vld [vmem:[#allocation7 + $0x8] sm:$0xff]  ;;  %v86_v1 = vld [vmem:[#allocation7 + $0x18] sm:$0xff]  ;;  %v83_v5 = vld [vmem:[#allocation7] sm:$0xff]  ;;  %v4674_v7 = vmov 0.0   ;;  %vm104_vm0 = vcmask 130048   ;;  %v66_v41 = vlaneseq  ;;  %v4675_v58 = vmov 0.5  }
  0x22   :  { %v276_v2 = vld [vmem:[#allocation7 + $0x48] sm:$0xff]  ;;  %v3960_v3 = vpack.c.bf16 %v86_v1, %v84_v0  ;;  %v278_v4 = vld [vmem:[#allocation7 + $0x58] sm:$0xff]  ;;  %v85_v6 = vld [vmem:[#allocation7 + $0x10] sm:$0xff]  ;;  %175 = vmatprep.mubr.f32.mxu0 %v4674_v7  ;;  %359 = vmatprep.mubr.f32.mxu1 %v4674_v7  ;;  %vm395_vm2 = vcmask 517120   ;;  %vm291_vm3 = vcmask 523264   ;;  %vm628_vm4 = vcmask 521220  }
  0x23   :  { %v4742_v8 = vpack.c.bf16 %v278_v4, %v276_v2  ;;  %v3962_v9 = vpack.c.bf16 %v85_v6, %v83_v5  ;;  %v275_v10 = vld [vmem:[#allocation7 + $0x40] sm:$0xff]  ;;  %v277_v11 = vld [vmem:[#allocation7 + $0x50] sm:$0xff]  ;;  %v280_v14 = vld [vmem:[#allocation7 + $0x68] sm:$0xff]  ;;  %v4806_v42 = vshrl.u32 %v66_v41, 7  ;;  %v4808_v43 = vand.u32 127, %v66_v41  ;;  %s64_s27 = sld [smem:[#allocation4]] }
  0x24   :  { %v79_v12 = vld [vmem:[%s5883_s0] sm:$0xff]  ;;  %3961 = vmatprep.subr.bf16.mxu0 %v3960_v3  ;;  %v4747_v13 = vpack.c.bf16 %v277_v11, %v275_v10  ;;  %v282_v15 = vld [vmem:[#allocation7 + $0x78] sm:$0xff]  ;;  %v88_v16 = vld [vmem:[#allocation7 + $0x28] sm:$0xff]  ;;  %vm510_vm5 = vcmask 519170   ;;  %vm746_vm6 = vcmask 523270   ;;  %vm4678_vm7 = vmmov 0  }
  0x25   :  { %3969 = vmatprep.subr.bf16.mxu1 %v4742_v8  ;;  %3963 = vmatpush1.bf16.msra.mxu0 %v3962_v9  ;;  %v4750_v17 = vpack.c.bf16 %v282_v15, %v280_v14  ;;  %v90_v18 = vld [vmem:[#allocation7 + $0x38] sm:$0xff]  ;;  %v279_v19 = vld [vmem:[#allocation7 + $0x60] sm:$0xff]  ;;  %v281_v20 = vld [vmem:[#allocation7 + $0x70] sm:$0xff]  ;;  %v4811_v44 = vsub.s32 0, %v4806_v42  ;;  %v4814_v46 = vsub.s32 1, %v4806_v42  ;;  %v68_v47 = vadd.s32 128, %v4808_v43 }
  0x26   :  { %3971 = vmatpush1.bf16.msra.mxu1 %v4747_v13  ;;  %v3964_v21 = vpack.c.bf16 %v90_v18, %v88_v16  ;;  %v4753_v22 = vpack.c.bf16 %v281_v20, %v279_v19  ;;  %v87_v23 = vld [vmem:[#allocation7 + $0x20] sm:$0xff]  ;;  %v89_v24 = vld [vmem:[#allocation7 + $0x30] sm:$0xff]  ;;  %v284_v26 = vld [vmem:[#allocation7 + $0x88] sm:$0xff]  ;;  %vm3577_vm8 = vcmask 130112   ;;  %vm3584_vm9 = vcmask 195712  }
  0x27   :  { %3973 = vmatprep.subr.bf16.mxu1 %v4750_v17  ;;  %v3966_v25 = vpack.c.bf16 %v89_v24, %v87_v23  ;;  %v286_v27 = vld [vmem:[#allocation7 + $0x98] sm:$0xff]  ;;  %v283_v28 = vld [vmem:[#allocation7 + $0x80] sm:$0xff]  ;;  %v285_v30 = vld [vmem:[#allocation7 + $0x90] sm:$0xff]  ;;  %vm72_vm1 = vcmp.lt.s32.totalorder %v68_v47, 192  ;;  %vm3591_vm10 = vcmask 261312   ;;  %vm3612_vm11 = vcmask 1041409  }
  0x28   :  { %3849 = vmatmul.mubr.msk.f32.vlgmr.msra.gmra.mrb[0].mxu0 %vm104_vm0, %v79_v12  ;;  %3965 = vmatprep.subr.bf16.mxu0 %v3964_v21  ;;  %v4757_v29 = vpack.c.bf16 %v286_v27, %v284_v26  ;;  %v288_v31 = vld [vmem:[#allocation7 + $0xa8] sm:$0xff]  ;;  %v290_v33 = vld [vmem:[#allocation7 + $0xb8] sm:$0xff]  ;;  %v4764_v34 = vpack.c.bf16 %v285_v30, %v283_v28  ;;  %v287_v36 = vld [vmem:[#allocation7 + $0xa0] sm:$0xff]  ;;  %v4826_v59 = vsel %vm72_vm1, 1.0, %v4675_v58  ;;  %v4834_v4 = vsel %vm72_vm1, 0.0, %v4675_v58 }
  0x29   :  { %3967 = vmatpush1.bf16.msra.mxu0 %v3966_v25  ;;  %181 = vmatprep.mubr.f32.mxu0 %v4674_v7  ;;  %v80_v32 = vld [vmem:[%s5883_s0 + $0x8] sm:$0xff]  ;;  %v4768_v35 = vpack.c.bf16 %v290_v33, %v288_v31  ;;  %v289_v37 = vld [vmem:[#allocation7 + $0xb0] sm:$0xff]  ;;  %v82_v40 = vld [vmem:[%s5883_s0 + $0x18] sm:$0xff]  ;;  %vm3614_vm12 = vcmask 261120   ;;  %vm3798_vm13 = vcmask 254976   ;;  %vm3840_vm14 = vcmask 1024  }
  0x2a   :  { %3975 = vmatpush1.bf16.msra.mxu1 %v4753_v22  ;;  %3985 = vmatprep.subr.bf16.mxu0 %v4742_v8  ;;  %v81_v38 = vld [vmem:[%s5883_s0 + $0x10] sm:$0xff]  ;;  %v4776_v39 = vpack.c.bf16 %v289_v37, %v287_v36  ;;  %v92_v45 = vld [vmem:[#allocation7 + $0xc0] ss:$8 sm:$0x3]  ;;  %s4676_s0 = smov 64  }
  0x2b   :  { %3977 = vmatprep.subr.bf16.mxu1 %v4757_v29  ;;  %v97_v48 = vrot.slane %v92_v45, %v4811_v44  ;;  %v101_v50 = vrot.slane %v92_v45, %v4814_v46  ;;  %v56_v12 = vld [vmem:[%s5884_s1] sm:$0x3]  ;;  %v57_v24 = vld [vmem:[%s5884_s1 + $0x2] sm:$0x3] }
  0x2c   :  { %3850 = vmatmul.mubr.msk.f32.gmra.mrb[2].mxu0 %vm104_vm0, %v80_v32  ;;  %v500_v25 = vrot.slane %v57_v24, 6 }
  0x2d   :  { %258 = vmatprep.mubr.f32.mxu0 %v4674_v7 }
  0x2e   :  { %3979 = vmatpush1.bf16.msra.mxu1 %v4764_v34 }
  0x2f   :  { %3981 = vmatprep.subr.bf16.mxu1 %v4768_v35 }
  0x30   :  { %3851 = vmatmul.mubr.msk.f32.vlgmr.msra.gmra.mrb[0].mxu0 %vm104_vm0, %v81_v38 }
  0x31   :  { %264 = vmatprep.mubr.f32.mxu0 %v4674_v7  ;;  %3987 = vmatpush1.bf16.msra.mxu0 %v4747_v13 }
  0x32   :  { %3983 = vmatpush1.bf16.msra.mxu1 %v4776_v39  ;;  %3989 = vmatprep.subr.bf16.mxu0 %v4750_v17 }
  0x33   :  { %4001 = vmatprep.subr.bf16.mxu1 %v4742_v8 }
  0x34   :  { %3852 = vmatmul.mubr.msk.f32.gmra.mrb[2].mxu0 %vm104_vm0, %v82_v40 }
  0x35   :  { %360 = vmatmul.mubr.f32.vlgmr.msra.gmra.mrb[0].mxu1 %v4674_v7  ;;  %3991 = vmatpush1.bf16.msra.mxu0 %v4753_v22 }
  0x36   :  { %3993 = vmatprep.subr.bf16.mxu0 %v4757_v29  ;;  %464 = vmatprep.mubr.f32.mxu0 %v4674_v7 }
  0x37   :  { %4003 = vmatpush1.bf16.msra.mxu1 %v4747_v13  ;;  %582 = vmatprep.mubr.f32.mxu1 %v4674_v7 }
  0x38   :  { %4005 = vmatprep.subr.bf16.mxu1 %v4750_v17 }
  0x39   :  { %3995 = vmatpush1.bf16.msra.mxu0 %v4764_v34 }
  0x3a   :  { %3997 = vmatprep.subr.bf16.mxu0 %v4768_v35 }
  0x3b   :  { %4007 = vmatpush1.bf16.msra.mxu1 %v4753_v22 }
  0x3c   :  { %4009 = vmatprep.subr.bf16.mxu1 %v4757_v29 }
  0x3d   :  { %3999 = vmatpush1.bf16.msra.mxu0 %v4776_v39 }
  0x3e   :  { %4017 = vmatprep.subr.bf16.mxu0 %v4742_v8 }
  0x3f   :  { %4011 = vmatpush1.bf16.msra.mxu1 %v4764_v34 }
  0x40   :  { %4013 = vmatprep.subr.bf16.mxu1 %v4768_v35 }
  0x43   :  { %4015 = vmatpush1.bf16.msra.mxu1 %v4776_v39 }
  0x44   :  { %4033 = vmatprep.subr.bf16.mxu1 %v4742_v8 }
 0x103   :  { %v260_v49 = vpop.f32.mrb[0].mxu0 }
 0x104   :  { %v262_v51 = vpop.f32.mrb[1].mxu0  ;;  %v4819_v52 = vadd.f32 %v260_v49, %v97_v48 }
 0x105   :  { %v4821_v54 = vadd.f32 %v262_v51, %v101_v50 }
 0x107   :  { %v266_v53 = vpop.f32.mrb[2].mxu0 }
 0x108   :  { %v4823_v55 = vadd.f32 %v266_v53, %v97_v48  ;;  %v361_v56 = vpop.f32.mrb[0].mxu1  ;;  %v268_v57 = vpop.f32.mrb[3].mxu0 }
 0x109   :  { %v366_v60 = vadd.f32 %v4819_v52, %v361_v56  ;;  %v4829_v61 = vadd.f32 %v268_v57, %v101_v50  ;;  %v363_v62 = vpop.f32.mrb[1].mxu1 }
 0x10a   :  { %v367_v63 = vadd.f32 %v4821_v54, %v363_v62 }
 0x10b   :  { %v368_v0 = vmul.f32 0.5, %v366_v60 }
 0x10c   :  { %v369_v1 = vmul.f32 %v367_v63, %v4826_v59 }
 0x10d   :  { %4480 = vtanh.f32 %v368_v0 }
 0x10e   :  { %4482 = vtanh.f32 %v369_v1  ;;  %v58_v1 = vld [vmem:[%s5884_s1 + $0x4] sm:$0x3] }
 0x117   :  { %v4481_v2 = vpop.eup %4480 }
 0x118   :  { %v4483_v3 = vpop.eup %4482  ;;  %v372_v5 = vmul.f32 0.5, %v4481_v2  ;;  %v618_v2 = vrot.slane %v58_v1, 4 }
 0x119   :  { %v373_v6 = vmul.f32 %v4483_v3, %v4826_v59 }
 0x11a   :  { %v374_v9 = vadd.f32 0.5, %v372_v5 }
 0x11b   :  { %v375_v10 = vadd.f32 %v373_v6, %v4834_v4 }
 0x11c   :  { %v376_v14 = vmul.f32 0.0, %v374_v9 }
 0x11d   :  { %v377_v11 = vmul.f32 %v375_v10, %v374_v9 }
 0x11f   :  { %379 = vrot.lane.b32.xlu0 %v377_v11, %s4676_s0 }
 0x123   :  { %386 = vrot.lane.b32.xlu0 %v56_v12, %s4676_s0 }
 0x127   :  { %501 = vrot.lane.b32.xlu0 %v500_v25, %s4676_s0 }
 0x191   :  { %v380_v15 = vpop.permute.xlu0 %379 }
 0x192   :  { %v382_v16 = vadd.f32 %v380_v15, %v376_v14 }
 0x194   :  { %4484 = vtanh.f32 %v382_v16 }
 0x195   :  { %v4843_v20 = vpop.permute.xlu0 %386 }
 0x196   :  { %v389_v37 = vmul.f32 %v4843_v20, %v382_v16 }
 0x198   :  { %v488_v48 = vrot.slane %v389_v37, 6 }
 0x199   :  { %v4870_v60 = vpop.permute.xlu0 %501 }
 0x19e   :  { %v4485_v18 = vpop.eup %4484 }
 0x19f   :  { %v384_v19 = vmul.f32 %v4485_v18, %v375_v10 }
 0x1a1   :  { %v390_v21 = vmul.f32 %v4843_v20, %v384_v19 }
 0x1a3   :  { %392 = vrot.lane.b32.xlu1 %v390_v21, %s4676_s0 }
 0x215   :  { %v393_v23 = vpop.permute.xlu1 %392 }
 0x216   :  { %396 = vst.msk [vmem:[#allocation2] sm:$0x3] %vm395_vm2, %v393_v23  ;;  %397 = vst.msk [vmem:[#allocation3 + $0xe] sm:$0x3] %vm395_vm2, %v393_v23  ;;  %3853 = vmatmul.mubr.msk.f32.vlgmr.msra.gmra.mrb[4].mxu0 %vm291_vm3, %v393_v23 }
 0x217   :  { %4019 = vmatpush1.bf16.msra.mxu0 %v4747_v13  ;;  %700 = vmatprep.mubr.f32.mxu0 %v4674_v7 }
 0x218   :  { %4021 = vmatprep.subr.bf16.mxu0 %v4750_v17 }
 0x21b   :  { %4023 = vmatpush1.bf16.msra.mxu0 %v4753_v22 }
 0x21c   :  { %4025 = vmatprep.subr.bf16.mxu0 %v4757_v29 }
 0x21f   :  { %4027 = vmatpush1.bf16.msra.mxu0 %v4764_v34 }
 0x220   :  { %4029 = vmatprep.subr.bf16.mxu0 %v4768_v35 }
 0x223   :  { %4031 = vmatpush1.bf16.msra.mxu0 %v4776_v39 }
 0x224   :  { %4049 = vmatprep.subr.bf16.mxu0 %v4742_v8 }
 0x2e9   :  { %v466_v26 = vpop.f32.mrb[4].mxu0 }
 0x2ea   :  { %v473_v27 = vrot.slane %v466_v26, 6  ;;  %v468_v28 = vpop.f32.mrb[5].mxu0 }
 0x2eb   :  { %v474_v30 = vrot.slane %v468_v28, 6 }
 0x2ec   :  { %v477_v31 = vadd.f32 %v4819_v52, %v473_v27 }
 0x2ed   :  { %v478_v32 = vadd.f32 %v4821_v54, %v474_v30 }
 0x2ee   :  { %v479_v33 = vmul.f32 0.5, %v477_v31 }
 0x2ef   :  { %v480_v36 = vmul.f32 %v478_v32, %v4826_v59 }
 0x2f0   :  { %4486 = vtanh.f32 %v479_v33 }
 0x2f1   :  { %4488 = vtanh.f32 %v480_v36 }
 0x2fa   :  { %v4487_v38 = vpop.eup %4486 }
 0x2fb   :  { %v4489_v40 = vpop.eup %4488  ;;  %v483_v41 = vmul.f32 0.5, %v4487_v38 }
 0x2fc   :  { %v484_v45 = vmul.f32 %v4489_v40, %v4826_v59  ;;  %v59_v40 = vld [vmem:[%s5884_s1 + $0x6] sm:$0x3] }
 0x2fd   :  { %v485_v47 = vadd.f32 0.5, %v483_v41  ;;  %v736_v41 = vrot.slane %v59_v40, 2 }
 0x2fe   :  { %v486_v49 = vadd.f32 %v484_v45, %v4834_v4 }
 0x2ff   :  { %v490_v50 = vmul.f32 %v488_v48, %v485_v47 }
 0x300   :  { %v491_v51 = vmul.f32 %v486_v49, %v485_v47 }
 0x302   :  { %493 = vrot.lane.b32.xlu1 %v491_v51, %s4676_s0 }
 0x374   :  { %v494_v53 = vpop.permute.xlu1 %493 }
 0x375   :  { %v496_v56 = vadd.f32 %v494_v53, %v490_v50 }
 0x377   :  { %4490 = vtanh.f32 %v496_v56  ;;  %v504_v15 = vmul.f32 %v4870_v60, %v496_v56 }
 0x379   :  { %v606_v24 = vrot.slane %v504_v15, 6 }
 0x381   :  { %v4491_v57 = vpop.eup %4490 }
 0x382   :  { %v498_v58 = vmul.f32 %v4491_v57, %v486_v49 }
 0x384   :  { %v4873_v62 = vmul.f32 %v4870_v60, %v498_v58 }
 0x386   :  { %v513_v63 = vrot.slane %v4873_v62, 2 }
 0x388   :  { %514 = vrot.lane.b32.xlu1 %v513_v63, %s4676_s0 }
 0x38c   :  { %619 = vrot.lane.b32.xlu1 %v618_v2, %s4676_s0 }
 0x3fa   :  { %v515_v0 = vpop.permute.xlu1 %514 }
 0x3fb   :  { %3854 = vmatmul.mubr.msk.f32.vlgmr.msra.gmra.mrb[2].mxu1 %vm291_vm3, %v515_v0 }
 0x3fc   :  { %4035 = vmatpush1.bf16.msra.mxu1 %v4747_v13  ;;  %818 = vmatprep.mubr.f32.mxu1 %v4674_v7 }
 0x3fd   :  { %4037 = vmatprep.subr.bf16.mxu1 %v4750_v17 }
 0x3fe   :  { %v4898_v33 = vpop.permute.xlu1 %619 }
 0x400   :  { %4039 = vmatpush1.bf16.msra.mxu1 %v4753_v22 }
 0x401   :  { %4041 = vmatprep.subr.bf16.mxu1 %v4757_v29 }
 0x404   :  { %4043 = vmatpush1.bf16.msra.mxu1 %v4764_v34 }
 0x405   :  { %4045 = vmatprep.subr.bf16.mxu1 %v4768_v35 }
 0x408   :  { %4047 = vmatpush1.bf16.msra.mxu1 %v4776_v39 }
 0x409   :  { %4065 = vmatprep.subr.bf16.mxu1 %v4742_v8 }
 0x4ce   :  { %v584_v3 = vpop.f32.mrb[2].mxu1 }
 0x4cf   :  { %v591_v5 = vrot.slane %v584_v3, 4  ;;  %v586_v6 = vpop.f32.mrb[3].mxu1 }
 0x4d0   :  { %v592_v9 = vrot.slane %v586_v6, 4 }
 0x4d1   :  { %v595_v10 = vadd.f32 %v4819_v52, %v591_v5 }
 0x4d2   :  { %v596_v11 = vadd.f32 %v4821_v54, %v592_v9 }
 0x4d3   :  { %v597_v12 = vmul.f32 0.5, %v595_v10 }
 0x4d4   :  { %v598_v14 = vmul.f32 %v596_v11, %v4826_v59 }
 0x4d5   :  { %4492 = vtanh.f32 %v597_v12 }
 0x4d6   :  { %4494 = vtanh.f32 %v598_v14 }
 0x4df   :  { %v4493_v16 = vpop.eup %4492 }
 0x4e0   :  { %v4495_v18 = vpop.eup %4494  ;;  %v601_v19 = vmul.f32 0.5, %v4493_v16  ;;  %v60_v16 = vld [vmem:[%s5884_s1 + $0x8] sm:$0x3] }
 0x4e1   :  { %v602_v21 = vmul.f32 %v4495_v18, %v4826_v59 }
 0x4e2   :  { %v603_v23 = vadd.f32 0.5, %v601_v19 }
 0x4e3   :  { %v604_v25 = vadd.f32 %v602_v21, %v4834_v4 }
 0x4e4   :  { %v608_v26 = vmul.f32 %v606_v24, %v603_v23 }
 0x4e5   :  { %v609_v27 = vmul.f32 %v604_v25, %v603_v23 }
 0x4e7   :  { %611 = vrot.lane.b32.xlu0 %v609_v27, %s4676_s0 }
 0x559   :  { %v612_v28 = vpop.permute.xlu0 %611 }
 0x55a   :  { %v614_v30 = vadd.f32 %v612_v28, %v608_v26 }
 0x55c   :  { %4496 = vtanh.f32 %v614_v30 }
 0x566   :  { %v4497_v31 = vpop.eup %4496 }
 0x567   :  { %v616_v32 = vmul.f32 %v4497_v31, %v604_v25 }
 0x569   :  { %v4901_v36 = vmul.f32 %v4898_v33, %v616_v32 }
 0x56b   :  { %v631_v37 = vrot.slane %v4901_v36, 4 }
 0x56d   :  { %632 = vrot.lane.b32.xlu0 %v631_v37, %s4676_s0 }
 0x571   :  { %737 = vrot.lane.b32.xlu0 %v736_v41, %s4676_s0 }
 0x5df   :  { %v633_v38 = vpop.permute.xlu0 %632 }
 0x5e0   :  { %3855 = vmatmul.mubr.msk.f32.vlgmr.msra.gmra.mrb[6].mxu0 %vm291_vm3, %v633_v38 }
 0x5e1   :  { %4051 = vmatpush1.bf16.msra.mxu0 %v4747_v13  ;;  %925 = vmatprep.mubr.f32.mxu0 %v4674_v7 }
 0x5e2   :  { %4053 = vmatprep.subr.bf16.mxu0 %v4750_v17 }
 0x5e3   :  { %v4926_v11 = vpop.permute.xlu0 %737 }
 0x5e5   :  { %4055 = vmatpush1.bf16.msra.mxu0 %v4753_v22 }
 0x5e6   :  { %4057 = vmatprep.subr.bf16.mxu0 %v4757_v29 }
 0x5e9   :  { %4059 = vmatpush1.bf16.msra.mxu0 %v4764_v34 }
 0x5ea   :  { %4061 = vmatprep.subr.bf16.mxu0 %v4768_v35 }
 0x5ed   :  { %4063 = vmatpush1.bf16.msra.mxu0 %v4776_v39 }
 0x5ee   :  { %4081 = vmatprep.subr.bf16.mxu0 %v4742_v8  ;;  %v622_v8 = vmul.f32 %v4898_v33, %v614_v30 }
 0x5f0   :  { %v724_v2 = vrot.slane %v622_v8, 6 }
 0x6b3   :  { %v702_v45 = vpop.f32.mrb[6].mxu0 }
 0x6b4   :  { %v709_v47 = vrot.slane %v702_v45, 2  ;;  %v704_v48 = vpop.f32.mrb[7].mxu0 }
 0x6b5   :  { %v710_v49 = vrot.slane %v704_v48, 2 }
 0x6b6   :  { %v713_v50 = vadd.f32 %v4819_v52, %v709_v47 }
 0x6b7   :  { %v714_v51 = vadd.f32 %v4821_v54, %v710_v49 }
 0x6b8   :  { %v715_v53 = vmul.f32 0.5, %v713_v50 }
 0x6b9   :  { %v716_v56 = vmul.f32 %v714_v51, %v4826_v59 }
 0x6ba   :  { %4498 = vtanh.f32 %v715_v53 }
 0x6bb   :  { %4500 = vtanh.f32 %v716_v56  ;;  %v61_v56 = vld [vmem:[%s5884_s1 + $0xa] sm:$0x3] }
 0x6bc   :  { %v961_v8 = vrot.slane %v61_v56, 6 }
 0x6c4   :  { %v4499_v57 = vpop.eup %4498 }
 0x6c5   :  { %v4501_v58 = vpop.eup %4500  ;;  %v719_v63 = vmul.f32 0.5, %v4499_v57 }
 0x6c6   :  { %v720_v0 = vmul.f32 %v4501_v58, %v4826_v59 }
 0x6c7   :  { %v721_v1 = vadd.f32 0.5, %v719_v63 }
 0x6c8   :  { %v722_v3 = vadd.f32 %v720_v0, %v4834_v4 }
 0x6c9   :  { %v726_v5 = vmul.f32 %v724_v2, %v721_v1 }
 0x6ca   :  { %v727_v52 = vmul.f32 %v722_v3, %v721_v1 }
 0x6cc   :  { %729 = vrot.lane.b32.xlu1 %v727_v52, %s4676_s0 }
 0x73e   :  { %v730_v54 = vpop.permute.xlu1 %729 }
 0x73f   :  { %v732_v6 = vadd.f32 %v730_v54, %v726_v5 }
 0x741   :  { %4502 = vtanh.f32 %v732_v6  ;;  %v740_v26 = vmul.f32 %v4926_v11, %v732_v6 }
 0x743   :  { %v836_v37 = vrot.slane %v740_v26, 6 }
 0x74b   :  { %v4503_v9 = vpop.eup %4502 }
 0x74c   :  { %v734_v10 = vmul.f32 %v4503_v9, %v722_v3 }
 0x74e   :  { %v4929_v12 = vmul.f32 %v4926_v11, %v734_v10 }
 0x750   :  { %v749_v14 = vrot.slane %v4929_v12, 6 }
 0x752   :  { %750 = vrot.lane.b32.xlu1 %v749_v14, %s4676_s0 }
 0x756   :  { %848 = vrot.lane.b32.xlu1 %v60_v16, %s4676_s0 }
 0x7c4   :  { %v751_v15 = vpop.permute.xlu1 %750 }
 0x7c5   :  { %3856 = vmatmul.mubr.msk.f32.vlgmr.msra.gmra.mrb[4].mxu1 %vm291_vm3, %v751_v15 }
 0x7c6   :  { %4067 = vmatpush1.bf16.msra.mxu1 %v4747_v13  ;;  %1042 = vmatprep.mubr.f32.mxu1 %v4674_v7 }
 0x7c7   :  { %4069 = vmatprep.subr.bf16.mxu1 %v4750_v17 }
 0x7c8   :  { %v4953_v50 = vpop.permute.xlu1 %848 }
 0x7ca   :  { %4071 = vmatpush1.bf16.msra.mxu1 %v4753_v22 }
 0x7cb   :  { %4073 = vmatprep.subr.bf16.mxu1 %v4757_v29 }
 0x7ce   :  { %4075 = vmatpush1.bf16.msra.mxu1 %v4764_v34 }
 0x7cf   :  { %4077 = vmatprep.subr.bf16.mxu1 %v4768_v35 }
 0x7d2   :  { %4079 = vmatpush1.bf16.msra.mxu1 %v4776_v39 }
 0x898   :  { %v820_v18 = vpop.f32.mrb[4].mxu1 }
 0x899   :  { %v825_v19 = vadd.f32 %v4823_v55, %v820_v18  ;;  %v822_v21 = vpop.f32.mrb[5].mxu1 }
 0x89a   :  { %v826_v23 = vadd.f32 %v4829_v61, %v822_v21 }
 0x89b   :  { %v827_v24 = vmul.f32 0.5, %v825_v19 }
 0x89c   :  { %v828_v25 = vmul.f32 %v826_v23, %v4826_v59  ;;  %v62_v23 = vld [vmem:[%s5884_s1 + $0xc] sm:$0x3] }
 0x89d   :  { %4504 = vtanh.f32 %v827_v24  ;;  %v1078_v24 = vrot.slane %v62_v23, 4 }
 0x89e   :  { %4506 = vtanh.f32 %v828_v25 }
 0x8a7   :  { %v4505_v27 = vpop.eup %4504 }
 0x8a8   :  { %v4507_v28 = vpop.eup %4506  ;;  %v831_v30 = vmul.f32 0.5, %v4505_v27 }
 0x8a9   :  { %v832_v31 = vmul.f32 %v4507_v28, %v4826_v59 }
 0x8aa   :  { %v833_v32 = vadd.f32 0.5, %v831_v30 }
 0x8ab   :  { %v834_v38 = vadd.f32 %v832_v31, %v4834_v4 }
 0x8ac   :  { %v838_v40 = vmul.f32 %v836_v37, %v833_v32 }
 0x8ad   :  { %v839_v41 = vmul.f32 %v834_v38, %v833_v32 }
 0x8af   :  { %841 = vrot.lane.b32.xlu0 %v839_v41, %s4676_s0 }
 0x921   :  { %v842_v45 = vpop.permute.xlu0 %841 }
 0x922   :  { %v844_v47 = vadd.f32 %v842_v45, %v838_v40 }
 0x924   :  { %4508 = vtanh.f32 %v844_v47 }
 0x92e   :  { %v4509_v48 = vpop.eup %4508 }
 0x92f   :  { %v846_v49 = vmul.f32 %v4509_v48, %v834_v38 }
 0x931   :  { %v852_v51 = vmul.f32 %v4953_v50, %v846_v49 }
 0x933   :  { %854 = vrot.lane.b32.xlu0 %v852_v51, %s4676_s0 }
 0x937   :  { %962 = vrot.lane.b32.xlu0 %v961_v8, %s4676_s0 }
 0x9a5   :  { %v855_v53 = vpop.permute.xlu0 %854 }
 0x9a6   :  { %857 = vst.msk [vmem:[#allocation2 + $0x8] sm:$0x3] %vm395_vm2, %v855_v53  ;;  %858 = vst.msk [vmem:[#allocation3 + $0x6] sm:$0x3] %vm395_vm2, %v855_v53  ;;  %3857 = vmatmul.mubr.msk.f32.vlgmr.msra.gmra.mrb[8].mxu0 %vm291_vm3, %v855_v53 }
 0x9a7   :  { %4083 = vmatpush1.bf16.msra.mxu0 %v4747_v13  ;;  %1159 = vmatprep.mubr.f32.mxu0 %v4674_v7 }
 0x9a8   :  { %4085 = vmatprep.subr.bf16.mxu0 %v4750_v17 }
 0x9a9   :  { %v4979_v16 = vpop.permute.xlu0 %962 }
 0x9ab   :  { %4087 = vmatpush1.bf16.msra.mxu0 %v4753_v22 }
 0x9ac   :  { %4089 = vmatprep.subr.bf16.mxu0 %v4757_v29 }
 0x9af   :  { %4091 = vmatpush1.bf16.msra.mxu0 %v4764_v34 }
 0x9b0   :  { %4093 = vmatprep.subr.bf16.mxu0 %v4768_v35 }
 0x9b3   :  { %4095 = vmatpush1.bf16.msra.mxu0 %v4776_v39  ;;  %v851_v39 = vmul.f32 %v4953_v50, %v844_v47 }
 0x9b5   :  { %v949_v5 = vrot.slane %v851_v39, 6 }
 0xa79   :  { %v927_v13 = vpop.f32.mrb[8].mxu0 }
 0xa7a   :  { %v934_v57 = vrot.slane %v927_v13, 6  ;;  %v929_v17 = vpop.f32.mrb[9].mxu0 }
 0xa7b   :  { %v935_v58 = vrot.slane %v929_v17, 6 }
 0xa7c   :  { %v938_v22 = vadd.f32 %v4823_v55, %v934_v57 }
 0xa7d   :  { %v939_v29 = vadd.f32 %v4829_v61, %v935_v58 }
 0xa7e   :  { %v940_v34 = vmul.f32 0.5, %v938_v22 }
 0xa7f   :  { %v941_v35 = vmul.f32 %v939_v29, %v4826_v59  ;;  %v63_v29 = vld [vmem:[%s5884_s1 + $0xe] sm:$0x3] }
 0xa80   :  { %4510 = vtanh.f32 %v940_v34 }
 0xa81   :  { %4512 = vtanh.f32 %v941_v35  ;;  %v1195_v35 = vrot.slane %v63_v29, 2 }
 0xa8a   :  { %v4511_v63 = vpop.eup %4510 }
 0xa8b   :  { %v4513_v0 = vpop.eup %4512  ;;  %v944_v1 = vmul.f32 0.5, %v4511_v63 }
 0xa8c   :  { %v945_v2 = vmul.f32 %v4513_v0, %v4826_v59 }
 0xa8d   :  { %v946_v3 = vadd.f32 0.5, %v944_v1 }
 0xa8e   :  { %v947_v52 = vadd.f32 %v945_v2, %v4834_v4 }
 0xa8f   :  { %v951_v54 = vmul.f32 %v949_v5, %v946_v3 }
 0xa90   :  { %v952_v6 = vmul.f32 %v947_v52, %v946_v3 }
 0xa92   :  { %954 = vrot.lane.b32.xlu1 %v952_v6, %s4676_s0 }
 0xb04   :  { %v955_v9 = vpop.permute.xlu1 %954 }
 0xb05   :  { %v957_v10 = vadd.f32 %v955_v9, %v951_v54 }
 0xb07   :  { %4514 = vtanh.f32 %v957_v10  ;;  %v965_v38 = vmul.f32 %v4979_v16, %v957_v10  ;;  %v1211_v10 = vld [vmem:[%s5887_s4 + $0x8] sm:$0xff] }
 0xb09   :  { %v1066_v49 = vrot.slane %v965_v38, 6 }
 0xb11   :  { %v4515_v14 = vpop.eup %4514 }
 0xb12   :  { %v959_v15 = vmul.f32 %v4515_v14, %v947_v52  ;;  %v1213_v14 = vld [vmem:[%s5887_s4 + $0x18] sm:$0xff] }
 0xb14   :  { %v966_v18 = vmul.f32 %v4979_v16, %v959_v15  ;;  %v4096_v15 = vpack.c.bf16 %v1213_v14, %v1211_v10  ;;  %v1432_v10 = vld [vmem:[%s5887_s4 + $0x138] sm:$0xff] }
 0xb16   :  { %v973_v19 = vrot.slane %v966_v18, 2  ;;  %4097 = vmatprep.subr.bf16.mxu1 %v4096_v15 }
 0xb18   :  { %974 = vrot.lane.b32.xlu1 %v973_v19, %s4676_s0  ;;  %v1215_v19 = vld [vmem:[%s5887_s4 + $0x28] sm:$0xff] }
 0xb1c   :  { %1079 = vrot.lane.b32.xlu1 %v1078_v24, %s4676_s0  ;;  %v1214_v24 = vld [vmem:[%s5887_s4 + $0x20] sm:$0xff] }
 0xb8a   :  { %v975_v21 = vpop.permute.xlu1 %974 }
 0xb8b   :  { %3858 = vmatmul.mubr.msk.f32.vlgmr.msra.gmra.mrb[6].mxu1 %vm291_vm3, %v975_v21  ;;  %v1217_v21 = vld [vmem:[%s5887_s4 + $0x38] sm:$0xff] }
 0xb8c   :  { %1325 = vmatprep.mubr.f32.mxu1 %v4674_v7  ;;  %v4100_v23 = vpack.c.bf16 %v1217_v21, %v1215_v19  ;;  %v1433_v19 = vld [vmem:[%s5887_s4 + $0x140] sm:$0xff]  ;;  %v1435_v21 = vld [vmem:[%s5887_s4 + $0x150] sm:$0xff] }
 0xb8e   :  { %v4996_v58 = vpop.permute.xlu1 %1079 }
 0xc5e   :  { %v1044_v25 = vpop.f32.mrb[6].mxu1 }
 0xc5f   :  { %v1051_v26 = vrot.slane %v1044_v25, 4  ;;  %v1046_v27 = vpop.f32.mrb[7].mxu1  ;;  %v1216_v25 = vld [vmem:[%s5887_s4 + $0x30] sm:$0xff] }
 0xc60   :  { %v1052_v28 = vrot.slane %v1046_v27, 4 }
 0xc61   :  { %v1055_v30 = vadd.f32 %v4823_v55, %v1051_v26  ;;  %v4102_v26 = vpack.c.bf16 %v1216_v25, %v1214_v24  ;;  %v5140_v24 = vpack.c.bf16 %v1435_v21, %v1433_v19  ;;  %v1226_v25 = vld [vmem:[%s5887_s4 + $0x80] sm:$0xff] }
 0xc62   :  { %v1056_v31 = vadd.f32 %v4829_v61, %v1052_v28 }
 0xc63   :  { %v1057_v32 = vmul.f32 0.5, %v1055_v30  ;;  %v1219_v30 = vld [vmem:[%s5887_s4 + $0x48] sm:$0xff] }
 0xc64   :  { %v1058_v37 = vmul.f32 %v1056_v31, %v4826_v59  ;;  %v1221_v31 = vld [vmem:[%s5887_s4 + $0x58] sm:$0xff] }
 0xc65   :  { %4516 = vtanh.f32 %v1057_v32  ;;  %v4104_v38 = vpack.c.bf16 %v1221_v31, %v1219_v30  ;;  %v1438_v30 = vld [vmem:[%s5887_s4 + $0x168] sm:$0xff] }
 0xc66   :  { %4518 = vtanh.f32 %v1058_v37 }
 0xc6f   :  { %v4517_v40 = vpop.eup %4516 }
 0xc70   :  { %v4519_v41 = vpop.eup %4518  ;;  %v1061_v45 = vmul.f32 0.5, %v4517_v40  ;;  %v1218_v40 = vld [vmem:[%s5887_s4 + $0x40] sm:$0xff] }
 0xc71   :  { %v1062_v47 = vmul.f32 %v4519_v41, %v4826_v59  ;;  %v1220_v41 = vld [vmem:[%s5887_s4 + $0x50] sm:$0xff] }
 0xc72   :  { %v1063_v48 = vadd.f32 0.5, %v1061_v45 }
 0xc73   :  { %v1064_v51 = vadd.f32 %v1062_v47, %v4834_v4  ;;  %v4106_v47 = vpack.c.bf16 %v1220_v41, %v1218_v40 }
 0xc74   :  { %v1068_v53 = vmul.f32 %v1066_v49, %v1063_v48 }
 0xc75   :  { %v1069_v56 = vmul.f32 %v1064_v51, %v1063_v48 }
 0xc77   :  { %1071 = vrot.lane.b32.xlu0 %v1069_v56, %s4676_s0  ;;  %v1225_v56 = vld [vmem:[%s5887_s4 + $0x78] sm:$0xff] }
 0xce9   :  { %v1072_v8 = vpop.permute.xlu0 %1071 }
 0xcea   :  { %v1074_v13 = vadd.f32 %v1072_v8, %v1068_v53  ;;  %v1223_v53 = vld [vmem:[%s5887_s4 + $0x68] sm:$0xff] }
 0xcec   :  { %4520 = vtanh.f32 %v1074_v13  ;;  %v1082_v27 = vmul.f32 %v4996_v58, %v1074_v13  ;;  %v4108_v13 = vpack.c.bf16 %v1225_v56, %v1223_v53  ;;  %v1230_v53 = vld [vmem:[%s5887_s4 + $0xa0] sm:$0xff]  ;;  %v1232_v56 = vld [vmem:[%s5887_s4 + $0xb0] sm:$0xff] }
 0xcee   :  { %v1183_v49 = vrot.slane %v1082_v27, 6  ;;  %v1231_v27 = vld [vmem:[%s5887_s4 + $0xa8] sm:$0xff] }
 0xcf6   :  { %v4521_v57 = vpop.eup %4520 }
 0xcf7   :  { %v1076_v17 = vmul.f32 %v4521_v57, %v1064_v51  ;;  %v1222_v57 = vld [vmem:[%s5887_s4 + $0x60] sm:$0xff] }
 0xcf9   :  { %v4999_v22 = vmul.f32 %v4996_v58, %v1076_v17  ;;  %v1224_v17 = vld [vmem:[%s5887_s4 + $0x70] sm:$0xff] }
 0xcfb   :  { %v1090_v34 = vrot.slane %v4999_v22, 4 }
 0xcfd   :  { %1091 = vrot.lane.b32.xlu0 %v1090_v34, %s4676_s0  ;;  %v4110_v34 = vpack.c.bf16 %v1224_v17, %v1222_v57  ;;  %v1235_v57 = vld [vmem:[%s5887_s4 + $0xc8] sm:$0xff]  ;;  %v4118_v17 = vpack.c.bf16 %v1232_v56, %v1230_v53 }
 0xd01   :  { %1196 = vrot.lane.b32.xlu0 %v1195_v35, %s4676_s0  ;;  %v1227_v35 = vld [vmem:[%s5887_s4 + $0x88] sm:$0xff] }
 0xd05   :  { %625 = vrot.lane.b32.xlu0 %v4901_v36, %s4676_s0 }
 0xd09   :  { %968 = vrot.lane.b32.xlu0 %v966_v18, %s4676_s0 }
 0xd6f   :  { %v1092_v39 = vpop.permute.xlu0 %1091 }
 0xd70   :  { %3859 = vmatmul.mubr.msk.f32.vlgmr.msra.gmra.mrb[10].mxu0 %vm291_vm3, %v1092_v39  ;;  %v1229_v39 = vld [vmem:[%s5887_s4 + $0x98] sm:$0xff] }
 0xd71   :  { %1505 = vmatprep.mubr.f32.mxu0 %v4674_v7 }
 0xd73   :  { %v5012_v63 = vpop.permute.xlu0 %1196 }
 0xd77   :  { %v626_v0 = vpop.permute.xlu0 %625 }
 0xd78   :  { %629 = vst.msk [vmem:[#allocation2] sm:$0x30] %vm628_vm4, %v626_v0  ;;  %630 = vst.msk [vmem:[#allocation3 + $0x6] sm:$0x30] %vm628_vm4, %v626_v0  ;;  %v4112_v0 = vpack.c.bf16 %v1229_v39, %v1227_v35  ;;  %v1236_v35 = vld [vmem:[%s5887_s4 + $0xd0] sm:$0xff]  ;;  %v1239_v39 = vld [vmem:[%s5887_s4 + $0xe8] sm:$0xff] }
 0xd7b   :  { %v969_v1 = vpop.permute.xlu0 %968 }
 0xd7c   :  { %971 = vst.msk [vmem:[#allocation2 + $0x8] sm:$0xc] %vm510_vm5, %v969_v1  ;;  %972 = vst.msk [vmem:[#allocation3 + $0x2] sm:$0xc] %vm510_vm5, %v969_v1  ;;  %v1426_v1 = vld [vmem:[%s5887_s4 + $0x108] sm:$0xff] }
 0xe43   :  { %v1161_v36 = vpop.f32.mrb[10].mxu0 }
 0xe44   :  { %v1168_v2 = vrot.slane %v1161_v36, 2  ;;  %v1163_v3 = vpop.f32.mrb[11].mxu0  ;;  %v1428_v36 = vld [vmem:[%s5887_s4 + $0x118] sm:$0xff] }
 0xe45   :  { %v1169_v5 = vrot.slane %v1163_v3, 2  ;;  %v1427_v3 = vld [vmem:[%s5887_s4 + $0x110] sm:$0xff] }
 0xe46   :  { %v1172_v52 = vadd.f32 %v4823_v55, %v1168_v2  ;;  %v1210_v55 = vld [vmem:[%s5887_s4] sm:$0xff]  ;;  %v5090_v2 = vpack.c.bf16 %v1428_v36, %v1426_v1 }
 0xe47   :  { %v1173_v54 = vadd.f32 %v4829_v61, %v1169_v5  ;;  %v1212_v61 = vld [vmem:[%s5887_s4 + $0x10] sm:$0xff] }
 0xe48   :  { %v1174_v6 = vmul.f32 0.5, %v1172_v52  ;;  %v4098_v18 = vpack.c.bf16 %v1212_v61, %v1210_v55  ;;  %4129 = vmatprep.subr.bf16.mxu0 %v5090_v2  ;;  %v1434_v55 = vld [vmem:[%s5887_s4 + $0x148] sm:$0xff]  ;;  %v1436_v61 = vld [vmem:[%s5887_s4 + $0x158] sm:$0xff] }
 0xe49   :  { %v1175_v9 = vmul.f32 %v1173_v54, %v4826_v59 }
 0xe4a   :  { %4522 = vtanh.f32 %v1174_v6  ;;  %4099 = vmatpush1.bf16.msra.mxu1 %v4098_v18  ;;  %v1430_v6 = vld [vmem:[%s5887_s4 + $0x128] sm:$0xff]  ;;  %v5131_v18 = vpack.c.bf16 %v1436_v61, %v1434_v55 }
 0xe4b   :  { %4524 = vtanh.f32 %v1175_v9  ;;  %4101 = vmatprep.subr.bf16.mxu1 %v4100_v23  ;;  %v5120_v14 = vpack.c.bf16 %v1432_v10, %v1430_v6  ;;  %v3860_v55 = vld [vmem:[%s5887_s4 + $0x180] ss:$8 sm:$0x3] }
 0xe4c   :  { %v1248_v61 = vrot.slane %v3860_v55, %v4811_v44  ;;  %v1252_v19 = vrot.slane %v3860_v55, %v4814_v46 }
 0xe4e   :  { %4103 = vmatpush1.bf16.msra.mxu1 %v4102_v26  ;;  %v1228_v26 = vld [vmem:[%s5887_s4 + $0x90] sm:$0xff] }
 0xe4f   :  { %4105 = vmatprep.subr.bf16.mxu1 %v4104_v38  ;;  %v1439_v38 = vld [vmem:[%s5887_s4 + $0x170] sm:$0xff] }
 0xe52   :  { %4107 = vmatpush1.bf16.msra.mxu1 %v4106_v47 }
 0xe53   :  { %4109 = vmatprep.subr.bf16.mxu1 %v4108_v13 }
 0xe54   :  { %v4523_v28 = vpop.eup %4522 }
 0xe55   :  { %v4525_v32 = vpop.eup %4524  ;;  %v1178_v37 = vmul.f32 0.5, %v4523_v28  ;;  %v1233_v28 = vld [vmem:[%s5887_s4 + $0xb8] sm:$0xff] }
 0xe56   :  { %v1179_v45 = vmul.f32 %v4525_v32, %v4826_v59  ;;  %4111 = vmatpush1.bf16.msra.mxu1 %v4110_v34  ;;  %v1440_v32 = vld [vmem:[%s5887_s4 + $0x178] sm:$0xff]  ;;  %v1234_v34 = vld [vmem:[%s5887_s4 + $0xc0] sm:$0xff] }
 0xe57   :  { %v1180_v48 = vadd.f32 0.5, %v1178_v37  ;;  %4113 = vmatprep.subr.bf16.mxu1 %v4112_v0  ;;  %v1437_v37 = vld [vmem:[%s5887_s4 + $0x160] sm:$0xff]  ;;  %v5172_v41 = vpack.c.bf16 %v1440_v32, %v1438_v30  ;;  %v1241_v0 = vld [vmem:[%s5887_s4 + $0xf8] sm:$0xff]  ;;  %v4122_v1 = vpack.c.bf16 %v1236_v35, %v1234_v34 }
 0xe58   :  { %v5060_v51 = vadd.f32 %v1179_v45, %v4834_v4  ;;  %v5174_v45 = vpack.c.bf16 %v1439_v38, %v1437_v37  ;;  %v4124_v36 = vpack.c.bf16 %v1241_v0, %v1239_v39 }
 0xe59   :  { %v1185_v8 = vmul.f32 %v1183_v49, %v1180_v48  ;;  %v4116_v49 = vpack.c.bf16 %v1233_v28, %v1231_v27 }
 0xe5a   :  { %v1186_v29 = vmul.f32 %v5060_v51, %v1180_v48  ;;  %v4114_v48 = vpack.c.bf16 %v1228_v26, %v1226_v25 }
 0xe5c   :  { %1188 = vrot.lane.b32.xlu1 %v1186_v29, %s4676_s0 }
 0xe60   :  { %507 = vrot.lane.b32.xlu1 %v4873_v62, %s4676_s0  ;;  %v1425_v62 = vld [vmem:[%s5887_s4 + $0x100] sm:$0xff] }
 0xe61   :  { %v5098_v5 = vpack.c.bf16 %v1427_v3, %v1425_v62  ;;  %v1238_v62 = vld [vmem:[%s5887_s4 + $0xe0] sm:$0xff]  ;;  %v1240_v3 = vld [vmem:[%s5887_s4 + $0xf0] sm:$0xff] }
 0xe63   :  { %4131 = vmatpush1.bf16.msra.mxu0 %v5098_v5 }
 0xe64   :  { %743 = vrot.lane.b32.xlu1 %v4929_v12, %s4676_s0  ;;  %v1429_v12 = vld [vmem:[%s5887_s4 + $0x120] sm:$0xff]  ;;  %4133 = vmatprep.subr.bf16.mxu0 %v5120_v14 }
 0xe68   :  { %1085 = vrot.lane.b32.xlu1 %v4999_v22, %s4676_s0  ;;  %v1431_v22 = vld [vmem:[%s5887_s4 + $0x130] sm:$0xff] }
 0xe69   :  { %v5122_v15 = vpack.c.bf16 %v1431_v22, %v1429_v12 }
 0xe6b   :  { %4135 = vmatpush1.bf16.msra.mxu0 %v5122_v15 }
 0xe6c   :  { %4137 = vmatprep.subr.bf16.mxu0 %v5131_v18 }
 0xe6f   :  { %4139 = vmatpush1.bf16.msra.mxu0 %v5140_v24 }
 0xe70   :  { %4141 = vmatprep.subr.bf16.mxu0 %v5172_v41 }
 0xe73   :  { %4143 = vmatpush1.bf16.msra.mxu0 %v5174_v45 }
 0xe74   :  { %4145 = vmatprep.subr.bf16.mxu0 %v5090_v2 }
 0xe76   :  { %1506 = vmatmul.mubr.f32.vlgmr.msra.gmra.mrb[12].mxu0 %v4674_v7 }
 0xe77   :  { %4147 = vmatpush1.bf16.msra.mxu0 %v5098_v5  ;;  %1605 = vmatprep.mubr.f32.mxu0 %v4674_v7 }
 0xe78   :  { %4149 = vmatprep.subr.bf16.mxu0 %v5120_v14 }
 0xe7b   :  { %4151 = vmatpush1.bf16.msra.mxu0 %v5122_v15 }
 0xe7c   :  { %4153 = vmatprep.subr.bf16.mxu0 %v5131_v18 }
 0xe7f   :  { %4155 = vmatpush1.bf16.msra.mxu0 %v5140_v24 }
 0xe80   :  { %4157 = vmatprep.subr.bf16.mxu0 %v5172_v41 }
 0xe83   :  { %4159 = vmatpush1.bf16.msra.mxu0 %v5174_v45 }
 0xe84   :  { %4177 = vmatprep.subr.bf16.mxu0 %v5090_v2 }
 0xece   :  { %v1189_v52 = vpop.permute.xlu1 %1188 }
 0xecf   :  { %v1191_v54 = vadd.f32 %v1189_v52, %v1185_v8  ;;  %v4126_v52 = vpack.c.bf16 %v1240_v3, %v1238_v62 }
 0xed1   :  { %4526 = vtanh.f32 %v1191_v54 }
 0xed2   :  { %v508_v9 = vpop.permute.xlu1 %507 }
 0xed3   :  { %511 = vst.msk [vmem:[#allocation2] sm:$0xc] %vm510_vm5, %v508_v9  ;;  %512 = vst.msk [vmem:[#allocation3 + $0xa] sm:$0xc] %vm510_vm5, %v508_v9 }
 0xed6   :  { %v744_v23 = vpop.permute.xlu1 %743 }
 0xed7   :  { %747 = vst.msk [vmem:[#allocation2] sm:$0xc0] %vm746_vm6, %v744_v23  ;;  %748 = vst.msk [vmem:[#allocation3 + $0x2] sm:$0xc0] %vm746_vm6, %v744_v23 }
 0xeda   :  { %v1086_v31 = vpop.permute.xlu1 %1085 }
 0xedb   :  { %v4527_v40 = vpop.eup %4526  ;;  %1088 = vst.msk [vmem:[#allocation2 + $0x8] sm:$0x30] %vm628_vm4, %v1086_v31  ;;  %1089 = vst.msk [vmem:[#allocation3 - $0x2] sm:$0x30] %vm628_vm4, %v1086_v31 }
 0xedc   :  { %v1193_v47 = vmul.f32 %v4527_v40, %v5060_v51  ;;  %v1237_v51 = vld [vmem:[%s5887_s4 + $0xd8] sm:$0xff] }
 0xedd   :  { %v4120_v29 = vpack.c.bf16 %v1237_v51, %v1235_v57 }
 0xede   :  { %v1206_v8 = vld [vmem:[#allocation2] sm:$0xff]  ;;  %v1199_v13 = vmul.f32 %v5012_v63, %v1193_v47  ;;  %v1209_v10 = vld [vmem:[#allocation3 + $0x8] sm:$0xff] }
 0xedf   :  { %3861 = vmatmul.mubr.msk.f32.vlgmr.msra.gmra.mrb[8].mxu1 %vm291_vm3, %v1206_v8 }
 0xee0   :  { %1201 = vrot.lane.b32.xlu0 %v1199_v13, %s4676_s0  ;;  %4115 = vmatpush1.bf16.msra.mxu1 %v4114_v48 }
 0xee1   :  { %4117 = vmatprep.subr.bf16.mxu1 %v4116_v49  ;;  %1331 = vmatprep.mubr.f32.mxu1 %v4674_v7 }
 0xee4   :  { %4119 = vmatpush1.bf16.msra.mxu1 %v4118_v17 }
 0xee5   :  { %4121 = vmatprep.subr.bf16.mxu1 %v4120_v29 }
 0xee8   :  { %4123 = vmatpush1.bf16.msra.mxu1 %v4122_v1 }
 0xee9   :  { %4125 = vmatprep.subr.bf16.mxu1 %v4124_v36 }
 0xeec   :  { %4127 = vmatpush1.bf16.msra.mxu1 %v4126_v52 }
 0xeed   :  { %4161 = vmatprep.subr.bf16.mxu1 %v5090_v2 }
 0xf49   :  { %v1507_v12 = vpop.f32.mrb[12].mxu0 }
 0xf4a   :  { %v1509_v22 = vpop.f32.mrb[13].mxu0 }
 0xf52   :  { %v1202_v54 = vpop.permute.xlu0 %1201 }
 0xf53   :  { %1204 = vst.msk [vmem:[#allocation2 + $0x8] sm:$0xc0] %vm746_vm6, %v1202_v54  ;;  %1205 = vst.msk [vmem:[#allocation3 - $0x6] sm:$0xc0] %vm746_vm6, %v1202_v54 }
 0xf5a   :  { %v1207_v6 = vld [vmem:[#allocation2 + $0x8] sm:$0xff]  ;;  %v1208_v9 = vld [vmem:[#allocation3] sm:$0xff] }
 0xf5b   :  { %3862 = vmatmul.mubr.msk.f32.gmra.mrb[10].mxu1 %vm291_vm3, %v1207_v6 }
 0xf5c   :  { %1408 = vmatprep.mubr.f32.mxu1 %v4674_v7 }
 0xf5f   :  { %3863 = vmatmul.mubr.msk.f32.vlgmr.msra.gmra.mrb[8].mxu1 %vm291_vm3, %v1208_v9 }
 0xf60   :  { %1414 = vmatprep.mubr.f32.mxu1 %v4674_v7  ;;  %4163 = vmatpush1.bf16.msra.mxu1 %v5098_v5 }
 0xf61   :  { %4165 = vmatprep.subr.bf16.mxu1 %v5120_v14 }
 0xf63   :  { %3864 = vmatmul.mubr.msk.f32.gmra.mrb[10].mxu1 %vm291_vm3, %v1209_v10 }
 0xf64   :  { %4167 = vmatpush1.bf16.msra.mxu1 %v5122_v15  ;;  %1717 = vmatprep.mubr.f32.mxu1 %v4674_v7 }
 0xf65   :  { %4169 = vmatprep.subr.bf16.mxu1 %v5131_v18 }
 0xf68   :  { %4171 = vmatpush1.bf16.msra.mxu1 %v5140_v24 }
 0xf69   :  { %4173 = vmatprep.subr.bf16.mxu1 %v5172_v41 }
 0xf6c   :  { %4175 = vmatpush1.bf16.msra.mxu1 %v5174_v45 }
 0xf6d   :  { %4193 = vmatprep.subr.bf16.mxu1 %v5090_v2 }
0x1032   :  { %v1410_v21 = vpop.f32.mrb[8].mxu1 }
0x1033   :  { %v5246_v23 = vadd.f32 %v1410_v21, %v1248_v61  ;;  %v1412_v25 = vpop.f32.mrb[9].mxu1 }
0x1034   :  { %v5248_v26 = vadd.f32 %v1412_v25, %v1252_v19 }
0x1035   :  { %v1512_v27 = vadd.f32 %v5246_v23, %v1507_v12 }
0x1036   :  { %v1513_v28 = vadd.f32 %v5248_v26, %v1509_v22  ;;  %v1416_v30 = vpop.f32.mrb[10].mxu1 }
0x1037   :  { %v1514_v31 = vmul.f32 0.5, %v1512_v27  ;;  %v5252_v32 = vadd.f32 %v1416_v30, %v1248_v61  ;;  %v1418_v37 = vpop.f32.mrb[11].mxu1 }
0x1038   :  { %v1515_v38 = vmul.f32 %v1513_v28, %v4826_v59  ;;  %v5255_v40 = vadd.f32 %v1418_v37, %v1252_v19 }
0x1039   :  { %4528 = vtanh.f32 %v1514_v31 }
0x103a   :  { %4530 = vtanh.f32 %v1515_v38 }
0x1043   :  { %v4529_v47 = vpop.eup %4528 }
0x1044   :  { %v4531_v48 = vpop.eup %4530  ;;  %v1518_v49 = vmul.f32 0.5, %v4529_v47 }
0x1045   :  { %v1519_v53 = vmul.f32 %v4531_v48, %v4826_v59 }
0x1046   :  { %v1520_v56 = vadd.f32 0.5, %v1518_v49 }
0x1047   :  { %v1521_v8 = vadd.f32 %v1519_v53, %v4834_v4 }
0x1048   :  { %v1522_v57 = vmul.f32 0.0, %v1520_v56 }
0x1049   :  { %v1523_v13 = vmul.f32 %v1521_v8, %v1520_v56 }
0x104b   :  { %1525 = vrot.lane.b32.xlu1 %v1523_v13, %s4676_s0 }
0x10bd   :  { %v1526_v51 = vpop.permute.xlu1 %1525 }
0x10be   :  { %v1528_v17 = vadd.f32 %v1526_v51, %v1522_v57 }
0x10c0   :  { %4532 = vtanh.f32 %v1528_v17  ;;  %v1531_v9 = vmul.f32 %v1528_v17, %v4843_v20 }
0x10c2   :  { %v1629_v61 = vrot.slane %v1531_v9, 6 }
0x10ca   :  { %v4533_v29 = vpop.eup %4532 }
0x10cb   :  { %v1530_v34 = vmul.f32 %v4533_v29, %v1521_v8 }
0x10cd   :  { %v1532_v35 = vmul.f32 %v1530_v34, %v4843_v20 }
0x10cf   :  { %1534 = vrot.lane.b32.xlu0 %v1532_v35, %s4676_s0 }
0x1141   :  { %v1535_v39 = vpop.permute.xlu0 %1534 }
0x1142   :  { %1537 = vst.msk [vmem:[#allocation2] sm:$0x3] %vm395_vm2, %v1535_v39  ;;  %1538 = vst.msk [vmem:[#allocation3 + $0xe] sm:$0x3] %vm395_vm2, %v1535_v39  ;;  %3865 = vmatmul.mubr.msk.f32.vlgmr.msra.gmra.mrb[14].mxu0 %vm291_vm3, %v1535_v39 }
0x1143   :  { %4179 = vmatpush1.bf16.msra.mxu0 %v5098_v5  ;;  %1829 = vmatprep.mubr.f32.mxu0 %v4674_v7 }
0x1144   :  { %4181 = vmatprep.subr.bf16.mxu0 %v5120_v14 }
0x1147   :  { %4183 = vmatpush1.bf16.msra.mxu0 %v5122_v15 }
0x1148   :  { %4185 = vmatprep.subr.bf16.mxu0 %v5131_v18 }
0x114b   :  { %4187 = vmatpush1.bf16.msra.mxu0 %v5140_v24 }
0x114c   :  { %4189 = vmatprep.subr.bf16.mxu0 %v5172_v41 }
0x114f   :  { %4191 = vmatpush1.bf16.msra.mxu0 %v5174_v45 }
0x1150   :  { %4209 = vmatprep.subr.bf16.mxu0 %v5090_v2 }
0x1215   :  { %v1607_v0 = vpop.f32.mrb[14].mxu0 }
0x1216   :  { %v1614_v1 = vrot.slane %v1607_v0, 6  ;;  %v1609_v36 = vpop.f32.mrb[15].mxu0 }
0x1217   :  { %v1615_v62 = vrot.slane %v1609_v36, 6 }
0x1218   :  { %v1618_v3 = vadd.f32 %v5246_v23, %v1614_v1 }
0x1219   :  { %v1619_v52 = vadd.f32 %v5248_v26, %v1615_v62 }
0x121a   :  { %v1620_v54 = vmul.f32 0.5, %v1618_v3 }
0x121b   :  { %v1621_v6 = vmul.f32 %v1619_v52, %v4826_v59 }
0x121c   :  { %4534 = vtanh.f32 %v1620_v54 }
0x121d   :  { %4536 = vtanh.f32 %v1621_v6 }
0x1226   :  { %v4535_v10 = vpop.eup %4534 }
0x1227   :  { %v4537_v12 = vpop.eup %4536  ;;  %v1624_v22 = vmul.f32 0.5, %v4535_v10 }
0x1228   :  { %v1625_v55 = vmul.f32 %v4537_v12, %v4826_v59 }
0x1229   :  { %v1626_v19 = vadd.f32 0.5, %v1624_v22 }
0x122a   :  { %v1627_v21 = vadd.f32 %v1625_v55, %v4834_v4 }
0x122b   :  { %v1631_v25 = vmul.f32 %v1629_v61, %v1626_v19 }
0x122c   :  { %v1632_v27 = vmul.f32 %v1627_v21, %v1626_v19 }
0x122e   :  { %1634 = vrot.lane.b32.xlu1 %v1632_v27, %s4676_s0 }
0x12a0   :  { %v1635_v28 = vpop.permute.xlu1 %1634 }
0x12a1   :  { %v1637_v30 = vadd.f32 %v1635_v28, %v1631_v25 }
0x12a3   :  { %4538 = vtanh.f32 %v1637_v30  ;;  %v1640_v29 = vmul.f32 %v1637_v30, %v4870_v60 }
0x12a5   :  { %v1741_v1 = vrot.slane %v1640_v29, 6 }
0x12ad   :  { %v4539_v31 = vpop.eup %4538 }
0x12ae   :  { %v1639_v37 = vmul.f32 %v4539_v31, %v1627_v21 }
0x12b0   :  { %v5282_v38 = vmul.f32 %v1639_v37, %v4870_v60 }
0x12b2   :  { %v1648_v47 = vrot.slane %v5282_v38, 2 }
0x12b4   :  { %1649 = vrot.lane.b32.xlu0 %v1648_v47, %s4676_s0 }
0x1326   :  { %v1650_v48 = vpop.permute.xlu0 %1649 }
0x1327   :  { %3866 = vmatmul.mubr.msk.f32.vlgmr.msra.gmra.mrb[12].mxu1 %vm291_vm3, %v1650_v48 }
0x1328   :  { %4195 = vmatpush1.bf16.msra.mxu1 %v5098_v5  ;;  %1941 = vmatprep.mubr.f32.mxu1 %v4674_v7 }
0x1329   :  { %4197 = vmatprep.subr.bf16.mxu1 %v5120_v14 }
0x132c   :  { %4199 = vmatpush1.bf16.msra.mxu1 %v5122_v15 }
0x132d   :  { %4201 = vmatprep.subr.bf16.mxu1 %v5131_v18 }
0x1330   :  { %4203 = vmatpush1.bf16.msra.mxu1 %v5140_v24 }
0x1331   :  { %4205 = vmatprep.subr.bf16.mxu1 %v5172_v41 }
0x1334   :  { %4207 = vmatpush1.bf16.msra.mxu1 %v5174_v45 }
0x1335   :  { %4225 = vmatprep.subr.bf16.mxu1 %v5090_v2 }
0x13fa   :  { %v1719_v49 = vpop.f32.mrb[12].mxu1 }
0x13fb   :  { %v1726_v53 = vrot.slane %v1719_v49, 4  ;;  %v1721_v56 = vpop.f32.mrb[13].mxu1 }
0x13fc   :  { %v1727_v8 = vrot.slane %v1721_v56, 4 }
0x13fd   :  { %v1730_v13 = vadd.f32 %v5246_v23, %v1726_v53 }
0x13fe   :  { %v1731_v57 = vadd.f32 %v5248_v26, %v1727_v8 }
0x13ff   :  { %v1732_v51 = vmul.f32 0.5, %v1730_v13 }
0x1400   :  { %v1733_v17 = vmul.f32 %v1731_v57, %v4826_v59 }
0x1401   :  { %4540 = vtanh.f32 %v1732_v51 }
0x1402   :  { %4542 = vtanh.f32 %v1733_v17 }
0x140b   :  { %v4541_v34 = vpop.eup %4540 }
0x140c   :  { %v4543_v35 = vpop.eup %4542  ;;  %v1736_v39 = vmul.f32 0.5, %v4541_v34 }
0x140d   :  { %v1737_v0 = vmul.f32 %v4543_v35, %v4826_v59 }
0x140e   :  { %v1738_v36 = vadd.f32 0.5, %v1736_v39 }
0x140f   :  { %v1739_v62 = vadd.f32 %v1737_v0, %v4834_v4 }
0x1410   :  { %v1743_v3 = vmul.f32 %v1741_v1, %v1738_v36 }
0x1411   :  { %v1744_v52 = vmul.f32 %v1739_v62, %v1738_v36 }
0x1413   :  { %1746 = vrot.lane.b32.xlu1 %v1744_v52, %s4676_s0 }
0x1485   :  { %v1747_v54 = vpop.permute.xlu1 %1746 }
0x1486   :  { %v1749_v6 = vadd.f32 %v1747_v54, %v1743_v3 }
0x1488   :  { %4544 = vtanh.f32 %v1749_v6  ;;  %v1752_v37 = vmul.f32 %v1749_v6, %v4898_v33 }
0x148a   :  { %v1853_v53 = vrot.slane %v1752_v37, 6 }
0x1492   :  { %v4545_v9 = vpop.eup %4544 }
0x1493   :  { %v1751_v10 = vmul.f32 %v4545_v9, %v1739_v62 }
0x1495   :  { %v5304_v12 = vmul.f32 %v1751_v10, %v4898_v33 }
0x1497   :  { %v1760_v22 = vrot.slane %v5304_v12, 4 }
0x1499   :  { %1761 = vrot.lane.b32.xlu0 %v1760_v22, %s4676_s0 }
0x150b   :  { %v1762_v55 = vpop.permute.xlu0 %1761 }
0x150c   :  { %3867 = vmatmul.mubr.msk.f32.vlgmr.msra.gmra.mrb[16].mxu0 %vm291_vm3, %v1762_v55 }
0x150d   :  { %4211 = vmatpush1.bf16.msra.mxu0 %v5098_v5  ;;  %2044 = vmatprep.mubr.f32.mxu0 %v4674_v7 }
0x150e   :  { %4213 = vmatprep.subr.bf16.mxu0 %v5120_v14 }
0x1511   :  { %4215 = vmatpush1.bf16.msra.mxu0 %v5122_v15 }
0x1512   :  { %4217 = vmatprep.subr.bf16.mxu0 %v5131_v18 }
0x1515   :  { %4219 = vmatpush1.bf16.msra.mxu0 %v5140_v24 }
0x1516   :  { %4221 = vmatprep.subr.bf16.mxu0 %v5172_v41 }
0x1519   :  { %4223 = vmatpush1.bf16.msra.mxu0 %v5174_v45 }
0x151a   :  { %4241 = vmatprep.subr.bf16.mxu0 %v5090_v2 }
0x15df   :  { %v1831_v61 = vpop.f32.mrb[16].mxu0 }
0x15e0   :  { %v1838_v19 = vrot.slane %v1831_v61, 2  ;;  %v1833_v21 = vpop.f32.mrb[17].mxu0 }
0x15e1   :  { %v1839_v25 = vrot.slane %v1833_v21, 2 }
0x15e2   :  { %v1842_v27 = vadd.f32 %v5246_v23, %v1838_v19 }
0x15e3   :  { %v1843_v28 = vadd.f32 %v5248_v26, %v1839_v25 }
0x15e4   :  { %v1844_v30 = vmul.f32 0.5, %v1842_v27 }
0x15e5   :  { %v1845_v31 = vmul.f32 %v1843_v28, %v4826_v59 }
0x15e6   :  { %4546 = vtanh.f32 %v1844_v30 }
0x15e7   :  { %4548 = vtanh.f32 %v1845_v31 }
0x15f0   :  { %v4547_v47 = vpop.eup %4546 }
0x15f1   :  { %v4549_v48 = vpop.eup %4548  ;;  %v1848_v49 = vmul.f32 0.5, %v4547_v47 }
0x15f2   :  { %v1849_v2 = vmul.f32 %v4549_v48, %v4826_v59 }
0x15f3   :  { %v1850_v56 = vadd.f32 0.5, %v1848_v49 }
0x15f4   :  { %v1851_v8 = vadd.f32 %v1849_v2, %v4834_v4 }
0x15f5   :  { %v1855_v13 = vmul.f32 %v1853_v53, %v1850_v56 }
0x15f6   :  { %v1856_v23 = vmul.f32 %v1851_v8, %v1850_v56 }
0x15f8   :  { %1858 = vrot.lane.b32.xlu1 %v1856_v23, %s4676_s0 }
0x166a   :  { %v1859_v26 = vpop.permute.xlu1 %1858 }
0x166b   :  { %v1861_v57 = vadd.f32 %v1859_v26, %v1855_v13 }
0x166d   :  { %4550 = vtanh.f32 %v1861_v57  ;;  %v1864_v52 = vmul.f32 %v1861_v57, %v4926_v11 }
0x166f   :  { %v1959_v22 = vrot.slane %v1864_v52, 6 }
0x1677   :  { %v4551_v51 = vpop.eup %4550 }
0x1678   :  { %v1863_v17 = vmul.f32 %v4551_v51, %v1851_v8 }
0x167a   :  { %v5326_v29 = vmul.f32 %v1863_v17, %v4926_v11 }
0x167c   :  { %v1872_v34 = vrot.slane %v5326_v29, 6 }
0x167e   :  { %1873 = vrot.lane.b32.xlu0 %v1872_v34, %s4676_s0 }
0x16f0   :  { %v1874_v35 = vpop.permute.xlu0 %1873 }
0x16f1   :  { %3868 = vmatmul.mubr.msk.f32.vlgmr.msra.gmra.mrb[14].mxu1 %vm291_vm3, %v1874_v35 }
0x16f2   :  { %4227 = vmatpush1.bf16.msra.mxu1 %v5098_v5  ;;  %2156 = vmatprep.mubr.f32.mxu1 %v4674_v7 }
0x16f3   :  { %4229 = vmatprep.subr.bf16.mxu1 %v5120_v14 }
0x16f6   :  { %4231 = vmatpush1.bf16.msra.mxu1 %v5122_v15 }
0x16f7   :  { %4233 = vmatprep.subr.bf16.mxu1 %v5131_v18 }
0x16fa   :  { %4235 = vmatpush1.bf16.msra.mxu1 %v5140_v24 }
0x16fb   :  { %4237 = vmatprep.subr.bf16.mxu1 %v5172_v41 }
0x16fe   :  { %4239 = vmatpush1.bf16.msra.mxu1 %v5174_v45 }
0x17c4   :  { %v1943_v39 = vpop.f32.mrb[14].mxu1 }
0x17c5   :  { %v1948_v0 = vadd.f32 %v5252_v32, %v1943_v39  ;;  %v1945_v1 = vpop.f32.mrb[15].mxu1 }
0x17c6   :  { %v1949_v36 = vadd.f32 %v5255_v40, %v1945_v1 }
0x17c7   :  { %v1950_v62 = vmul.f32 0.5, %v1948_v0 }
0x17c8   :  { %v1951_v3 = vmul.f32 %v1949_v36, %v4826_v59 }
0x17c9   :  { %4552 = vtanh.f32 %v1950_v62 }
0x17ca   :  { %4554 = vtanh.f32 %v1951_v3 }
0x17d3   :  { %v4553_v54 = vpop.eup %4552 }
0x17d4   :  { %v4555_v6 = vpop.eup %4554  ;;  %v1954_v9 = vmul.f32 0.5, %v4553_v54 }
0x17d5   :  { %v1955_v10 = vmul.f32 %v4555_v6, %v4826_v59 }
0x17d6   :  { %v1956_v55 = vadd.f32 0.5, %v1954_v9 }
0x17d7   :  { %v1957_v61 = vadd.f32 %v1955_v10, %v4834_v4 }
0x17d8   :  { %v1961_v19 = vmul.f32 %v1959_v22, %v1956_v55 }
0x17d9   :  { %v1962_v21 = vmul.f32 %v1957_v61, %v1956_v55 }
0x17db   :  { %1964 = vrot.lane.b32.xlu1 %v1962_v21, %s4676_s0 }
0x184d   :  { %v1965_v25 = vpop.permute.xlu1 %1964 }
0x184e   :  { %v1967_v27 = vadd.f32 %v1965_v25, %v1961_v19 }
0x1850   :  { %4556 = vtanh.f32 %v1967_v27 }
0x185a   :  { %v4557_v28 = vpop.eup %4556 }
0x185b   :  { %v1969_v30 = vmul.f32 %v4557_v28, %v1957_v61 }
0x185d   :  { %v1971_v31 = vmul.f32 %v1969_v30, %v4953_v50 }
0x185f   :  { %1973 = vrot.lane.b32.xlu0 %v1971_v31, %s4676_s0 }
0x18d1   :  { %v1974_v37 = vpop.permute.xlu0 %1973 }
0x18d2   :  { %1976 = vst.msk [vmem:[#allocation2 + $0x8] sm:$0x3] %vm395_vm2, %v1974_v37  ;;  %1977 = vst.msk [vmem:[#allocation3 + $0x6] sm:$0x3] %vm395_vm2, %v1974_v37  ;;  %3869 = vmatmul.mubr.msk.f32.vlgmr.msra.gmra.mrb[18].mxu0 %vm291_vm3, %v1974_v37 }
0x18d3   :  { %4243 = vmatpush1.bf16.msra.mxu0 %v5098_v5  ;;  %2268 = vmatprep.mubr.f32.mxu0 %v4674_v7 }
0x18d4   :  { %4245 = vmatprep.subr.bf16.mxu0 %v5120_v14 }
0x18d7   :  { %4247 = vmatpush1.bf16.msra.mxu0 %v5122_v15  ;;  %v1970_v15 = vmul.f32 %v1967_v27, %v4953_v50 }
0x18d8   :  { %4249 = vmatprep.subr.bf16.mxu0 %v5131_v18 }
0x18d9   :  { %v2068_v8 = vrot.slane %v1970_v15, 6  ;;  %v2317_v15 = vld [vmem:[%s5888_s5 + $0x18] sm:$0xff] }
0x18db   :  { %4251 = vmatpush1.bf16.msra.mxu0 %v5140_v24 }
0x18dc   :  { %4253 = vmatprep.subr.bf16.mxu0 %v5172_v41 }
0x18df   :  { %4255 = vmatpush1.bf16.msra.mxu0 %v5174_v45 }
0x19a5   :  { %v2046_v47 = vpop.f32.mrb[18].mxu0 }
0x19a6   :  { %v2053_v48 = vrot.slane %v2046_v47, 6  ;;  %v2048_v49 = vpop.f32.mrb[19].mxu0 }
0x19a7   :  { %v2054_v2 = vrot.slane %v2048_v49, 6 }
0x19a8   :  { %v2057_v5 = vadd.f32 %v5252_v32, %v2053_v48 }
0x19a9   :  { %v2058_v53 = vadd.f32 %v5255_v40, %v2054_v2 }
0x19aa   :  { %v2059_v56 = vmul.f32 0.5, %v2057_v5 }
0x19ab   :  { %v2060_v14 = vmul.f32 %v2058_v53, %v4826_v59 }
0x19ac   :  { %4558 = vtanh.f32 %v2059_v56 }
0x19ad   :  { %4560 = vtanh.f32 %v2060_v14 }
0x19b6   :  { %v4559_v18 = vpop.eup %4558 }
0x19b7   :  { %v4561_v24 = vpop.eup %4560  ;;  %v2063_v41 = vmul.f32 0.5, %v4559_v18  ;;  %v2314_v18 = vld [vmem:[%s5888_s5] sm:$0xff] }
0x19b8   :  { %v2064_v45 = vmul.f32 %v4561_v24, %v4826_v59 }
0x19b9   :  { %v2065_v13 = vadd.f32 0.5, %v2063_v41  ;;  %v2316_v41 = vld [vmem:[%s5888_s5 + $0x10] sm:$0xff] }
0x19ba   :  { %v2066_v23 = vadd.f32 %v2064_v45, %v4834_v4  ;;  %v4258_v45 = vpack.c.bf16 %v2316_v41, %v2314_v18 }
0x19bb   :  { %v2070_v26 = vmul.f32 %v2068_v8, %v2065_v13 }
0x19bc   :  { %v2071_v57 = vmul.f32 %v2066_v23, %v2065_v13 }
0x19be   :  { %2073 = vrot.lane.b32.xlu1 %v2071_v57, %s4676_s0 }
0x1a30   :  { %v2074_v51 = vpop.permute.xlu1 %2073 }
0x1a31   :  { %v2076_v17 = vadd.f32 %v2074_v51, %v2070_v26 }
0x1a33   :  { %4562 = vtanh.f32 %v2076_v17  ;;  %v2079_v22 = vmul.f32 %v2076_v17, %v4979_v16 }
0x1a35   :  { %v2180_v25 = vrot.slane %v2079_v22, 6 }
0x1a3d   :  { %v4563_v34 = vpop.eup %4562 }
0x1a3e   :  { %v2078_v35 = vmul.f32 %v4563_v34, %v2066_v23 }
0x1a40   :  { %v5367_v39 = vmul.f32 %v2078_v35, %v4979_v16  ;;  %v2319_v35 = vld [vmem:[%s5888_s5 + $0x28] sm:$0xff] }
0x1a42   :  { %v2087_v0 = vrot.slane %v5367_v39, 2 }
0x1a44   :  { %2088 = vrot.lane.b32.xlu0 %v2087_v0, %s4676_s0  ;;  %v2321_v0 = vld [vmem:[%s5888_s5 + $0x38] sm:$0xff] }
0x1ab6   :  { %v2089_v1 = vpop.permute.xlu0 %2088 }
0x1ab7   :  { %3870 = vmatmul.mubr.msk.f32.vlgmr.msra.gmra.mrb[16].mxu1 %vm291_vm3, %v2089_v1  ;;  %v4260_v1 = vpack.c.bf16 %v2321_v0, %v2319_v35  ;;  %v2332_v35 = vld [vmem:[%s5888_s5 + $0x90] sm:$0xff] }
0x1ab8   :  { %2429 = vmatprep.mubr.f32.mxu1 %v4674_v7 }
0x1b8a   :  { %v2158_v36 = vpop.f32.mrb[16].mxu1 }
0x1b8b   :  { %v2165_v62 = vrot.slane %v2158_v36, 4  ;;  %v2160_v3 = vpop.f32.mrb[17].mxu1 }
0x1b8c   :  { %v2166_v52 = vrot.slane %v2160_v3, 4  ;;  %v2325_v3 = vld [vmem:[%s5888_s5 + $0x58] sm:$0xff] }
0x1b8d   :  { %v2169_v54 = vadd.f32 %v5252_v32, %v2165_v62  ;;  %v2323_v62 = vld [vmem:[%s5888_s5 + $0x48] sm:$0xff] }
0x1b8e   :  { %v2170_v6 = vadd.f32 %v5255_v40, %v2166_v52  ;;  %v4264_v52 = vpack.c.bf16 %v2325_v3, %v2323_v62  ;;  %v2337_v62 = vld [vmem:[%s5888_s5 + $0xb8] sm:$0xff] }
0x1b8f   :  { %v2171_v9 = vmul.f32 0.5, %v2169_v54  ;;  %v2322_v54 = vld [vmem:[%s5888_s5 + $0x40] sm:$0xff] }
0x1b90   :  { %v2172_v10 = vmul.f32 %v2170_v6, %v4826_v59  ;;  %v2324_v6 = vld [vmem:[%s5888_s5 + $0x50] sm:$0xff] }
0x1b91   :  { %4564 = vtanh.f32 %v2171_v9  ;;  %v4266_v9 = vpack.c.bf16 %v2324_v6, %v2322_v54  ;;  %v2334_v54 = vld [vmem:[%s5888_s5 + $0xa0] sm:$0xff]  ;;  %v2336_v6 = vld [vmem:[%s5888_s5 + $0xb0] sm:$0xff] }
0x1b92   :  { %4566 = vtanh.f32 %v2172_v10 }
0x1b9b   :  { %v4565_v55 = vpop.eup %4564 }
0x1b9c   :  { %v4567_v61 = vpop.eup %4566  ;;  %v2175_v19 = vmul.f32 0.5, %v4565_v55  ;;  %v2327_v55 = vld [vmem:[%s5888_s5 + $0x68] sm:$0xff] }
0x1b9d   :  { %v2176_v21 = vmul.f32 %v4567_v61, %v4826_v59  ;;  %v2329_v61 = vld [vmem:[%s5888_s5 + $0x78] sm:$0xff] }
0x1b9e   :  { %v2177_v27 = vadd.f32 0.5, %v2175_v19 }
0x1b9f   :  { %v2178_v28 = vadd.f32 %v2176_v21, %v4834_v4 }
0x1ba0   :  { %v2182_v30 = vmul.f32 %v2180_v25, %v2177_v27  ;;  %v4268_v25 = vpack.c.bf16 %v2329_v61, %v2327_v55  ;;  %v2542_v55 = vld [vmem:[%s5888_s5 + $0x168] sm:$0xff] }
0x1ba1   :  { %v2183_v31 = vmul.f32 %v2178_v28, %v2177_v27  ;;  %v2326_v27 = vld [vmem:[%s5888_s5 + $0x60] sm:$0xff] }
0x1ba3   :  { %2185 = vrot.lane.b32.xlu1 %v2183_v31, %s4676_s0 }
0x1c15   :  { %v2186_v37 = vpop.permute.xlu1 %2185 }
0x1c16   :  { %v2188_v47 = vadd.f32 %v2186_v37, %v2182_v30 }
0x1c18   :  { %4568 = vtanh.f32 %v2188_v47  ;;  %v2191_v10 = vmul.f32 %v2188_v47, %v4996_v58 }
0x1c1a   :  { %v2292_v37 = vrot.slane %v2191_v10, 6  ;;  %v2339_v10 = vld [vmem:[%s5888_s5 + $0xc8] sm:$0xff] }
0x1c22   :  { %v4569_v48 = vpop.eup %4568 }
0x1c23   :  { %v2190_v49 = vmul.f32 %v4569_v48, %v2178_v28  ;;  %v2328_v28 = vld [vmem:[%s5888_s5 + $0x70] sm:$0xff] }
0x1c24   :  { %v4270_v31 = vpack.c.bf16 %v2328_v28, %v2326_v27  ;;  %v2543_v28 = vld [vmem:[%s5888_s5 + $0x170] sm:$0xff] }
0x1c25   :  { %v2192_v2 = vmul.f32 %v2190_v49, %v4996_v58 }
0x1c27   :  { %v2199_v5 = vrot.slane %v2192_v2, 4 }
0x1c29   :  { %2200 = vrot.lane.b32.xlu0 %v2199_v5, %s4676_s0  ;;  %v2331_v5 = vld [vmem:[%s5888_s5 + $0x88] sm:$0xff] }
0x1c2d   :  { %1643 = vrot.lane.b32.xlu0 %v5282_v38, %s4676_s0 }
0x1c31   :  { %1867 = vrot.lane.b32.xlu0 %v5326_v29, %s4676_s0  ;;  %v2315_v29 = vld [vmem:[%s5888_s5 + $0x8] sm:$0xff] }
0x1c32   :  { %v4256_v24 = vpack.c.bf16 %v2317_v15, %v2315_v29  ;;  %v2531_v15 = vld [vmem:[%s5888_s5 + $0x110] sm:$0xff] }
0x1c34   :  { %4257 = vmatprep.subr.bf16.mxu1 %v4256_v24 }
0x1c35   :  { %2194 = vrot.lane.b32.xlu0 %v2192_v2, %s4676_s0  ;;  %4259 = vmatpush1.bf16.msra.mxu1 %v4258_v45  ;;  %v2534_v45 = vld [vmem:[%s5888_s5 + $0x128] sm:$0xff] }
0x1c36   :  { %4261 = vmatprep.subr.bf16.mxu1 %v4260_v1  ;;  %v2537_v1 = vld [vmem:[%s5888_s5 + $0x140] sm:$0xff] }
0x1c9b   :  { %v2201_v53 = vpop.permute.xlu0 %2200 }
0x1c9c   :  { %3871 = vmatmul.mubr.msk.f32.vlgmr.msra.gmra.mrb[20].mxu0 %vm291_vm3, %v2201_v53  ;;  %v2333_v53 = vld [vmem:[%s5888_s5 + $0x98] sm:$0xff] }
0x1c9d   :  { %2609 = vmatprep.mubr.f32.mxu0 %v4674_v7 }
0x1c9f   :  { %v1644_v56 = vpop.permute.xlu0 %1643 }
0x1ca0   :  { %1646 = vst.msk [vmem:[#allocation2] sm:$0xc] %vm510_vm5, %v1644_v56  ;;  %1647 = vst.msk [vmem:[#allocation3 + $0xa] sm:$0xc] %vm510_vm5, %v1644_v56  ;;  %v4272_v56 = vpack.c.bf16 %v2333_v53, %v2331_v5  ;;  %v2343_v5 = vld [vmem:[%s5888_s5 + $0xe8] sm:$0xff]  ;;  %v2345_v53 = vld [vmem:[%s5888_s5 + $0xf8] sm:$0xff] }
0x1ca3   :  { %v1868_v14 = vpop.permute.xlu0 %1867 }
0x1ca4   :  { %1870 = vst.msk [vmem:[#allocation2] sm:$0xc0] %vm746_vm6, %v1868_v14  ;;  %1871 = vst.msk [vmem:[#allocation3 + $0x2] sm:$0xc0] %vm746_vm6, %v1868_v14  ;;  %v2530_v14 = vld [vmem:[%s5888_s5 + $0x108] sm:$0xff] }
0x1ca7   :  { %v2195_v38 = vpop.permute.xlu0 %2194 }
0x1ca8   :  { %2197 = vst.msk [vmem:[#allocation2 + $0x8] sm:$0x30] %vm628_vm4, %v2195_v38  ;;  %2198 = vst.msk [vmem:[#allocation3 - $0x2] sm:$0x30] %vm628_vm4, %v2195_v38  ;;  %v2532_v38 = vld [vmem:[%s5888_s5 + $0x118] sm:$0xff] }
0x1ca9   :  { %v5464_v29 = vpack.c.bf16 %v2532_v38, %v2530_v14  ;;  %v4284_v14 = vpack.c.bf16 %v2345_v53, %v2343_v5  ;;  %v2342_v38 = vld [vmem:[%s5888_s5 + $0xe0] sm:$0xff] }
0x1cab   :  { %4289 = vmatprep.subr.bf16.mxu0 %v5464_v29 }
0x1d6f   :  { %v2270_v8 = vpop.f32.mrb[20].mxu0 }
0x1d70   :  { %v2277_v13 = vrot.slane %v2270_v8, 2  ;;  %v2272_v23 = vpop.f32.mrb[21].mxu0 }
0x1d71   :  { %v2278_v26 = vrot.slane %v2272_v23, 2  ;;  %v2535_v23 = vld [vmem:[%s5888_s5 + $0x130] sm:$0xff] }
0x1d72   :  { %v2281_v57 = vadd.f32 %v5252_v32, %v2277_v13  ;;  %v2318_v32 = vld [vmem:[%s5888_s5 + $0x20] sm:$0xff]  ;;  %v2536_v13 = vld [vmem:[%s5888_s5 + $0x138] sm:$0xff] }
0x1d73   :  { %v2282_v51 = vadd.f32 %v5255_v40, %v2278_v26  ;;  %v2320_v40 = vld [vmem:[%s5888_s5 + $0x30] sm:$0xff]  ;;  %v5492_v26 = vpack.c.bf16 %v2536_v13, %v2534_v45 }
0x1d74   :  { %v2283_v17 = vmul.f32 0.5, %v2281_v57  ;;  %v4262_v36 = vpack.c.bf16 %v2320_v40, %v2318_v32  ;;  %v2539_v32 = vld [vmem:[%s5888_s5 + $0x150] sm:$0xff] }
0x1d75   :  { %v2284_v34 = vmul.f32 %v2282_v51, %v4826_v59  ;;  %v2330_v51 = vld [vmem:[%s5888_s5 + $0x80] sm:$0xff]  ;;  %v5524_v3 = vpack.c.bf16 %v2539_v32, %v2537_v1 }
0x1d76   :  { %4570 = vtanh.f32 %v2283_v17  ;;  %4263 = vmatpush1.bf16.msra.mxu1 %v4262_v36  ;;  %v2538_v17 = vld [vmem:[%s5888_s5 + $0x148] sm:$0xff] }
0x1d77   :  { %4572 = vtanh.f32 %v2284_v34  ;;  %4265 = vmatprep.subr.bf16.mxu1 %v4264_v52  ;;  %v2540_v34 = vld [vmem:[%s5888_s5 + $0x158] sm:$0xff]  ;;  %v2335_v36 = vld [vmem:[%s5888_s5 + $0xa8] sm:$0xff]  ;;  %v4274_v52 = vpack.c.bf16 %v2332_v35, %v2330_v51 }
0x1d78   :  { %v5509_v0 = vpack.c.bf16 %v2540_v34, %v2538_v17 }
0x1d7a   :  { %4267 = vmatpush1.bf16.msra.mxu1 %v4266_v9  ;;  %v4276_v9 = vpack.c.bf16 %v2337_v62, %v2335_v36 }
0x1d7b   :  { %4269 = vmatprep.subr.bf16.mxu1 %v4268_v25 }
0x1d7e   :  { %4271 = vmatpush1.bf16.msra.mxu1 %v4270_v31  ;;  %v4278_v31 = vpack.c.bf16 %v2336_v6, %v2334_v54 }
0x1d7f   :  { %4273 = vmatprep.subr.bf16.mxu1 %v4272_v56 }
0x1d80   :  { %v4571_v22 = vpop.eup %4570 }
0x1d81   :  { %v4573_v19 = vpop.eup %4572  ;;  %v2287_v21 = vmul.f32 0.5, %v4571_v22  ;;  %v2341_v22 = vld [vmem:[%s5888_s5 + $0xd8] sm:$0xff] }
0x1d82   :  { %v2288_v30 = vmul.f32 %v4573_v19, %v4826_v59  ;;  %v2544_v19 = vld [vmem:[%s5888_s5 + $0x178] sm:$0xff] }
0x1d83   :  { %v2289_v47 = vadd.f32 0.5, %v2287_v21  ;;  %v2541_v21 = vld [vmem:[%s5888_s5 + $0x160] sm:$0xff]  ;;  %v5552_v27 = vpack.c.bf16 %v2544_v19, %v2542_v55 }
0x1d84   :  { %v2290_v48 = vadd.f32 %v2288_v30, %v4834_v4 }
0x1d85   :  { %v2294_v49 = vmul.f32 %v2292_v37, %v2289_v47  ;;  %v5558_v37 = vpack.c.bf16 %v2543_v28, %v2541_v21 }
0x1d86   :  { %v2295_v2 = vmul.f32 %v2290_v48, %v2289_v47  ;;  %v4280_v47 = vpack.c.bf16 %v2341_v22, %v2339_v10 }
0x1d88   :  { %2297 = vrot.lane.b32.xlu1 %v2295_v2, %s4676_s0  ;;  %v2340_v2 = vld [vmem:[%s5888_s5 + $0xd0] sm:$0xff] }
0x1d8c   :  { %1755 = vrot.lane.b32.xlu1 %v5304_v12, %s4676_s0  ;;  %v2529_v12 = vld [vmem:[%s5888_s5 + $0x100] sm:$0xff] }
0x1d8d   :  { %v5472_v18 = vpack.c.bf16 %v2531_v15, %v2529_v12  ;;  %v2344_v12 = vld [vmem:[%s5888_s5 + $0xf0] sm:$0xff] }
0x1d8e   :  { %v4286_v15 = vpack.c.bf16 %v2344_v12, %v2342_v38 }
0x1d8f   :  { %4291 = vmatpush1.bf16.msra.mxu0 %v5472_v18 }
0x1d90   :  { %2082 = vrot.lane.b32.xlu1 %v5367_v39, %s4676_s0  ;;  %v2533_v39 = vld [vmem:[%s5888_s5 + $0x120] sm:$0xff]  ;;  %4293 = vmatprep.subr.bf16.mxu0 %v5492_v26 }
0x1d91   :  { %v5494_v57 = vpack.c.bf16 %v2535_v23, %v2533_v39  ;;  %v3872_v23 = vld [vmem:[%s5888_s5 + $0x180] ss:$8 sm:$0x3] }
0x1d92   :  { %v2352_v51 = vrot.slane %v3872_v23, %v4811_v44  ;;  %v2356_v17 = vrot.slane %v3872_v23, %v4814_v46 }
0x1d93   :  { %4295 = vmatpush1.bf16.msra.mxu0 %v5494_v57 }
0x1d94   :  { %4297 = vmatprep.subr.bf16.mxu0 %v5509_v0 }
0x1d97   :  { %4299 = vmatpush1.bf16.msra.mxu0 %v5524_v3 }
0x1d98   :  { %4301 = vmatprep.subr.bf16.mxu0 %v5552_v27 }
0x1d9b   :  { %4303 = vmatpush1.bf16.msra.mxu0 %v5558_v37 }
0x1d9c   :  { %4305 = vmatprep.subr.bf16.mxu0 %v5464_v29 }
0x1d9e   :  { %2610 = vmatmul.mubr.f32.vlgmr.msra.gmra.mrb[22].mxu0 %v4674_v7 }
0x1d9f   :  { %4307 = vmatpush1.bf16.msra.mxu0 %v5472_v18  ;;  %2707 = vmatprep.mubr.f32.mxu0 %v4674_v7 }
0x1da0   :  { %4309 = vmatprep.subr.bf16.mxu0 %v5492_v26 }
0x1da3   :  { %4311 = vmatpush1.bf16.msra.mxu0 %v5494_v57 }
0x1da4   :  { %4313 = vmatprep.subr.bf16.mxu0 %v5509_v0 }
0x1da7   :  { %4315 = vmatpush1.bf16.msra.mxu0 %v5524_v3 }
0x1da8   :  { %4317 = vmatprep.subr.bf16.mxu0 %v5552_v27 }
0x1dab   :  { %4319 = vmatpush1.bf16.msra.mxu0 %v5558_v37 }
0x1dac   :  { %4337 = vmatprep.subr.bf16.mxu0 %v5464_v29 }
0x1dfa   :  { %v2298_v24 = vpop.permute.xlu1 %2297 }
0x1dfb   :  { %v2300_v41 = vadd.f32 %v2298_v24, %v2294_v49  ;;  %v2338_v49 = vld [vmem:[%s5888_s5 + $0xc0] sm:$0xff] }
0x1dfc   :  { %v4282_v56 = vpack.c.bf16 %v2340_v2, %v2338_v49 }
0x1dfd   :  { %4574 = vtanh.f32 %v2300_v41 }
0x1dfe   :  { %v1756_v8 = vpop.permute.xlu1 %1755 }
0x1dff   :  { %1758 = vst.msk [vmem:[#allocation2] sm:$0x30] %vm628_vm4, %v1756_v8  ;;  %1759 = vst.msk [vmem:[#allocation3 + $0x6] sm:$0x30] %vm628_vm4, %v1756_v8 }
0x1e02   :  { %v2083_v40 = vpop.permute.xlu1 %2082 }
0x1e03   :  { %2085 = vst.msk [vmem:[#allocation2 + $0x8] sm:$0xc] %vm510_vm5, %v2083_v40  ;;  %2086 = vst.msk [vmem:[#allocation3 + $0x2] sm:$0xc] %vm510_vm5, %v2083_v40 }
0x1e06   :  { %v2310_v61 = vld [vmem:[#allocation2] sm:$0xff]  ;;  %v2313_v8 = vld [vmem:[#allocation3 + $0x8] sm:$0xff] }
0x1e07   :  { %v4575_v25 = vpop.eup %4574  ;;  %3873 = vmatmul.mubr.msk.f32.vlgmr.msra.gmra.mrb[18].mxu1 %vm291_vm3, %v2310_v61 }
0x1e08   :  { %v2302_v30 = vmul.f32 %v4575_v25, %v2290_v48  ;;  %4275 = vmatpush1.bf16.msra.mxu1 %v4274_v52  ;;  %2435 = vmatprep.mubr.f32.mxu1 %v4674_v7 }
0x1e09   :  { %4277 = vmatprep.subr.bf16.mxu1 %v4276_v9 }
0x1e0a   :  { %v2303_v48 = vmul.f32 %v2302_v30, %v5012_v63 }
0x1e0c   :  { %2305 = vrot.lane.b32.xlu1 %v2303_v48, %s4676_s0  ;;  %4279 = vmatpush1.bf16.msra.mxu1 %v4278_v31 }
0x1e0d   :  { %4281 = vmatprep.subr.bf16.mxu1 %v4280_v47 }
0x1e10   :  { %4283 = vmatpush1.bf16.msra.mxu1 %v4282_v56 }
0x1e11   :  { %4285 = vmatprep.subr.bf16.mxu1 %v4284_v14 }
0x1e14   :  { %4287 = vmatpush1.bf16.msra.mxu1 %v4286_v15 }
0x1e15   :  { %4321 = vmatprep.subr.bf16.mxu1 %v5464_v29 }
0x1e71   :  { %v2611_v13 = vpop.f32.mrb[22].mxu0 }
0x1e72   :  { %v2613_v39 = vpop.f32.mrb[23].mxu0 }
0x1e7e   :  { %v2306_v24 = vpop.permute.xlu1 %2305 }
0x1e7f   :  { %2308 = vst.msk [vmem:[#allocation2 + $0x8] sm:$0xc0] %vm746_vm6, %v2306_v24  ;;  %2309 = vst.msk [vmem:[#allocation3 - $0x6] sm:$0xc0] %vm746_vm6, %v2306_v24 }
0x1e86   :  { %v2311_v41 = vld [vmem:[#allocation2 + $0x8] sm:$0xff]  ;;  %v2312_v45 = vld [vmem:[#allocation3] sm:$0xff] }
0x1e87   :  { %3874 = vmatmul.mubr.msk.f32.gmra.mrb[20].mxu1 %vm291_vm3, %v2311_v41 }
0x1e88   :  { %2512 = vmatprep.mubr.f32.mxu1 %v4674_v7 }
0x1e8b   :  { %3875 = vmatmul.mubr.msk.f32.vlgmr.msra.gmra.mrb[18].mxu1 %vm291_vm3, %v2312_v45 }
0x1e8c   :  { %2518 = vmatprep.mubr.f32.mxu1 %v4674_v7  ;;  %4323 = vmatpush1.bf16.msra.mxu1 %v5472_v18 }
0x1e8d   :  { %4325 = vmatprep.subr.bf16.mxu1 %v5492_v26 }
0x1e8f   :  { %3876 = vmatmul.mubr.msk.f32.gmra.mrb[20].mxu1 %vm291_vm3, %v2313_v8 }
0x1e90   :  { %4327 = vmatpush1.bf16.msra.mxu1 %v5494_v57  ;;  %2816 = vmatprep.mubr.f32.mxu1 %v4674_v7 }
0x1e91   :  { %4329 = vmatprep.subr.bf16.mxu1 %v5509_v0 }
0x1e94   :  { %4331 = vmatpush1.bf16.msra.mxu1 %v5524_v3 }
0x1e95   :  { %4333 = vmatprep.subr.bf16.mxu1 %v5552_v27 }
0x1e98   :  { %4335 = vmatpush1.bf16.msra.mxu1 %v5558_v37 }
0x1e99   :  { %4353 = vmatprep.subr.bf16.mxu1 %v5464_v29 }
0x1f5e   :  { %v2514_v34 = vpop.f32.mrb[18].mxu1 }
0x1f5f   :  { %v5615_v35 = vadd.f32 %v2514_v34, %v2352_v51  ;;  %v2516_v1 = vpop.f32.mrb[19].mxu1 }
0x1f60   :  { %v5617_v32 = vadd.f32 %v2516_v1, %v2356_v17 }
0x1f61   :  { %v2616_v40 = vadd.f32 %v5615_v35, %v2611_v13 }
0x1f62   :  { %v2617_v36 = vadd.f32 %v5617_v32, %v2613_v39  ;;  %v2520_v62 = vpop.f32.mrb[20].mxu1 }
0x1f63   :  { %v2618_v52 = vmul.f32 0.5, %v2616_v40  ;;  %v5621_v54 = vadd.f32 %v2520_v62, %v2352_v51  ;;  %v2522_v6 = vpop.f32.mrb[21].mxu1 }
0x1f64   :  { %v2619_v9 = vmul.f32 %v2617_v36, %v4826_v59  ;;  %v5624_v10 = vadd.f32 %v2522_v6, %v2356_v17 }
0x1f65   :  { %4576 = vtanh.f32 %v2618_v52 }
0x1f66   :  { %4578 = vtanh.f32 %v2619_v9 }
0x1f6f   :  { %v4577_v22 = vpop.eup %4576 }
0x1f70   :  { %v4579_v55 = vpop.eup %4578  ;;  %v2622_v61 = vmul.f32 0.5, %v4577_v22 }
0x1f71   :  { %v2623_v19 = vmul.f32 %v4579_v55, %v4826_v59 }
0x1f72   :  { %v2624_v21 = vadd.f32 0.5, %v2622_v61 }
0x1f73   :  { %v2625_v25 = vadd.f32 %v2623_v19, %v4834_v4 }
0x1f74   :  { %v2626_v30 = vmul.f32 0.0, %v2624_v21 }
0x1f75   :  { %v2627_v28 = vmul.f32 %v2625_v25, %v2624_v21 }
0x1f77   :  { %2629 = vrot.lane.b32.xlu0 %v2627_v28, %s4676_s0 }
0x1fe9   :  { %v2630_v31 = vpop.permute.xlu0 %2629 }
0x1fea   :  { %v2632_v47 = vadd.f32 %v2630_v31, %v2626_v30 }
0x1fec   :  { %4580 = vtanh.f32 %v2632_v47  ;;  %v2635_v45 = vmul.f32 %v2632_v47, %v4843_v20 }
0x1fee   :  { %v2731_v51 = vrot.slane %v2635_v45, 6 }
0x1ff6   :  { %v4581_v49 = vpop.eup %4580 }
0x1ff7   :  { %v2634_v2 = vmul.f32 %v4581_v49, %v2625_v25 }
0x1ff9   :  { %v5630_v48 = vmul.f32 %v2634_v2, %v4843_v20 }
0x1ffb   :  { %2639 = vrot.lane.b32.xlu1 %v5630_v48, %s4676_s0 }
0x206d   :  { %v2640_v5 = vpop.permute.xlu1 %2639 }
0x206e   :  { %3877 = vmatmul.mubr.msk.f32.vlgmr.msra.gmra.mrb[24].mxu0 %vm291_vm3, %v2640_v5 }
0x206f   :  { %4339 = vmatpush1.bf16.msra.mxu0 %v5472_v18  ;;  %2925 = vmatprep.mubr.f32.mxu0 %v4674_v7 }
0x2070   :  { %4341 = vmatprep.subr.bf16.mxu0 %v5492_v26 }
0x2073   :  { %4343 = vmatpush1.bf16.msra.mxu0 %v5494_v57 }
0x2074   :  { %4345 = vmatprep.subr.bf16.mxu0 %v5509_v0 }
0x2077   :  { %4347 = vmatpush1.bf16.msra.mxu0 %v5524_v3 }
0x2078   :  { %4349 = vmatprep.subr.bf16.mxu0 %v5552_v27 }
0x207b   :  { %4351 = vmatpush1.bf16.msra.mxu0 %v5558_v37 }
0x207c   :  { %4369 = vmatprep.subr.bf16.mxu0 %v5464_v29 }
0x2141   :  { %v2709_v53 = vpop.f32.mrb[24].mxu0 }
0x2142   :  { %v2716_v56 = vrot.slane %v2709_v53, 6  ;;  %v2711_v14 = vpop.f32.mrb[25].mxu0 }
0x2143   :  { %v2717_v38 = vrot.slane %v2711_v14, 6 }
0x2144   :  { %v2720_v12 = vadd.f32 %v5615_v35, %v2716_v56 }
0x2145   :  { %v2721_v15 = vadd.f32 %v5617_v32, %v2717_v38 }
0x2146   :  { %v2722_v24 = vmul.f32 0.5, %v2720_v12 }
0x2147   :  { %v2723_v41 = vmul.f32 %v2721_v15, %v4826_v59 }
0x2148   :  { %4582 = vtanh.f32 %v2722_v24 }
0x2149   :  { %4584 = vtanh.f32 %v2723_v41 }
0x2152   :  { %v4583_v8 = vpop.eup %4582 }
0x2153   :  { %v4585_v13 = vpop.eup %4584  ;;  %v2726_v39 = vmul.f32 0.5, %v4583_v8 }
0x2154   :  { %v2727_v23 = vmul.f32 %v4585_v13, %v4826_v59 }
0x2155   :  { %v2728_v17 = vadd.f32 0.5, %v2726_v39 }
0x2156   :  { %v2729_v34 = vadd.f32 %v2727_v23, %v4834_v4 }
0x2157   :  { %v2733_v1 = vmul.f32 %v2731_v51, %v2728_v17 }
0x2158   :  { %v2734_v40 = vmul.f32 %v2729_v34, %v2728_v17 }
0x215a   :  { %2736 = vrot.lane.b32.xlu0 %v2734_v40, %s4676_s0 }
0x21cc   :  { %v2737_v36 = vpop.permute.xlu0 %2736 }
0x21cd   :  { %v2739_v62 = vadd.f32 %v2737_v36, %v2733_v1 }
0x21cf   :  { %4586 = vtanh.f32 %v2739_v62  ;;  %v2742_v47 = vmul.f32 %v2739_v62, %v4870_v60 }
0x21d1   :  { %v2840_v56 = vrot.slane %v2742_v47, 6 }
0x21d9   :  { %v4587_v52 = vpop.eup %4586 }
0x21da   :  { %v2741_v6 = vmul.f32 %v4587_v52, %v2729_v34 }
0x21dc   :  { %v2743_v20 = vmul.f32 %v2741_v6, %v4870_v60 }
0x21de   :  { %v2745_v9 = vrot.slane %v2743_v20, 2 }
0x21e0   :  { %2748 = vrot.lane.b32.xlu1 %v2745_v9, %s4676_s0  ;;  %v2747_v13 = vadd.f32 %v2745_v9, %v5630_v48 }
0x2252   :  { %v2749_v22 = vpop.permute.xlu1 %2748 }
0x2253   :  { %3878 = vmatmul.mubr.msk.f32.vlgmr.msra.gmra.mrb[22].mxu1 %vm291_vm3, %v2749_v22 }
0x2254   :  { %4355 = vmatpush1.bf16.msra.mxu1 %v5472_v18  ;;  %3034 = vmatprep.mubr.f32.mxu1 %v4674_v7 }
0x2255   :  { %4357 = vmatprep.subr.bf16.mxu1 %v5492_v26 }
0x2258   :  { %4359 = vmatpush1.bf16.msra.mxu1 %v5494_v57 }
0x2259   :  { %4361 = vmatprep.subr.bf16.mxu1 %v5509_v0 }
0x225c   :  { %4363 = vmatpush1.bf16.msra.mxu1 %v5524_v3 }
0x225d   :  { %4365 = vmatprep.subr.bf16.mxu1 %v5552_v27 }
0x2260   :  { %4367 = vmatpush1.bf16.msra.mxu1 %v5558_v37 }
0x2261   :  { %4385 = vmatprep.subr.bf16.mxu1 %v5464_v29 }
0x2326   :  { %v2818_v55 = vpop.f32.mrb[22].mxu1 }
0x2327   :  { %v2825_v61 = vrot.slane %v2818_v55, 4  ;;  %v2820_v19 = vpop.f32.mrb[23].mxu1 }
0x2328   :  { %v2826_v21 = vrot.slane %v2820_v19, 4 }
0x2329   :  { %v2829_v25 = vadd.f32 %v5615_v35, %v2825_v61 }
0x232a   :  { %v2830_v28 = vadd.f32 %v5617_v32, %v2826_v21 }
0x232b   :  { %v2831_v30 = vmul.f32 0.5, %v2829_v25 }
0x232c   :  { %v2832_v31 = vmul.f32 %v2830_v28, %v4826_v59 }
0x232d   :  { %4588 = vtanh.f32 %v2831_v30 }
0x232e   :  { %4590 = vtanh.f32 %v2832_v31 }
0x2337   :  { %v4589_v49 = vpop.eup %4588 }
0x2338   :  { %v4591_v2 = vpop.eup %4590  ;;  %v2835_v5 = vmul.f32 0.5, %v4589_v49 }
0x2339   :  { %v2836_v53 = vmul.f32 %v4591_v2, %v4826_v59 }
0x233a   :  { %v2837_v14 = vadd.f32 0.5, %v2835_v5 }
0x233b   :  { %v2838_v38 = vadd.f32 %v2836_v53, %v4834_v4 }
0x233c   :  { %v2842_v12 = vmul.f32 %v2840_v56, %v2837_v14 }
0x233d   :  { %v2843_v15 = vmul.f32 %v2838_v38, %v2837_v14 }
0x233f   :  { %2845 = vrot.lane.b32.xlu0 %v2843_v15, %s4676_s0 }
0x23b1   :  { %v2846_v24 = vpop.permute.xlu0 %2845 }
0x23b2   :  { %v2848_v41 = vadd.f32 %v2846_v24, %v2842_v12 }
0x23b4   :  { %4592 = vtanh.f32 %v2848_v41  ;;  %v2851_v6 = vmul.f32 %v2848_v41, %v4898_v33 }
0x23b6   :  { %v2949_v55 = vrot.slane %v2851_v6, 6 }
0x23be   :  { %v4593_v45 = vpop.eup %4592 }
0x23bf   :  { %v2850_v8 = vmul.f32 %v4593_v45, %v2838_v38 }
0x23c1   :  { %v2852_v60 = vmul.f32 %v2850_v8, %v4898_v33 }
0x23c3   :  { %v2854_v39 = vrot.slane %v2852_v60, 4 }
0x23c5   :  { %2857 = vrot.lane.b32.xlu1 %v2854_v39, %s4676_s0  ;;  %v2856_v23 = vadd.f32 %v2854_v39, %v2747_v13 }
0x2437   :  { %v2858_v51 = vpop.permute.xlu1 %2857 }
0x2438   :  { %3879 = vmatmul.mubr.msk.f32.vlgmr.msra.gmra.mrb[26].mxu0 %vm291_vm3, %v2858_v51 }
0x2439   :  { %4371 = vmatpush1.bf16.msra.mxu0 %v5472_v18  ;;  %3135 = vmatprep.mubr.f32.mxu0 %v4674_v7 }
0x243a   :  { %4373 = vmatprep.subr.bf16.mxu0 %v5492_v26 }
0x243d   :  { %4375 = vmatpush1.bf16.msra.mxu0 %v5494_v57 }
0x243e   :  { %4377 = vmatprep.subr.bf16.mxu0 %v5509_v0 }
0x2441   :  { %4379 = vmatpush1.bf16.msra.mxu0 %v5524_v3 }
0x2442   :  { %4381 = vmatprep.subr.bf16.mxu0 %v5552_v27 }
0x2445   :  { %4383 = vmatpush1.bf16.msra.mxu0 %v5558_v37 }
0x2446   :  { %4401 = vmatprep.subr.bf16.mxu0 %v5464_v29 }
0x250b   :  { %v2927_v48 = vpop.f32.mrb[26].mxu0 }
0x250c   :  { %v2934_v17 = vrot.slane %v2927_v48, 2  ;;  %v2929_v34 = vpop.f32.mrb[27].mxu0 }
0x250d   :  { %v2935_v1 = vrot.slane %v2929_v34, 2 }
0x250e   :  { %v2938_v40 = vadd.f32 %v5615_v35, %v2934_v17 }
0x250f   :  { %v2939_v36 = vadd.f32 %v5617_v32, %v2935_v1 }
0x2510   :  { %v2940_v62 = vmul.f32 0.5, %v2938_v40 }
0x2511   :  { %v2941_v52 = vmul.f32 %v2939_v36, %v4826_v59 }
0x2512   :  { %4594 = vtanh.f32 %v2940_v62 }
0x2513   :  { %4596 = vtanh.f32 %v2941_v52 }
0x251c   :  { %v4595_v20 = vpop.eup %4594 }
0x251d   :  { %v4597_v9 = vpop.eup %4596  ;;  %v2944_v22 = vmul.f32 0.5, %v4595_v20 }
0x251e   :  { %v2945_v29 = vmul.f32 %v4597_v9, %v4826_v59 }
0x251f   :  { %v2946_v61 = vadd.f32 0.5, %v2944_v22 }
0x2520   :  { %v2947_v19 = vadd.f32 %v2945_v29, %v4834_v4 }
0x2521   :  { %v2951_v21 = vmul.f32 %v2949_v55, %v2946_v61 }
0x2522   :  { %v2952_v35 = vmul.f32 %v2947_v19, %v2946_v61 }
0x2524   :  { %2954 = vrot.lane.b32.xlu0 %v2952_v35, %s4676_s0 }
0x2596   :  { %v2955_v32 = vpop.permute.xlu0 %2954 }
0x2597   :  { %v2957_v25 = vadd.f32 %v2955_v32, %v2951_v21 }
0x2599   :  { %4598 = vtanh.f32 %v2957_v25  ;;  %v2960_v12 = vmul.f32 %v2957_v25, %v4926_v11 }
0x259b   :  { %v3052_v8 = vrot.slane %v2960_v12, 6 }
0x25a3   :  { %v4599_v28 = vpop.eup %4598 }
0x25a4   :  { %v2959_v30 = vmul.f32 %v4599_v28, %v2947_v19 }
0x25a6   :  { %v2961_v33 = vmul.f32 %v2959_v30, %v4926_v11 }
0x25a8   :  { %v2963_v31 = vrot.slane %v2961_v33, 6 }
0x25aa   :  { %2966 = vrot.lane.b32.xlu1 %v2963_v31, %s4676_s0  ;;  %v2965_v47 = vadd.f32 %v2963_v31, %v2856_v23 }
0x261c   :  { %v2967_v49 = vpop.permute.xlu1 %2966 }
0x261d   :  { %3880 = vmatmul.mubr.msk.f32.vlgmr.msra.gmra.mrb[24].mxu1 %vm291_vm3, %v2967_v49 }
0x261e   :  { %4387 = vmatpush1.bf16.msra.mxu1 %v5472_v18  ;;  %3244 = vmatprep.mubr.f32.mxu1 %v4674_v7 }
0x261f   :  { %4389 = vmatprep.subr.bf16.mxu1 %v5492_v26 }
0x2622   :  { %4391 = vmatpush1.bf16.msra.mxu1 %v5494_v57 }
0x2623   :  { %4393 = vmatprep.subr.bf16.mxu1 %v5509_v0 }
0x2626   :  { %4395 = vmatpush1.bf16.msra.mxu1 %v5524_v3 }
0x2627   :  { %4397 = vmatprep.subr.bf16.mxu1 %v5552_v27 }
0x262a   :  { %4399 = vmatpush1.bf16.msra.mxu1 %v5558_v37 }
0x26f0   :  { %v3036_v2 = vpop.f32.mrb[24].mxu1 }
0x26f1   :  { %v3041_v5 = vadd.f32 %v5621_v54, %v3036_v2  ;;  %v3038_v53 = vpop.f32.mrb[25].mxu1 }
0x26f2   :  { %v3042_v56 = vadd.f32 %v5624_v10, %v3038_v53 }
0x26f3   :  { %v3043_v14 = vmul.f32 0.5, %v3041_v5 }
0x26f4   :  { %v3044_v38 = vmul.f32 %v3042_v56, %v4826_v59 }
0x26f5   :  { %4600 = vtanh.f32 %v3043_v14 }
0x26f6   :  { %4602 = vtanh.f32 %v3044_v38 }
0x26ff   :  { %v4601_v15 = vpop.eup %4600 }
0x2700   :  { %v4603_v24 = vpop.eup %4602  ;;  %v3047_v41 = vmul.f32 0.5, %v4601_v15 }
0x2701   :  { %v3048_v45 = vmul.f32 %v4603_v24, %v4826_v59 }
0x2702   :  { %v3049_v60 = vadd.f32 0.5, %v3047_v41 }
0x2703   :  { %v3050_v13 = vadd.f32 %v3048_v45, %v4834_v4 }
0x2704   :  { %v3054_v39 = vmul.f32 %v3052_v8, %v3049_v60 }
0x2705   :  { %v3055_v23 = vmul.f32 %v3050_v13, %v3049_v60 }
0x2707   :  { %3057 = vrot.lane.b32.xlu0 %v3055_v23, %s4676_s0 }
0x2779   :  { %v3058_v51 = vpop.permute.xlu0 %3057 }
0x277a   :  { %v3060_v48 = vadd.f32 %v3058_v51, %v3054_v39 }
0x277c   :  { %4604 = vtanh.f32 %v3060_v48 }
0x2786   :  { %v4605_v17 = vpop.eup %4604 }
0x2787   :  { %v3062_v34 = vmul.f32 %v4605_v17, %v3050_v13 }
0x2789   :  { %v3064_v11 = vmul.f32 %v3062_v34, %v4953_v50 }
0x278b   :  { %3067 = vrot.lane.b32.xlu1 %v3064_v11, %s4676_s0  ;;  %v3065_v1 = vadd.f32 %v3064_v11, %v2965_v47 }
0x27fd   :  { %v3068_v40 = vpop.permute.xlu1 %3067 }
0x27fe   :  { %3881 = vmatmul.mubr.msk.f32.vlgmr.msra.gmra.mrb[28].mxu0 %vm291_vm3, %v3068_v40 }
0x27ff   :  { %4403 = vmatpush1.bf16.msra.mxu0 %v5472_v18  ;;  %3353 = vmatprep.mubr.f32.mxu0 %v4674_v7 }
0x2800   :  { %4405 = vmatprep.subr.bf16.mxu0 %v5492_v26 }
0x2803   :  { %4407 = vmatpush1.bf16.msra.mxu0 %v5494_v57  ;;  %v3063_v57 = vmul.f32 %v3060_v48, %v4953_v50 }
0x2804   :  { %4409 = vmatprep.subr.bf16.mxu0 %v5509_v0 }
0x2805   :  { %v3159_v22 = vrot.slane %v3063_v57, 6 }
0x2807   :  { %4411 = vmatpush1.bf16.msra.mxu0 %v5524_v3 }
0x2808   :  { %4413 = vmatprep.subr.bf16.mxu0 %v5552_v27 }
0x280b   :  { %4415 = vmatpush1.bf16.msra.mxu0 %v5558_v37 }
0x28d1   :  { %v3137_v36 = vpop.f32.mrb[28].mxu0 }
0x28d2   :  { %v3144_v62 = vrot.slane %v3137_v36, 6  ;;  %v3139_v52 = vpop.f32.mrb[29].mxu0 }
0x28d3   :  { %v3145_v6 = vrot.slane %v3139_v52, 6 }
0x28d4   :  { %v3148_v18 = vadd.f32 %v5621_v54, %v3144_v62 }
0x28d5   :  { %v3149_v20 = vadd.f32 %v5624_v10, %v3145_v6 }
0x28d6   :  { %v3150_v9 = vmul.f32 0.5, %v3148_v18 }
0x28d7   :  { %v3151_v26 = vmul.f32 %v3149_v20, %v4826_v59 }
0x28d8   :  { %4606 = vtanh.f32 %v3150_v9 }
0x28d9   :  { %4608 = vtanh.f32 %v3151_v26 }
0x28e2   :  { %v4607_v0 = vpop.eup %4606 }
0x28e3   :  { %v4609_v3 = vpop.eup %4608  ;;  %v3154_v27 = vmul.f32 0.5, %v4607_v0 }
0x28e4   :  { %v3155_v37 = vmul.f32 %v4609_v3, %v4826_v59 }
0x28e5   :  { %v3156_v29 = vadd.f32 0.5, %v3154_v27 }
0x28e6   :  { %v3157_v55 = vadd.f32 %v3155_v37, %v4834_v4 }
0x28e7   :  { %v3161_v61 = vmul.f32 %v3159_v22, %v3156_v29 }
0x28e8   :  { %v3162_v19 = vmul.f32 %v3157_v55, %v3156_v29 }
0x28ea   :  { %3164 = vrot.lane.b32.xlu0 %v3162_v19, %s4676_s0  ;;  %v3398_v19 = vld [vmem:[%s5889_s6 + $0x18] sm:$0xff] }
0x295c   :  { %v3165_v21 = vpop.permute.xlu0 %3164 }
0x295d   :  { %v3167_v35 = vadd.f32 %v3165_v21, %v3161_v61  ;;  %v4677_v61 = vmov 0.0|0.0  }
0x295e   :  { %4416 = vmatprep.subr.bf16.mxu1 %v4677_v61  ;;  %4428 = vmatprep.subr.bf16.mxu0 %v4677_v61 }
0x295f   :  { %4610 = vtanh.f32 %v3167_v35  ;;  %v3170_v38 = vmul.f32 %v3167_v35, %v4979_v16  ;;  %v3399_v35 = vld [vmem:[%s5889_s6 + $0x20] sm:$0xff] }
0x2961   :  { %v3268_v45 = vrot.slane %v3170_v38, 6 }
0x2969   :  { %v4611_v32 = vpop.eup %4610 }
0x296a   :  { %v3169_v25 = vmul.f32 %v4611_v32, %v3157_v55  ;;  %v3400_v32 = vld [vmem:[%s5889_s6 + $0x28] sm:$0xff] }
0x296c   :  { %v3171_v50 = vmul.f32 %v3169_v25, %v4979_v16  ;;  %v4423_v25 = vpack.c.bf16 %v3400_v32, %v3399_v35  ;;  %v3572_v32 = vadd.s32 4294967288, %v4808_v43 }
0x296e   :  { %v3173_v28 = vrot.slane %v3171_v50, 2  ;;  %v3401_v50 = vld [vmem:[%s5889_s6 + $0x30] sm:$0xff] }
0x2970   :  { %3176 = vrot.lane.b32.xlu1 %v3173_v28, %s4676_s0  ;;  %v3175_v30 = vadd.f32 %v3173_v28, %v3065_v1  ;;  %v3402_v28 = vld [vmem:[%s5889_s6 + $0x38] sm:$0xff] }
0x29e2   :  { %v3177_v33 = vpop.permute.xlu1 %3176 }
0x29e3   :  { %3882 = vmatmul.mubr.msk.f32.vlgmr.msra.gmra.mrb[26].mxu1 %vm291_vm3, %v3177_v33 }
0x29e4   :  { %3927 = vmatprep.mubr.msk.f32.mxu1 %vm4678_vm7, %v4674_v7 }
0x2ab6   :  { %v3246_v31 = vpop.f32.mrb[26].mxu1 }
0x2ab7   :  { %v3253_v47 = vrot.slane %v3246_v31, 4  ;;  %v3248_v49 = vpop.f32.mrb[27].mxu1 }
0x2ab8   :  { %v3254_v2 = vrot.slane %v3248_v49, 4 }
0x2ab9   :  { %v3257_v5 = vadd.f32 %v5621_v54, %v3253_v47 }
0x2aba   :  { %v3258_v53 = vadd.f32 %v5624_v10, %v3254_v2 }
0x2abb   :  { %v3259_v56 = vmul.f32 0.5, %v3257_v5 }
0x2abc   :  { %v3260_v14 = vmul.f32 %v3258_v53, %v4826_v59  ;;  %v3393_v53 = vstv %s64_s27 }
0x2abd   :  { %4612 = vtanh.f32 %v3259_v56 }
0x2abe   :  { %4614 = vtanh.f32 %v3260_v14 }
0x2ac7   :  { %v4613_v12 = vpop.eup %4612 }
0x2ac8   :  { %v4615_v15 = vpop.eup %4614  ;;  %v3263_v24 = vmul.f32 0.5, %v4613_v12  ;;  %v4679_v12 = vmov 1966171168  }
0x2ac9   :  { %v3264_v41 = vmul.f32 %v4615_v15, %v4826_v59  ;;  %v3493_v15 = vunpack.c.l.s4 %v4679_v12 }
0x2aca   :  { %v3265_v8 = vadd.f32 0.5, %v3263_v24  ;;  %v5788_v24 = vld [vmem:[%s5889_s6 + $0x80] sm:$0xf] }
0x2acb   :  { %v3266_v60 = vadd.f32 %v3264_v41, %v4834_v4  ;;  %v3415_v41 = vrot.slane %v5788_v24, %v4811_v44 }
0x2acc   :  { %v3270_v13 = vmul.f32 %v3268_v45, %v3265_v8 }
0x2acd   :  { %v3271_v39 = vmul.f32 %v3266_v60, %v3265_v8 }
0x2acf   :  { %3273 = vrot.lane.b32.xlu0 %v3271_v39, %s4676_s0 }
0x2b41   :  { %v3274_v23 = vpop.permute.xlu0 %3273 }
0x2b42   :  { %v3276_v51 = vadd.f32 %v3274_v23, %v3270_v13 }
0x2b44   :  { %4616 = vtanh.f32 %v3276_v51  ;;  %v3279_v26 = vmul.f32 %v3276_v51, %v4996_v58 }
0x2b46   :  { %v3377_v37 = vrot.slane %v3279_v26, 6 }
0x2b4e   :  { %v4617_v48 = vpop.eup %4616 }
0x2b4f   :  { %v3278_v17 = vmul.f32 %v4617_v48, %v3266_v60  ;;  %v3403_v48 = vld [vmem:[%s5889_s6 + $0x40] sm:$0xff] }
0x2b51   :  { %v3280_v16 = vmul.f32 %v3278_v17, %v4996_v58  ;;  %v3396_v58 = vld [vmem:[%s5889_s6 + $0x8] sm:$0xff] }
0x2b53   :  { %v3282_v34 = vrot.slane %v3280_v16, 4 }
0x2b55   :  { %3285 = vrot.lane.b32.xlu1 %v3282_v34, %s4676_s0  ;;  %v3284_v11 = vadd.f32 %v3282_v34, %v3175_v30  ;;  %v4426_v30 = vpack.c.bf16 %v3402_v28, %v3401_v50  ;;  %v3405_v34 = vld [vmem:[%s5889_s6 + $0x50] sm:$0xff]  ;;  %v3586_v28 = vadd.s32 4294967272, %v4808_v43 }
0x2bc7   :  { %v3286_v1 = vpop.permute.xlu1 %3285 }
0x2bc8   :  { %3883 = vmatmul.mubr.msk.f32.vlgmr.msra.gmra.mrb[30].mxu0 %vm291_vm3, %v3286_v1 }
0x2bc9   :  { %3938 = vmatprep.mubr.msk.f32.mxu0 %vm4678_vm7, %v4674_v7 }
0x2c9b   :  { %v3355_v40 = vpop.f32.mrb[30].mxu0 }
0x2c9c   :  { %v3362_v36 = vrot.slane %v3355_v40, 2  ;;  %v3357_v62 = vpop.f32.mrb[31].mxu0 }
0x2c9d   :  { %v3363_v52 = vrot.slane %v3357_v62, 2 }
0x2c9e   :  { %v3366_v6 = vadd.f32 %v5621_v54, %v3362_v36 }
0x2c9f   :  { %v3367_v18 = vadd.f32 %v5624_v10, %v3363_v52  ;;  %v3395_v10 = vld [vmem:[%s5889_s6] sm:$0xff] }
0x2ca0   :  { %v3368_v20 = vmul.f32 0.5, %v3366_v6 }
0x2ca1   :  { %v3369_v9 = vmul.f32 %v3367_v18, %v4826_v59  ;;  %v3406_v18 = vld [vmem:[%s5889_s6 + $0x58] sm:$0xff] }
0x2ca2   :  { %4618 = vtanh.f32 %v3368_v20 }
0x2ca3   :  { %4620 = vtanh.f32 %v3369_v9 }
0x2cac   :  { %v4619_v57 = vpop.eup %4618 }
0x2cad   :  { %v4621_v0 = vpop.eup %4620  ;;  %v3372_v3 = vmul.f32 0.5, %v4619_v57 }
0x2cae   :  { %v3373_v27 = vmul.f32 %v4621_v0, %v4826_v59  ;;  %v3397_v59 = vld [vmem:[%s5889_s6 + $0x10] sm:$0xff] }
0x2caf   :  { %v3374_v22 = vadd.f32 0.5, %v3372_v3  ;;  %v4420_v21 = vpack.c.bf16 %v3398_v19, %v3397_v59  ;;  %v3410_v59 = vld [vmem:[%s5889_s6 + $0x78] sm:$0xff] }
0x2cb0   :  { %v3375_v29 = vadd.f32 %v3373_v27, %v4834_v4  ;;  %v4417_v4 = vpack.c.bf16 %v3396_v58, %v3395_v10  ;;  %v3409_v58 = vld [vmem:[%s5889_s6 + $0x70] sm:$0xff] }
0x2cb1   :  { %v3379_v55 = vmul.f32 %v3377_v37, %v3374_v22 }
0x2cb2   :  { %v3380_v54 = vmul.f32 %v3375_v29, %v3374_v22  ;;  %4418 = vmatpush3.bf16.msra.mxu1 %v4417_v4  ;;  %v4432_v4 = vpack.c.bf16 %v3410_v59, %v3409_v58  ;;  %v3708_v58 = vsub.s32 3, %v4806_v42 }
0x2cb3   :  { %4419 = vmatprep.subr.bf16.mxu1 %v4677_v61 }
0x2cb4   :  { %3382 = vrot.lane.b32.xlu0 %v3380_v54, %s4676_s0  ;;  %v3408_v54 = vld [vmem:[%s5889_s6 + $0x68] sm:$0xff] }
0x2cb6   :  { %4421 = vmatpush3.bf16.msra.mxu1 %v4420_v21 }
0x2cb7   :  { %4422 = vmatprep.subr.bf16.mxu1 %v4677_v61 }
0x2cba   :  { %4424 = vmatpush3.bf16.msra.mxu1 %v4423_v25  ;;  %v3579_v25 = vadd.s32 4294967280, %v4808_v43 }
0x2cbb   :  { %4425 = vmatprep.subr.bf16.mxu1 %v4677_v61 }
0x2cbe   :  { %4427 = vmatpush3.bf16.msra.mxu1 %v4426_v30 }
0x2cbf   :  { %4434 = vmatprep.subr.bf16.mxu1 %v4677_v61 }
0x2d26   :  { %v3383_v33 = vpop.permute.xlu0 %3382 }
0x2d27   :  { %v3385_v31 = vadd.f32 %v3383_v33, %v3379_v55  ;;  %v3407_v55 = vld [vmem:[%s5889_s6 + $0x60] sm:$0xff]  ;;  %v3575_v33 = vsub.s32 %v3572_v32, %v4806_v42 }
0x2d28   :  { %v4429_v10 = vpack.c.bf16 %v3408_v54, %v3407_v55 }
0x2d29   :  { %4622 = vtanh.f32 %v3385_v31  ;;  %v3570_v31 = vsub.s32 %v4808_v43, %v4806_v42 }
0x2d2a   :  { %4430 = vmatpush3.bf16.msra.mxu0 %v4429_v10  ;;  %v3703_v10 = vsub.s32 2, %v4806_v42 }
0x2d2b   :  { %4431 = vmatprep.subr.bf16.mxu0 %v4677_v61 }
0x2d2c   :  { %v3704_v59 = vrot.slane %v5788_v24, %v3703_v10 }
0x2d2e   :  { %4433 = vmatpush3.bf16.msra.mxu0 %v4432_v4 }
0x2d33   :  { %v4623_v47 = vpop.eup %4622 }
0x2d34   :  { %v3387_v49 = vmul.f32 %v4623_v47, %v3375_v29  ;;  %v3582_v47 = vsub.s32 %v3579_v25, %v4806_v42 }
0x2d36   :  { %v3388_v2 = vmul.f32 %v3387_v49, %v5012_v63  ;;  %v3494_v63 = vunpack.c.0.s8 %v3493_v15  ;;  %v3589_v49 = vsub.s32 %v3586_v28, %v4806_v42 }
0x2d38   :  { %v3390_v5 = vrot.slane %v3388_v2, 6  ;;  %v3497_v45 = vsub.s32 %v3494_v63, %v4806_v42 }
0x2d3a   :  { %v3392_v56 = vadd.f32 %v3390_v5, %v3284_v11 }
0x2d3c   :  { %v3394_v14 = vmul.f32 %v3393_v53, %v3392_v56 }
0x2d3e   :  { %3417 = vrot.lane.b32.xlu1 %v3394_v14, %s4676_s0 }
0x2db0   :  { %v3418_v38 = vpop.permute.xlu1 %3417 }
0x2db1   :  { %3928 = vmatmul.mubr.msk.f32.vlgmr.msra.gmra.mrb[28].mxu1 %vm291_vm3, %v3418_v38 }
0x2db2   :  { %3957 = vmatprep.mubr.msk.f32.mxu1 %vm4678_vm7, %v4674_v7  ;;  %v3404_v7 = vld [vmem:[%s5889_s6 + $0x48] sm:$0xff] }
0x2e84   :  { %v3487_v8 = vpop.f32.mrb[28].mxu1 }
0x2e85   :  { %v3488_v60 = vadd.f32 %v3487_v8, %v3415_v41  ;;  %v3929_v13 = vpop.f32.mrb[29].mxu1 }
0x2e87   :  { %v3498_v39 = vrot.slane %v3488_v60, %v3497_v45 }
0x2e89   :  { %v3499_v23 = vcombine.high %v3498_v39, %v3498_v39  ;;  %v3506_v51 = vrot.slane %v3498_v39, %v3497_v45 }
0x2e8b   :  { %v3513_v17 = vrot.slane %v3499_v23, %v3497_v45  ;;  %v3517_v16 = vrot.slane %v3506_v51, %v4811_v44 }
0x2e8d   :  { %v3521_v11 = vrot.slane %v3513_v17, %v4811_v44  ;;  %v3525_v1 = vadd.f32 %v3517_v16, %v3404_v7  ;;  %v3524_v40 = vadd.f32 %v3517_v16, %v3403_v48  ;;  %v3526_v52 = vadd.f32 %v3517_v16, %v3405_v34 }
0x2e8e   :  { %v3527_v26 = vadd.f32 %v3517_v16, %v3406_v18 }
0x2e8f   :  { %v3535_v36 = vsel %vm291_vm3, %v3525_v1, -inf  ;;  %v3532_v62 = vsel %vm291_vm3, %v3524_v40, -inf  ;;  %v3528_v6 = vadd.f32 %v3521_v11, %v3403_v48  ;;  %v3538_v20 = vsel %vm291_vm3, %v3526_v52, -inf  ;;  %v3712_v52 = vld [vmem:[%s5890_s7] sm:$0xff] }
0x2e90   :  { %3536 = vmax.xlane.f32.xlu1 %v3535_v36  ;;  %3533 = vmax.xlane.f32.xlu0 %v3532_v62  ;;  %v3529_v57 = vadd.f32 %v3521_v11, %v3404_v7  ;;  %v3541_v0 = vsel %vm291_vm3, %v3527_v26, -inf  ;;  %v3530_v27 = vadd.f32 %v3521_v11, %v3405_v34  ;;  %v3531_v22 = vadd.f32 %v3521_v11, %v3406_v18 }
0x2e91   :  { %v3544_v9 = vsel %vm291_vm3, %v3528_v6, -inf  ;;  %v3559_v7 = vrot.slane %v5788_v24, %v4814_v46  ;;  %v3713_v6 = vld [vmem:[%s5890_s7 + $0x8] sm:$0xff] }
0x2e92   :  { %v3547_v3 = vsel %vm291_vm3, %v3529_v57, -inf  ;;  %v3550_v37 = vsel %vm291_vm3, %v3530_v27, -inf  ;;  %v3553_v29 = vsel %vm291_vm3, %v3531_v22, -inf  ;;  %v4435_v18 = vpack.c.bf16 %v3713_v6, %v3712_v52  ;;  %v3716_v57 = vld [vmem:[%s5890_s7 + $0x20] sm:$0xff]  ;;  %v3718_v27 = vld [vmem:[%s5890_s7 + $0x30] sm:$0xff] }
0x2e94   :  { %3539 = vmax.xlane.f32.xlu1 %v3538_v20  ;;  %3545 = vmax.xlane.f32.xlu0 %v3544_v9  ;;  %v3714_v20 = vld [vmem:[%s5890_s7 + $0x10] sm:$0xff]  ;;  %v3715_v9 = vld [vmem:[%s5890_s7 + $0x18] sm:$0xff] }
0x2e95   :  { %4436 = vmatpush3.bf16.msra.mxu1 %v4435_v18  ;;  %v4438_v26 = vpack.c.bf16 %v3715_v9, %v3714_v20 }
0x2e96   :  { %4437 = vmatprep.subr.bf16.mxu1 %v4677_v61 }
0x2e98   :  { %3542 = vmax.xlane.f32.xlu1 %v3541_v0  ;;  %3548 = vmax.xlane.f32.xlu0 %v3547_v3  ;;  %v3717_v0 = vld [vmem:[%s5890_s7 + $0x28] sm:$0xff] }
0x2e99   :  { %4439 = vmatpush3.bf16.msra.mxu1 %v4438_v26  ;;  %v4441_v3 = vpack.c.bf16 %v3717_v0, %v3716_v57 }
0x2e9a   :  { %4440 = vmatprep.subr.bf16.mxu1 %v4677_v61 }
0x2e9c   :  { %3551 = vmax.xlane.f32.xlu0 %v3550_v37  ;;  %v3719_v37 = vld [vmem:[%s5890_s7 + $0x38] sm:$0xff] }
0x2e9d   :  { %4442 = vmatpush3.bf16.msra.mxu1 %v4441_v3  ;;  %v4444_v22 = vpack.c.bf16 %v3719_v37, %v3718_v27 }
0x2e9e   :  { %4443 = vmatprep.subr.bf16.mxu1 %v4677_v61  ;;  %v3720_v61 = vld [vmem:[%s5890_s7 + $0x40] sm:$0xf]  ;;  %s3848_s7 = sld [smem:[#allocation4 + $0x1]] }
0x2ea0   :  { %3554 = vmax.xlane.f32.xlu0 %v3553_v29 }
0x2ea1   :  { %4445 = vmatpush3.bf16.msra.mxu1 %v4444_v22 }
0x2f1d   :  { %v3537_v19 = vpop.xlane.xlu1 %3536  ;;  %v3534_v21 = vpop.xlane.xlu0 %3533 }
0x2f1e   :  { %v3576_v53 = vrot.slane %v3537_v19, %v3575_v33  ;;  %v3571_v56 = vrot.slane %v3534_v21, %v3570_v31  ;;  %v3709_v19 = vrot.slane %v5788_v24, %v3708_v58 }
0x2f20   :  { %v3578_v45 = vsel %vm3577_vm8, %v3576_v53, %v3571_v56 }
0x2f21   :  { %v3546_v35 = vpop.xlane.xlu0 %3545  ;;  %v3540_v50 = vpop.xlane.xlu1 %3539 }
0x2f22   :  { %v3583_v38 = vrot.slane %v3540_v50, %v3582_v47  ;;  %v3596_v15 = vrot.slane %v3546_v35, %v3570_v31  ;;  %v3724_v50 = vrot.slane %v3720_v61, %v4811_v44  ;;  %v3816_v44 = vrot.slane %v3720_v61, %v4814_v46 }
0x2f24   :  { %v3585_v60 = vsel %vm3584_vm9, %v3583_v38, %v3578_v45 }
0x2f25   :  { %v3549_v30 = vpop.xlane.xlu0 %3548  ;;  %v3543_v2 = vpop.xlane.xlu1 %3542 }
0x2f26   :  { %v3600_v14 = vrot.slane %v3549_v30, %v3575_v33  ;;  %v3590_v63 = vrot.slane %v3543_v2, %v3589_v49 }
0x2f28   :  { %v3601_v8 = vsel %vm3577_vm8, %v3600_v14, %v3596_v15  ;;  %v3592_v39 = vsel %vm3591_vm10, %v3590_v63, %v3585_v60  ;;  %v3832_v60 = vstv %s3848_s7 }
0x2f29   :  { %v3552_v5 = vpop.xlane.xlu0 %3551 }
0x2f2a   :  { %v3605_v12 = vrot.slane %v3552_v5, %v3582_v47 }
0x2f2c   :  { %v3606_v13 = vsel %vm3584_vm9, %v3605_v12, %v3601_v8  ;;  %v3821_v12 = vrot.slane %v3720_v61, %v3703_v10 }
0x2f2d   :  { %v3555_v41 = vpop.xlane.xlu0 %3554 }
0x2f2e   :  { %v3610_v43 = vrot.slane %v3555_v41, %v3589_v49  ;;  %v3827_v41 = vrot.slane %v3720_v61, %v3708_v58 }
0x2f30   :  { %v3611_v23 = vsel %vm3591_vm10, %v3610_v43, %v3606_v13 }
0x2f31   :  { %v3613_v51 = vsel %vm3612_vm11, %v3611_v23, %v3592_v39 }
0x2f32   :  { %3939 = vmatmul.mubr.msk.f32.vlgmr.msra.gmra.mrb[32].mxu0 %vm3614_vm12, %v3613_v51 }
0x3005   :  { %v3683_v48 = vpop.f32.mrb[32].mxu0 }
0x3006   :  { %v3684_v17 = vadd.f32 %v3683_v48, %v3559_v7  ;;  %v3940_v16 = vpop.f32.mrb[33].mxu0 }
0x3008   :  { %v3687_v34 = vsel %vm395_vm2, %v3684_v17, 0.0 }
0x3009   :  { %3688 = vadd.xlane.f32.xlu1 %v3687_v34 }
0x3096   :  { %v3689_v11 = vpop.xlane.xlu1 %3688 }
0x3097   :  { %v3691_v1 = vmul.f32 0.015625, %v3689_v11 }
0x3099   :  { %v3692_v40 = vsub.f32 %v3684_v17, %v3691_v1 }
0x309b   :  { %v3693_v36 = vmul.f32 %v3692_v40, %v3692_v40 }
0x309d   :  { %v3694_v62 = vsel %vm395_vm2, %v3693_v36, 0.0 }
0x309e   :  { %3695 = vadd.xlane.f32.xlu0 %v3694_v62 }
0x312b   :  { %v3696_v29 = vpop.xlane.xlu0 %3695 }
0x312c   :  { %v3697_v55 = vmul.f32 0.015625, %v3696_v29 }
0x312e   :  { %v3698_v54 = vadd.f32 1e-05, %v3697_v55 }
0x3130   :  { %4624 = vrsqrt.f32 %v3698_v54 }
0x313a   :  { %v4625_v4 = vpop.eup %4624 }
0x313b   :  { %v3700_v21 = vmul.f32 %v4625_v4, %v3692_v40 }
0x313d   :  { %v3705_v35 = vmul.f32 %v3704_v59, %v3700_v21 }
0x313f   :  { %v3710_v32 = vadd.f32 %v3709_v19, %v3705_v35 }
0x3141   :  { %v3711_v25 = vmax.f32 %v3710_v32, 0.0 }
0x3143   :  { %3958 = vmatmul.mubr.msk.f32.vlgmr.msra.gmra.mrb[30].mxu1 %vm291_vm3, %v3711_v25 }
0x3216   :  { %v3794_v28 = vpop.f32.mrb[30].mxu1 }
0x3217   :  { %v3795_v42 = vadd.f32 %v3794_v28, %v3724_v50  ;;  %v3959_v30 = vpop.f32.mrb[31].mxu1 }
0x3219   :  { %v3799_v33 = vsel %vm3798_vm13, %v3795_v42, 0.0 }
0x321a   :  { %3800 = vadd.xlane.f32.xlu1 %v3799_v33 }
0x32a7   :  { %v3801_v24 = vpop.xlane.xlu1 %3800 }
0x32a8   :  { %v3803_v31 = vmul.f32 0.03125, %v3801_v24 }
0x32aa   :  { %v3804_v47 = vsub.f32 %v3795_v42, %v3803_v31 }
0x32ac   :  { %v3805_v49 = vmul.f32 %v3804_v47, %v3804_v47 }
0x32ae   :  { %v3806_v2 = vsel %vm3798_vm13, %v3805_v49, 0.0 }
0x32af   :  { %3807 = vadd.xlane.f32.xlu0 %v3806_v2 }
0x333c   :  { %v3808_v5 = vpop.xlane.xlu0 %3807 }
0x333d   :  { %v3809_v53 = vmul.f32 0.03125, %v3808_v5 }
0x333f   :  { %v3810_v56 = vadd.f32 1e-05, %v3809_v53 }
0x3341   :  { %4626 = vrsqrt.f32 %v3810_v56 }
0x334b   :  { %v4627_v14 = vpop.eup %4626 }
0x334c   :  { %v3812_v38 = vmul.f32 %v4627_v14, %v3804_v47 }
0x334e   :  { %v3817_v15 = vmul.f32 %v3816_v44, %v3812_v38 }
0x3350   :  { %v3822_v63 = vadd.f32 %v3821_v12, %v3817_v15 }
0x3352   :  { %v3823_v45 = vmax.f32 %v3822_v63, 0.0 }
0x3354   :  { %v3828_v8 = vmul.f32 %v3827_v41, %v3823_v45 }
0x3356   :  { %v3829_v43 = vsel %vm3798_vm13, %v3828_v8, 0.0 }
0x3357   :  { %3830 = vadd.xlane.f32.xlu1 %v3829_v43 }
0x33e4   :  { %v3831_v13 = vpop.xlane.xlu1 %3830 }
0x33e5   :  { %v3833_v39 = vadd.f32 %v3832_v60, %v3831_v13 }
0x33e7   :  { %v3887_v23 = vmul.f32 -1.442695, %v3833_v39 }
0x33e9   :  { %4628 = vpow2.f32 %v3887_v23 }
0x33f3   :  { %v4629_v51 = vpop.eup %4628 }
0x33f4   :  { %v3837_v7 = vadd.f32 1.0, %v4629_v51 }
0x33f6   :  { %4630 = vrcp.f32 %v3837_v7 }
0x3400   :  { %v4631_v46 = vpop.eup %4630 }
0x3401   :  { %3841 = vst.msk [vmem:[%s5891_s8] sm:$0x3] %vm3840_vm14, %v4631_v46 }
0x3402   :  { %3846 = vsyncpa [#allocation5], 1 }
0x3403   :  { %3847 = vsyncpa [#allocation6], 1 }

</bundles_post_ra>
